<compile_context>
chip_gen: v5e
topology: v5e:2x2
jax: 0.10.0
libtpu: 0.0.40
codegen_flags: <defaults>
</compile_context>

<pallas_src>
import jax
import jax.numpy as jnp
from jax.experimental import pallas as pl
from jax.experimental.pallas import tpu as pltpu


def _round_up(x, m):
    return (x + m - 1) // m * m


# --------------------------- stage 1: HW = H @ W^T ---------------------------
def _hw_kernel(h_ref, w_ref, o_ref):
    # h_ref: [TM, F_pad] bf16, w_ref: [F_pad, F_out] bf16, o_ref: [TM, F_out] bf16
    o_ref[...] = jnp.dot(
        h_ref[...], w_ref[...], preferred_element_type=jnp.float32
    ).astype(o_ref.dtype)


# ---------------------- stage 2: OUT = relu(A @ HW + b) ----------------------
def _agg_kernel(a_ref, hw_ref, b_ref, o_ref, acc_ref):
    # a_ref:  [TM, TK] bf16 block of dense normalized adjacency
    # hw_ref: [TK, F_out] bf16 block of H @ W^T
    # b_ref:  [1, F_out] f32 bias
    # o_ref:  [TM, F_out] f32 output (resident across contraction axis)
    # acc_ref:[TM, F_out] f32 VMEM accumulator
    k = pl.program_id(1)

    @pl.when(k == 0)
    def _():
        acc_ref[...] = jnp.zeros_like(acc_ref)

    acc_ref[...] += jnp.dot(
        a_ref[...], hw_ref[...], preferred_element_type=jnp.float32
    )

    @pl.when(k == pl.num_programs(1) - 1)
    def _():
        o_ref[...] = jnp.maximum(acc_ref[...] + b_ref[...], 0.0)


def node_model_3_forward(x, edge_index, edge_attr, weight, bias, *, tile=256):
    """Pallas implementation of NodeModel_3.forward.

    x:          [N, Dx]  float32 node features
    edge_index: [2, E]   int32   (row, col); values must be < min(N, E)
    edge_attr:  [E, De]  float32 edge features, Dx + De == 632
    weight:     [512, 632] GCNConv linear weight (PyTorch [out, in] layout)
    bias:       [512]      GCNConv bias
    """
    row, col = edge_index[0], edge_index[1]

    # out = torch.cat([x[col], edge_attr], dim=1)
    h = jnp.concatenate([x[col], edge_attr], axis=1)            # [E, 632]
    M, F_in = h.shape
    F_out = weight.shape[0]

    # --- GCN normalization (gcn_norm with add_self_loops=True): tiny scalar glue ---
    loops = jnp.arange(M, dtype=edge_index.dtype)
    row2 = jnp.concatenate([row, loops])
    col2 = jnp.concatenate([col, loops])
    deg = jax.ops.segment_sum(
        jnp.ones_like(row2, dtype=jnp.float32), col2, num_segments=M)
    dinv = jnp.where(deg > 0.0, jax.lax.rsqrt(deg), 0.0)
    norm = dinv[row2] * dinv[col2]

    # --- padding: feature dim to 128, item dim to the MXU-friendly tile size ---
    F_pad = _round_up(F_in, 128)                                # 632 -> 640
    M_pad = _round_up(M, tile)                                  # multiple of 256
    n_row = M_pad // tile
    n_k = M_pad // tile

    # Dense normalized adjacency (built padded, then cast to bf16 for the MXU).
    adj = jnp.zeros((M_pad, M_pad), jnp.float32).at[col2, row2].add(norm)
    a_p = adj.astype(jnp.bfloat16)
    h_p = jnp.pad(h, ((0, M_pad - M), (0, F_pad - F_in))).astype(jnp.bfloat16)
    w_p = jnp.pad(weight, ((0, 0), (0, F_pad - F_in))).T.astype(jnp.bfloat16)
    b_p = bias.reshape(1, F_out).astype(jnp.float32)

    # ----------------------------- stage 1 call -----------------------------
    hw_cost = pl.CostEstimate(
        flops=2 * M_pad * F_pad * F_out,
        transcendentals=0,
        bytes_accessed=2 * (M_pad * F_pad + F_pad * F_out + M_pad * F_out))
    hw = pl.pallas_call(
        _hw_kernel,
        out_shape=jax.ShapeDtypeStruct((M_pad, F_out), jnp.bfloat16),
        grid=(n_row,),
        in_specs=[
            pl.BlockSpec((tile, F_pad), lambda i: (i, 0)),
            pl.BlockSpec((F_pad, F_out), lambda i: (0, 0)),
        ],
        out_specs=pl.BlockSpec((tile, F_out), lambda i: (i, 0)),
        compiler_params=pltpu.CompilerParams(
            dimension_semantics=("parallel",)),
        cost_estimate=hw_cost,
    )(h_p, w_p)

    # ----------------------------- stage 2 call -----------------------------
    agg_cost = pl.CostEstimate(
        flops=2 * M_pad * M_pad * F_out,
        transcendentals=0,
        bytes_accessed=(2 * M_pad * M_pad        # A (bf16)
                        + 2 * M_pad * F_out      # HW (bf16)
                        + 4 * M_pad * F_out      # output (f32)
                        + 4 * F_out))            # bias
    out = pl.pallas_call(
        _agg_kernel,
        out_shape=jax.ShapeDtypeStruct((M_pad, F_out), jnp.float32),
        grid=(n_row, n_k),
        in_specs=[
            pl.BlockSpec((tile, tile), lambda i, k: (i, k)),
            pl.BlockSpec((tile, F_out), lambda i, k: (k, 0)),
            pl.BlockSpec((1, F_out), lambda i, k: (0, 0)),
        ],
        out_specs=pl.BlockSpec((tile, F_out), lambda i, k: (i, 0)),
        scratch_shapes=[pltpu.VMEM((tile, F_out), jnp.float32)],
        compiler_params=pltpu.CompilerParams(
            dimension_semantics=("parallel", "arbitrary")),
        cost_estimate=agg_cost,
    )(a_p, hw, b_p)

    return out[:M]                                               # [E, 512]


def _reference_forward(x, edge_index, edge_attr, weight, bias):
    """Pure-JAX reference mirroring torch_geometric GCNConv semantics."""
    row, col = edge_index[0], edge_index[1]
    h = jnp.concatenate([x[col], edge_attr], axis=1)
    M = h.shape[0]
    loops = jnp.arange(M, dtype=edge_index.dtype)
    row2 = jnp.concatenate([row, loops])
    col2 = jnp.concatenate([col, loops])
    deg = jax.ops.segment_sum(
        jnp.ones_like(row2, dtype=jnp.float32), col2, num_segments=M)
    dinv = jnp.where(deg > 0.0, jax.lax.rsqrt(deg), 0.0)
    norm = dinv[row2] * dinv[col2]
    hw = h @ weight.T
    msgs = norm[:, None] * hw[row2]
    agg = jax.ops.segment_sum(msgs, col2, num_segments=M)
    return jnp.maximum(agg + bias[None, :], 0.0)


if __name__ == "__main__":
    key = jax.random.PRNGKey(0)
    k1, k2, k3, k4 = jax.random.split(key, 4)

    # Feature dims fixed by the module: GCNConv(632, 512).  Graph kept small but
    # large enough (M=320 -> M_pad=512) to exercise both grid axes of the kernels.
    N, E = 320, 320        # nodes, edges (edge_index values must be < min(N, E))
    Dx, De = 504, 128      # 504 + 128 = 632 concatenated input channels
    F_out = 512

    x = jax.random.normal(k1, (N, Dx), dtype=jnp.float32)
    edge_attr = jax.random.normal(k2, (E, De), dtype=jnp.float32)
    edge_index = jax.random.randint(k3, (2, E), 0, min(N, E), dtype=jnp.int32)

    # Deterministic GCNConv parameter init (glorot-uniform weight, zero bias).
    limit = (6.0 / (Dx + De + F_out)) ** 0.5
    weight = jax.random.uniform(k4, (F_out, Dx + De), jnp.float32, -limit, limit)
    bias = jnp.zeros((F_out,), jnp.float32)

    out = jax.block_until_ready(
        node_model_3_forward(x, edge_index, edge_attr, weight, bias))

    ref = jax.block_until_ready(
        _reference_forward(x, edge_index, edge_attr, weight, bias))

    err = float(jnp.max(jnp.abs(out - ref)))
    scale = float(jnp.max(jnp.abs(ref))) + 1e-6
    assert out.shape == (E, F_out), out.shape
    assert err / scale < 2e-2, f"mismatch: max abs err {err} (scale {scale})"
    print("KERNEL_OK")
</pallas_src>

<mosaic_0001>
module attributes {stable_mosaic.version = 11 : i64} {
  func.func @_hw_kernel(%arg0: i32, %arg1: memref<256x640xbf16, #tpu.memory_space<vmem>>, %arg2: memref<640x512xbf16, #tpu.memory_space<vmem>>, %arg3: memref<256x512xbf16, #tpu.memory_space<vmem>>) attributes {dimension_semantics = [#tpu.dimension_semantics<parallel>], iteration_bounds = array<i64: 2>, scalar_prefetch = 0 : i64, scratch_operands = 0 : i64, tpu.core_type = #tpu.core_type<tc>, window_params = [{transform_indices = @transform_0, window_bounds = array<i64: 256, 640>}, {pipeline_mode = #tpu.pipeline_mode<synchronous>, transform_indices = @transform_1, window_bounds = array<i64: 640, 512>}, {transform_indices = @transform_2, window_bounds = array<i64: 256, 512>}]} {
    %c0 = arith.constant 0 : index
    %c0_0 = arith.constant 0 : index
    %0 = vector.load %arg1[%c0, %c0_0] : memref<256x640xbf16, #tpu.memory_space<vmem>>, vector<256x640xbf16>
    %c0_1 = arith.constant 0 : index
    %c0_2 = arith.constant 0 : index
    %1 = vector.load %arg2[%c0_1, %c0_2] : memref<640x512xbf16, #tpu.memory_space<vmem>>, vector<640x512xbf16>
    %cst = arith.constant dense<0.000000e+00> : vector<256x512xf32>
    %2 = tpu.matmul %0, %1, %cst {dimension_numbers = #tpu.dot_dimension_numbers<[1], [0], [0], [1], [0, 0, 1, 1], [], []>} : vector<256x640xbf16>, vector<640x512xbf16>, vector<256x512xf32> -> vector<256x512xf32>
    %3 = arith.truncf %2 : vector<256x512xf32> to vector<256x512xbf16>
    %c0_3 = arith.constant 0 : index
    %c0_4 = arith.constant 0 : index
    %4 = vector.load %arg3[%c0_3, %c0_4] : memref<256x512xbf16, #tpu.memory_space<vmem>>, vector<256x512xbf16>
    tpu.vector_store %arg3[%c0_3, %c0_4], %3 {strides = array<i32>} : memref<256x512xbf16, #tpu.memory_space<vmem>>, vector<256x512xbf16>,
    return
  }
  func.func @transform_0(%arg0: i32) -> (i32, i32) {
    %c0_i32 = arith.constant 0 : i32
    %c0_i32_0 = arith.constant 0 : i32
    return %arg0, %c0_i32 : i32, i32
  }
  func.func @transform_1(%arg0: i32) -> (i32, i32) {
    %c0_i32 = arith.constant 0 : i32
    %c0_i32_0 = arith.constant 0 : i32
    %c0_i32_1 = arith.constant 0 : i32
    return %c0_i32, %c0_i32_0 : i32, i32
  }
  func.func @transform_2(%arg0: i32) -> (i32, i32) {
    %c0_i32 = arith.constant 0 : i32
    %c0_i32_0 = arith.constant 0 : i32
    return %arg0, %c0_i32 : i32, i32
  }
}

</mosaic_0001>

<bundles_post_ra>
// kernel: tpu_custom_call.1
= control target key start
LH: loop header
LB: loop body
LE: loop exit
PB: predicated region body
PF: predicated region fallthrough
CT: control target
= control target key end

     0   :  { %7 = vsyncpa [#allocation3], 0  ;;  %s6526_s0 = inlined_call_operand.hbm [shape: bf16[512,640], index: 0, kind: input, shape index: {}]   ;;  %s6527_s1 = inlined_call_operand.hbm [shape: bf16[640,512], index: 1, kind: input, shape index: {}]   ;;  %s6528_s2 = inlined_call_operand.hbm [shape: bf16[512,512], index: 2, kind: output, shape index: {}]  }
   0x1   :  { %9 = vsyncpa [#allocation3 + $0x1], 0 }
   0x2   :  { %10 = vsyncpa [#allocation6], 0 }
   0x3   :  { %11 = vsyncpa [#allocation4], 0 }
   0x4   :  { %13 = vsyncpa [#allocation4 + $0x1], 0  ;;  %s5102_s9 = smov 0   ;;  %s5104_s10 = smov 0  }
   0x5   :  { %s5106_s11 = smov 0   ;;  %s5108_s12 = smov 0  }
   0x6 LB: > { %s5123_s13 = sadd.s32 4294967295, %s5078_s12   ;;  %s3664_s14 = sadd.s32 4294967294, %s5078_s12   ;;  %s5078_s12 = sphi %s5108_s12, %s7046_s12   ;;  %s5074_s11 = sphi %s5106_s11, %s7045_s11   ;;  %s5070_s10 = sphi %s5104_s10, %s7044_s10   ;;  %s5066_s9 = sphi %s5102_s9, %s7043_s9  }
   0x7   : > { %p39_p0 = scmp.ne.s32.totalorder %s5070_s10, %s5066_s9  ;;  %p40_p1 = scmp.eq.s32.totalorder %s5123_s13, 0 }
   0x8   : > { %p84_p2 = scmp.eq.s32.totalorder %s5123_s13, 1  ;;  %p90_p3 = scmp.eq.s32.totalorder %s3664_s14, 1 }
   0x9   : > { %p5132_p4 = por %p40_p1, %p39_p0  ;;  %p3665_p5 = scmp.ge.s32.totalorder %s5078_s12, 1 }
   0xa   : > { %p5137_p6 = por %p90_p3, %p39_p0  ;;  %p97_p7 = scmp.lt.s32.totalorder %s5078_s12, 3 }
   0xb   : > { %s108_s19 = sshll.u32 %s6527_s1, 4  ;;  %s5080_s21 = smov [#allocation5]   ;;  %s109_s19 = int_to_ptr.hbm [resolvable:$true] %s108_s19 }
   0xc   : > { %p5145_p8 = pnand %p3665_p5, %p97_p7  ;;  %s110_s22 = sshll.u32 %s5080_s21, 4  ;;  %s111_s22 = int_to_ptr.vmem [resolvable:$true] %s110_s22 }
   0xd   : > { %s5155_s23 = sadd.s32 1, %s5078_s12   ;;  %s5081_s24 = smov 256  }
   0xe   : > { %p4893_p9 = pneg %p5145_p8  ;;  %s5082_s25 = smov 16  }
   0xf   : > { %s23_s26 = ssub.s32 %s5078_s12, %s5155_s23  ;;  %s26_s27 = sadd.s32 1, %s5074_s11 }
  0x10   : > { %p4894_p10 = pnand %p4893_p9, %p40_p1  ;;  %p24_p12 = scmp.eq.s32.totalorder %s23_s26, 0 }
  0x11   : > { %p33_p13 = scmp.ne.s32.totalorder %s5074_s11, %s5070_s10  ;;  %p34_p0 = scmp.eq.s32.totalorder %s5078_s12, 0 }
  0x12   : > { %4896 = dma.hbm_to_vmem [thread:$0]  (!%p4894_p10), %s109_s19, 20480, %s111_s22, [#allocation6], %s5081_s24, %s5081_s24, %s5082_s25  }
  0x13   : > { %p4906_p3 = scmp.lt.s32.totalorder %s5078_s12, 2  ;;  %p35_p5 = por %p34_p0, %p33_p13 }
  0x14   : > { %s5165_s28 = scalar_select %p24_p12, %s5074_s11, %s26_s27  }
  0x15   : > { %p5169_p7 = por %p84_p2, %p33_p13  ;;  %s124_s30 = sand.u32 1, %s5074_s11  }
  0x16   : > { %s4883_s3 = smul.u32 640, %s5078_s12  ;;  %p5178_p9 = pnand %p4906_p3, %p35_p5 }
  0x17   : > { %s4882_s4 = smul.u32 640, %s124_s30  ;;  %s125_s19 = scalar_lea.sflag [#allocation3], %s124_s30 }
  0x18   : > { %s134_s7 = scalar_lea.hbm %s6526_s0, %s4883_s3  ;;  %p4982_p10 = pneg %p5178_p9 }
  0x19   : > { %s135_s14 = sshll.u32 %s134_s7, 4  ;;  %s128_s17 = scalar_lea.vmem [#allocation2], %s4882_s4  ;;  %s136_s14 = int_to_ptr.hbm [resolvable:$true] %s135_s14 }
  0x1a   : > { %s137_s18 = sshll.u32 %s128_s17, 4  ;;  %s4978_s21 = sshra.s32 %s136_s14, 4  ;;  %s138_s18 = int_to_ptr.vmem [resolvable:$true] %s137_s18  ;;  %s4979_s21 = int_to_ptr.hbm [resolvable:$true] %s4978_s21 }
  0x1b   : > { %s4980_s22 = scalar_lea.hbm %s4979_s21, 640  ;;  %s4985_s26 = scalar_lea.hbm %s6526_s0, 1280 }
  0x1c   : > { %p4981_p2 = scmp.ne.s32.totalorder %s4979_s21, %s4980_s22  ;;  %p4986_p0 = scmp.lt.s32.totalorder %s4979_s21, %s6526_s0 }
  0x1d   : > { %p4987_p3 = scmp.lt.s32.totalorder %s4985_s26, %s4980_s22 }
  0x1e   : > { %p4983_p12 = pnand %p4982_p10, %p4981_p2 }
  0x1f   : > { %p4988_p5 = por %p4987_p3, %p4986_p0 }
  0x20   : > { %p4984_p13 = pneg %p4983_p12 }
  0x22   : > { %p4989_p11 = pnand %p4988_p5, %p4984_p13 }
  0x24   : > { %4992 = shalt.err (!%p4989_p11)
}
  0x25   : > { %s5083_s30 = smov 320   ;;  %s5084_s4 = smov 20  }
  0x26   : > { %4900 = dma.hbm_to_vmem [thread:$0]  (!%p5178_p9), %s136_s14, 10240, %s138_s18, %s125_s19, %s5083_s30, %s5083_s30, %s5084_s4  }
  0x27   : > { %149 = sbr.rel (%p5145_p8) target bundleno = 1501 (0x5dd), region = 28 }
  0x2c   : > { %s5195_s5 = sand.u32 1, %s5070_s10  }
  0x2d   : > { %s4884_s6 = smul.u32 640, %s5195_s5  ;;  %s152_s7 = scalar_lea.sflag [#allocation3], %s5195_s5 }
  0x2f   : > { %s5199_s17 = scalar_lea.vmem [#allocation2], %s4884_s6 }
  0x30   : > { %5053 = dma.done.wait (%p5132_p4), %s152_s7, 10240  }
  0x31   : > { %5055 = vsyncadd (%p5132_p4), %s152_s7, 4294957056 }
  0x32   : > { %5057 = dma.done.wait (%p40_p1), [#allocation6], 20480  }
  0x33   : > { %5059 = vsyncadd (%p40_p1), [#allocation6], 4294946816  ;;  %v4108_v0 = vld [vmem:[#allocation5 + $0xe0] sm:$0xf]  ;;  %v4750_v1 = vld [vmem:[#allocation5 + $0xec] sm:$0xf0] }
  0x34   : > { %v4236_v2 = vld [vmem:[#allocation5 + $0x1e0] sm:$0xf]  ;;  %v4109_v3 = vor.u32 %v4750_v1, %v4108_v0  ;;  %v4782_v4 = vld [vmem:[#allocation5 + $0x1ec] sm:$0xf0]  ;;  %s3673_s15 = sshll.u32 %s5195_s5, 9  ;;  %s4881_s8 = sshll.u32 %s5123_s13, 9 }
  0x35   : > { %v4364_v5 = vld [vmem:[#allocation5 + $0x2e0] sm:$0xf]  ;;  %v4814_v6 = vld [vmem:[#allocation5 + $0x2ec] sm:$0xf0]  ;;  %v4237_v7 = vor.u32 %v4782_v4, %v4236_v2  ;;  %s5920_s20 = scalar_lea.vmem [#allocation7], %s3673_s15  ;;  %s3577_s19 = scalar_lea.hbm %s6528_s2, %s4881_s8 }
  0x36   : > { %v4365_v8 = vor.u32 %v4814_v6, %v4364_v5  ;;  %v4492_v9 = vld [vmem:[#allocation5 + $0x3e0] sm:$0xf]  ;;  %v4846_v10 = vld [vmem:[#allocation5 + $0x3ec] sm:$0xf0]  ;;  %1656 = vmatpush.bf16.msra.mxu0 %v4109_v3  ;;  %s3578_s21 = sshll.u32 %s5920_s20, 4  ;;  %s3580_s22 = sshll.u32 %s3577_s19, 4  ;;  %s3579_s21 = int_to_ptr.vmem [resolvable:$true] %s3578_s21  ;;  %s3581_s22 = int_to_ptr.hbm [resolvable:$true] %s3580_s22 }
  0x37   : > { %v4092_v11 = vld [vmem:[#allocation5 + $0xc0] sm:$0xf]  ;;  %v4493_v12 = vor.u32 %v4846_v10, %v4492_v9  ;;  %v4746_v13 = vld [vmem:[#allocation5 + $0xcc] sm:$0xf0]  ;;  %1745 = vmatpush.bf16.msra.mxu1 %v4237_v7  ;;  %s3565_s13 = scalar_lea.sflag [#allocation4], %s5195_s5  ;;  %s5022_s24 = sshra.s32 %s3581_s22, 4  ;;  %s5023_s24 = int_to_ptr.hbm [resolvable:$true] %s5022_s24 }
  0x38   : > { %v4220_v14 = vld [vmem:[#allocation5 + $0x1c0] sm:$0xf]  ;;  %v4778_v15 = vld [vmem:[#allocation5 + $0x1cc] sm:$0xf0]  ;;  %1834 = vmatpush.bf16.msra.mxu2 %v4365_v8  ;;  %v4093_v16 = vor.u32 %v4746_v13, %v4092_v11  ;;  %s5024_s25 = scalar_lea.hbm %s5023_s24, 512  ;;  %s5028_s3 = scalar_lea.hbm %s6528_s2, 1024 }
  0x39   : > { %v4221_v17 = vor.u32 %v4778_v15, %v4220_v14  ;;  %v4348_v18 = vld [vmem:[#allocation5 + $0x2c0] sm:$0xf]  ;;  %v4810_v19 = vld [vmem:[#allocation5 + $0x2cc] sm:$0xf0]  ;;  %1923 = vmatpush.bf16.msra.mxu3 %v4493_v12  ;;  %p5025_p1 = scmp.ne.s32.totalorder %s5023_s24, %s5024_s25  ;;  %p5029_p11 = scmp.lt.s32.totalorder %s5023_s24, %s6528_s2 }
  0x3a   : > { %v4476_v20 = vld [vmem:[#allocation5 + $0x3c0] sm:$0xf]  ;;  %v4349_v21 = vor.u32 %v4810_v19, %v4348_v18  ;;  %v4842_v22 = vld [vmem:[#allocation5 + $0x3cc] sm:$0xf0]  ;;  %1657 = vmatpush.bf16.msra.mxu0 %v4093_v16  ;;  %p5030_p9 = scmp.lt.s32.totalorder %s5028_s3, %s5024_s25 }
  0x3b   : > { %v4076_v23 = vld [vmem:[#allocation5 + $0xa0] sm:$0xf]  ;;  %v4742_v24 = vld [vmem:[#allocation5 + $0xac] sm:$0xf0]  ;;  %v4477_v25 = vor.u32 %v4842_v22, %v4476_v20  ;;  %1746 = vmatpush.bf16.msra.mxu1 %v4221_v17  ;;  %p5026_p4 = pnand %p5025_p1, %p5169_p7 }
  0x3c   : > { %v4204_v26 = vld [vmem:[#allocation5 + $0x1a0] sm:$0xf]  ;;  %v4774_v27 = vld [vmem:[#allocation5 + $0x1ac] sm:$0xf0]  ;;  %v4077_v29 = vor.u32 %v4742_v24, %v4076_v23  ;;  %1835 = vmatpush.bf16.msra.mxu2 %v4349_v21  ;;  %p5031_p2 = por %p5030_p9, %p5029_p11 }
  0x3d   : > { %v4332_v28 = vld [vmem:[#allocation5 + $0x2a0] sm:$0xf]  ;;  %v4806_v30 = vld [vmem:[#allocation5 + $0x2ac] sm:$0xf0]  ;;  %v4205_v33 = vor.u32 %v4774_v27, %v4204_v26  ;;  %1924 = vmatpush.bf16.msra.mxu3 %v4477_v25  ;;  %p5027_p8 = pneg %p5026_p4 }
  0x3e   : > { %v4460_v31 = vld [vmem:[#allocation5 + $0x3a0] sm:$0xf]  ;;  %v4838_v32 = vld [vmem:[#allocation5 + $0x3ac] sm:$0xf0]  ;;  %v4333_v34 = vor.u32 %v4806_v30, %v4332_v28  ;;  %1658 = vmatpush.bf16.msra.mxu0 %v4077_v29  ;;  %v4642_v29 = vld [vmem:[%s5199_s17 + $0x10] sm:$0xf0] }
  0x3f   : > { %v4060_v35 = vld [vmem:[#allocation5 + $0x80] sm:$0xf]  ;;  %v4738_v36 = vld [vmem:[#allocation5 + $0x8c] sm:$0xf0]  ;;  %v4461_v38 = vor.u32 %v4838_v32, %v4460_v31  ;;  %1747 = vmatpush.bf16.msra.mxu1 %v4205_v33  ;;  %v4640_v30 = vld [vmem:[%s5199_s17 + $0x4] sm:$0xf]  ;;  %p5032_p10 = pnand %p5031_p2, %p5027_p8 }
  0x40   : > { %v4188_v37 = vld [vmem:[#allocation5 + $0x180] sm:$0xf]  ;;  %v4770_v39 = vld [vmem:[#allocation5 + $0x18c] sm:$0xf0]  ;;  %v4061_v44 = vor.u32 %v4738_v36, %v4060_v35  ;;  %1836 = vmatpush.bf16.msra.mxu2 %v4333_v34  ;;  %v4780_v31 = vld [vmem:[#allocation5 + $0x1e4] sm:$0xf] }
  0x41   : > { %v4316_v40 = vld [vmem:[#allocation5 + $0x280] sm:$0xf]  ;;  %v4802_v41 = vld [vmem:[#allocation5 + $0x28c] sm:$0xf0]  ;;  %v4189_v45 = vor.u32 %v4770_v39, %v4188_v37  ;;  %1925 = vmatpush.bf16.msra.mxu3 %v4461_v38  ;;  %v4238_v32 = vld [vmem:[#allocation5 + $0x1f0] sm:$0xf0] }
  0x42   : > { %v4444_v42 = vld [vmem:[#allocation5 + $0x380] sm:$0xf]  ;;  %v4834_v43 = vld [vmem:[#allocation5 + $0x38c] sm:$0xf0]  ;;  %v4317_v46 = vor.u32 %v4802_v41, %v4316_v40  ;;  %1659 = vmatpush.bf16.msra.mxu0 %v4061_v44  ;;  %v3678_v34 = vld [vmem:[%s5199_s17 + $0x14] sm:$0xf0]  ;;  %v4241_v44 = vor.u32 %v4780_v31, %v4238_v32 }
  0x43   : > { %v4044_v47 = vld [vmem:[#allocation5 + $0x60] sm:$0xf]  ;;  %v4734_v48 = vld [vmem:[#allocation5 + $0x6c] sm:$0xf0]  ;;  %v4445_v50 = vor.u32 %v4834_v43, %v4444_v42  ;;  %1748 = vmatpush.bf16.msra.mxu1 %v4189_v45  ;;  %v4812_v35 = vld [vmem:[#allocation5 + $0x2e4] sm:$0xf] }
  0x44   : > { %v4172_v49 = vld [vmem:[#allocation5 + $0x160] sm:$0xf]  ;;  %v4766_v51 = vld [vmem:[#allocation5 + $0x16c] sm:$0xf0]  ;;  %v4045_v56 = vor.u32 %v4734_v48, %v4044_v47  ;;  %1837 = vmatpush.bf16.msra.mxu2 %v4317_v46  ;;  %v4366_v36 = vld [vmem:[#allocation5 + $0x2f0] sm:$0xf0] }
  0x45   : > { %v4300_v52 = vld [vmem:[#allocation5 + $0x260] sm:$0xf]  ;;  %v4798_v53 = vld [vmem:[#allocation5 + $0x26c] sm:$0xf0]  ;;  %v4173_v57 = vor.u32 %v4766_v51, %v4172_v49  ;;  %1926 = vmatpush.bf16.msra.mxu3 %v4445_v50  ;;  %v3684_v39 = vld [vmem:[%s5199_s17 + $0x8] sm:$0xf]  ;;  %v4369_v48 = vor.u32 %v4812_v35, %v4366_v36  ;;  %v5219_v51 = vor.u32 %v4640_v30, %v3678_v34 }
  0x46   : > { %v4428_v54 = vld [vmem:[#allocation5 + $0x360] sm:$0xf]  ;;  %v4830_v55 = vld [vmem:[#allocation5 + $0x36c] sm:$0xf0]  ;;  %v4301_v58 = vor.u32 %v4798_v53, %v4300_v52  ;;  %1660 = vmatpush.bf16.msra.mxu0 %v4045_v56  ;;  %v4643_v40 = vld [vmem:[%s5199_s17 + $0x18] sm:$0xf0] }
  0x47   : > { %v4028_v59 = vld [vmem:[#allocation5 + $0x40] sm:$0xf]  ;;  %v4730_v60 = vld [vmem:[#allocation5 + $0x4c] sm:$0xf0]  ;;  %v4429_v62 = vor.u32 %v4830_v55, %v4428_v54  ;;  %1749 = vmatpush.bf16.msra.mxu1 %v4173_v57  ;;  %v4641_v41 = vld [vmem:[%s5199_s17 + $0xc] sm:$0xf]  ;;  %v5221_v52 = vor.u32 %v4643_v40, %v3684_v39 }
  0x48   : > { %v4156_v61 = vld [vmem:[#allocation5 + $0x140] sm:$0xf]  ;;  %v4762_v63 = vld [vmem:[#allocation5 + $0x14c] sm:$0xf0]  ;;  %v4029_v4 = vor.u32 %v4730_v60, %v4028_v59  ;;  %1838 = vmatpush.bf16.msra.mxu2 %v4301_v58  ;;  %v4748_v49 = vld [vmem:[#allocation5 + $0xe4] sm:$0xf] }
  0x49   : > { %v4284_v0 = vld [vmem:[#allocation5 + $0x240] sm:$0xf]  ;;  %v4794_v1 = vld [vmem:[#allocation5 + $0x24c] sm:$0xf0]  ;;  %v4157_v5 = vor.u32 %v4762_v63, %v4156_v61  ;;  %1927 = vmatpush.bf16.msra.mxu3 %v4429_v62  ;;  %v4110_v50 = vld [vmem:[#allocation5 + $0xf0] sm:$0xf0] }
  0x4a   : > { %v4412_v2 = vld [vmem:[#allocation5 + $0x340] sm:$0xf]  ;;  %v4826_v3 = vld [vmem:[#allocation5 + $0x34c] sm:$0xf0]  ;;  %v4285_v6 = vor.u32 %v4794_v1, %v4284_v0  ;;  %1661 = vmatpush.bf16.msra.mxu0 %v4029_v4  ;;  %6678 = vst [vmem:[#allocation12_spill] sm:$0xff] %v5219_v51  ;;  %v4113_v55 = vor.u32 %v4748_v49, %v4110_v50 }
  0x4b   : > { %v4012_v7 = vld [vmem:[#allocation5 + $0x20] sm:$0xf]  ;;  %v4726_v8 = vld [vmem:[#allocation5 + $0x2c] sm:$0xf0]  ;;  %v4413_v10 = vor.u32 %v4826_v3, %v4412_v2  ;;  %1750 = vmatpush.bf16.msra.mxu1 %v4157_v5  ;;  %6679 = vst [vmem:[#allocation13_spill] sm:$0xff] %v5221_v52 }
  0x4c   : > { %v4140_v9 = vld [vmem:[#allocation5 + $0x120] sm:$0xf]  ;;  %v4758_v11 = vld [vmem:[#allocation5 + $0x12c] sm:$0xf0]  ;;  %v4013_v17 = vor.u32 %v4726_v8, %v4012_v7  ;;  %1839 = vmatpush.bf16.msra.mxu2 %v4285_v6  ;;  %v4776_v56 = vld [vmem:[#allocation5 + $0x1c4] sm:$0xf] }
  0x4d   : > { %v4268_v12 = vld [vmem:[#allocation5 + $0x220] sm:$0xf]  ;;  %v4790_v13 = vld [vmem:[#allocation5 + $0x22c] sm:$0xf0]  ;;  %v4141_v21 = vor.u32 %v4758_v11, %v4140_v9  ;;  %1928 = vmatpush.bf16.msra.mxu3 %v4413_v10  ;;  %v4222_v57 = vld [vmem:[#allocation5 + $0x1d0] sm:$0xf0] }
  0x4e   : > { %v4396_v14 = vld [vmem:[#allocation5 + $0x320] sm:$0xf]  ;;  %v4822_v15 = vld [vmem:[#allocation5 + $0x32c] sm:$0xf0]  ;;  %v4269_v22 = vor.u32 %v4790_v13, %v4268_v12  ;;  %1662 = vmatpush.bf16.msra.mxu0 %v4013_v17  ;;  %v4225_v59 = vor.u32 %v4776_v56, %v4222_v57  ;;  %v4808_v61 = vld [vmem:[#allocation5 + $0x2c4] sm:$0xf] }
  0x4f   : > { %v3996_v16 = vld [vmem:[#allocation5] sm:$0xf]  ;;  %v4722_v18 = vld [vmem:[#allocation5 + $0xc] sm:$0xf0]  ;;  %v4397_v26 = vor.u32 %v4822_v15, %v4396_v14  ;;  %1751 = vmatpush.bf16.msra.mxu1 %v4141_v21  ;;  %v4350_v62 = vld [vmem:[#allocation5 + $0x2d0] sm:$0xf0] }
  0x50   : > { %v4124_v19 = vld [vmem:[#allocation5 + $0x100] sm:$0xf]  ;;  %v4754_v20 = vld [vmem:[#allocation5 + $0x10c] sm:$0xf0]  ;;  %v3997_v33 = vor.u32 %v4722_v18, %v3996_v16  ;;  %1840 = vmatpush.bf16.msra.mxu2 %v4269_v22  ;;  %v4353_v0 = vor.u32 %v4808_v61, %v4350_v62  ;;  %v4744_v1 = vld [vmem:[#allocation5 + $0xc4] sm:$0xf] }
  0x51   : > { %v4252_v23 = vld [vmem:[#allocation5 + $0x200] sm:$0xf]  ;;  %v4786_v24 = vld [vmem:[#allocation5 + $0x20c] sm:$0xf0]  ;;  %v4125_v37 = vor.u32 %v4754_v20, %v4124_v19  ;;  %1929 = vmatpush.bf16.msra.mxu3 %v4397_v26  ;;  %v4094_v2 = vld [vmem:[#allocation5 + $0xd0] sm:$0xf0] }
  0x52   : > { %v4380_v25 = vld [vmem:[#allocation5 + $0x300] sm:$0xf]  ;;  %v4818_v27 = vld [vmem:[#allocation5 + $0x30c] sm:$0xf0]  ;;  %v4253_v38 = vor.u32 %v4786_v24, %v4252_v23  ;;  %1663 = vmatpush.bf16.msra.mxu0 %v3997_v33  ;;  %v4097_v3 = vor.u32 %v4744_v1, %v4094_v2  ;;  %v3696_v4 = vld [vmem:[%s5199_s17 + $0x28] sm:$0xf] }
  0x53   : > { %v3676_v28 = vld [vmem:[%s5199_s17] sm:$0xf]  ;;  %v4381_v42 = vor.u32 %v4818_v27, %v4380_v25  ;;  %v4878_v46 = vld [vmem:[#allocation5 + $0x4ec] sm:$0xf0]  ;;  %1752 = vmatpush.bf16.msra.mxu1 %v4125_v37  ;;  %v4647_v5 = vld [vmem:[%s5199_s17 + $0x38] sm:$0xf0] }
  0x54   : > { %v3686_v43 = vld [vmem:[%s5199_s17 + $0x1c] sm:$0xf0]  ;;  %v5217_v47 = vor.u32 %v4642_v29, %v3676_v28  ;;  %1841 = vmatpush.bf16.msra.mxu2 %v4253_v38  ;;  %v4874_v60 = vld [vmem:[#allocation5 + $0x4cc] sm:$0xf0]  ;;  %v4645_v6 = vld [vmem:[%s5199_s17 + $0x2c] sm:$0xf]  ;;  %v5237_v12 = vor.u32 %v4647_v5, %v3696_v4 }
  0x55   : > { %v4620_v45 = vld [vmem:[#allocation5 + $0x4e0] sm:$0xf]  ;;  %v5223_v53 = vor.u32 %v4641_v41, %v3686_v43  ;;  %1930 = vmatpush.bf16.msra.mxu3 %v4381_v42  ;;  %v3704_v8 = vld [vmem:[%s5199_s17 + $0x30] sm:$0xf]  ;;  %v4648_v9 = vld [vmem:[%s5199_s17 + $0x40] sm:$0xf0] }
  0x56   : > { %6677 = vst [vmem:[#allocation11_spill] sm:$0xff] %v5217_v47  ;;  %v4621_v54 = vor.u32 %v4878_v46, %v4620_v45  ;;  %1664 = vmatmul.bf16.vlgmr.msra.gmra.mxu0 %v5217_v47  ;;  %1753 = vmatmul.bf16.vlgmr.msra.gmra.mxu1 %v5219_v51  ;;  %v4604_v58 = vld [vmem:[#allocation5 + $0x4c0] sm:$0xf]  ;;  %v4646_v10 = vld [vmem:[%s5199_s17 + $0x34] sm:$0xf]  ;;  %v5241_v14 = vor.u32 %v4648_v9, %v3704_v8 }
  0x57   : > { %6680 = vst [vmem:[#allocation14_spill] sm:$0xff] %v5223_v53  ;;  %1842 = vmatmul.bf16.vlgmr.msra.gmra.mxu2 %v5221_v52  ;;  %2101 = vmatpush.bf16.msrb.mxu1 %v4113_v55  ;;  %v4605_v63 = vor.u32 %v4874_v60, %v4604_v58  ;;  %v3698_v7 = vld [vmem:[%s5199_s17 + $0x3c] sm:$0xf0]  ;;  %v3706_v11 = vld [vmem:[%s5199_s17 + $0x44] sm:$0xf0] }
  0x58   : > { %2190 = vmatpush.bf16.msrb.mxu2 %v4241_v44  ;;  %1931 = vmatmul.bf16.vlgmr.msra.gmra.mxu3 %v5223_v53  ;;  %6681 = vst [vmem:[#allocation15_spill] sm:$0xff] %v5237_v12  ;;  %v5239_v13 = vor.u32 %v4645_v6, %v3698_v7  ;;  %v5243_v15 = vor.u32 %v4646_v10, %v3706_v11  ;;  %v3716_v16 = vld [vmem:[%s5199_s17 + $0x50] sm:$0xf]  ;;  %v4652_v17 = vld [vmem:[%s5199_s17 + $0x60] sm:$0xf0] }
  0x59   : > { %2279 = vmatpush.bf16.msrb.mxu3 %v4369_v48  ;;  %2012 = vmatpush.bf16.msrb.mxu0 %v4621_v54  ;;  %6683 = vst [vmem:[#allocation17_spill] sm:$0xff] %v5241_v14  ;;  %v4650_v18 = vld [vmem:[%s5199_s17 + $0x54] sm:$0xf]  ;;  %v3718_v19 = vld [vmem:[%s5199_s17 + $0x64] sm:$0xf0]  ;;  %v5257_v24 = vor.u32 %v4652_v17, %v3716_v16 }
  0x5a   : > { %6682 = vst [vmem:[#allocation16_spill] sm:$0xff] %v5239_v13  ;;  %v3724_v20 = vld [vmem:[%s5199_s17 + $0x58] sm:$0xf]  ;;  %v4653_v21 = vld [vmem:[%s5199_s17 + $0x68] sm:$0xf0]  ;;  %v5259_v25 = vor.u32 %v4650_v18, %v3718_v19 }
  0x5b   : > { %2102 = vmatpush.bf16.msrb.mxu1 %v4097_v3  ;;  %6684 = vst [vmem:[#allocation18_spill] sm:$0xff] %v5243_v15  ;;  %v4651_v22 = vld [vmem:[%s5199_s17 + $0x5c] sm:$0xf]  ;;  %v3726_v23 = vld [vmem:[%s5199_s17 + $0x6c] sm:$0xf0]  ;;  %v5261_v26 = vor.u32 %v4653_v21, %v3724_v20 }
  0x5c   : > { %2191 = vmatpush.bf16.msrb.mxu2 %v4225_v59  ;;  %6685 = vst [vmem:[#allocation19_spill] sm:$0xff] %v5257_v24  ;;  %v5263_v27 = vor.u32 %v4651_v22, %v3726_v23  ;;  %v4772_v28 = vld [vmem:[#allocation5 + $0x1a4] sm:$0xf]  ;;  %v4206_v29 = vld [vmem:[#allocation5 + $0x1b0] sm:$0xf0] }
  0x5d   : > { %2013 = vmatpush.bf16.msrb.mxu0 %v4605_v63  ;;  %2280 = vmatpush.bf16.msrb.mxu3 %v4353_v0  ;;  %6686 = vst [vmem:[#allocation20_spill] sm:$0xff] %v5259_v25  ;;  %v4588_v30 = vld [vmem:[#allocation5 + $0x4a0] sm:$0xf]  ;;  %v4209_v31 = vor.u32 %v4772_v28, %v4206_v29  ;;  %v4870_v32 = vld [vmem:[#allocation5 + $0x4ac] sm:$0xf0] }
  0x5e   : > { %6687 = vst [vmem:[#allocation21_spill] sm:$0xff] %v5261_v26  ;;  %v4804_v33 = vld [vmem:[#allocation5 + $0x2a4] sm:$0xf]  ;;  %v4334_v34 = vld [vmem:[#allocation5 + $0x2b0] sm:$0xf0]  ;;  %v4589_v35 = vor.u32 %v4870_v32, %v4588_v30 }
  0x5f   : > { %6688 = vst [vmem:[#allocation22_spill] sm:$0xff] %v5263_v27  ;;  %v4337_v36 = vor.u32 %v4804_v33, %v4334_v34  ;;  %v4740_v37 = vld [vmem:[#allocation5 + $0xa4] sm:$0xf]  ;;  %v4078_v38 = vld [vmem:[#allocation5 + $0xb0] sm:$0xf0] }
  0x60   : > { %2192 = vmatpush.bf16.msrb.mxu2 %v4209_v31  ;;  %v4081_v39 = vor.u32 %v4740_v37, %v4078_v38  ;;  %v3736_v40 = vld [vmem:[%s5199_s17 + $0x78] sm:$0xf]  ;;  %v4657_v41 = vld [vmem:[%s5199_s17 + $0x88] sm:$0xf0]  ;;  %v4655_v42 = vld [vmem:[%s5199_s17 + $0x7c] sm:$0xf] }
  0x61   : > { %2014 = vmatpush.bf16.msrb.mxu0 %v4589_v35  ;;  %2281 = vmatpush.bf16.msrb.mxu3 %v4337_v36  ;;  %v3738_v43 = vld [vmem:[%s5199_s17 + $0x8c] sm:$0xf0]  ;;  %v3744_v44 = vld [vmem:[%s5199_s17 + $0x80] sm:$0xf]  ;;  %v4658_v45 = vld [vmem:[%s5199_s17 + $0x90] sm:$0xf0]  ;;  %v5277_v49 = vor.u32 %v4657_v41, %v3736_v40 }
  0x62   : > { %2103 = vmatpush.bf16.msrb.mxu1 %v4081_v39  ;;  %v4656_v46 = vld [vmem:[%s5199_s17 + $0x84] sm:$0xf]  ;;  %v3746_v48 = vld [vmem:[%s5199_s17 + $0x94] sm:$0xf0]  ;;  %v5279_v50 = vor.u32 %v4655_v42, %v3738_v43  ;;  %v5281_v54 = vor.u32 %v4658_v45, %v3744_v44  ;;  %v3756_v56 = vld [vmem:[%s5199_s17 + $0xa0] sm:$0xf] }
  0x63   : > { %6689 = vst [vmem:[#allocation23_spill] sm:$0xff] %v5277_v49  ;;  %v5283_v55 = vor.u32 %v4656_v46, %v3746_v48  ;;  %v4662_v57 = vld [vmem:[%s5199_s17 + $0xb0] sm:$0xf0]  ;;  %v4660_v58 = vld [vmem:[%s5199_s17 + $0xa4] sm:$0xf] }
  0x64   : > { %6690 = vst [vmem:[#allocation24_spill] sm:$0xff] %v5279_v50  ;;  %v3758_v59 = vld [vmem:[%s5199_s17 + $0xb4] sm:$0xf0]  ;;  %v3764_v60 = vld [vmem:[%s5199_s17 + $0xa8] sm:$0xf]  ;;  %v5297_v0 = vor.u32 %v4662_v57, %v3756_v56 }
  0x65   : > { %6691 = vst [vmem:[#allocation25_spill] sm:$0xff] %v5281_v54  ;;  %v4663_v61 = vld [vmem:[%s5199_s17 + $0xb8] sm:$0xf0]  ;;  %v4661_v62 = vld [vmem:[%s5199_s17 + $0xac] sm:$0xf]  ;;  %v5299_v1 = vor.u32 %v4660_v58, %v3758_v59 }
  0x66   : > { %1669 = vmatmul.bf16.gmra.mxu0 %v5237_v12  ;;  %1758 = vmatmul.bf16.gmra.mxu1 %v5239_v13  ;;  %6692 = vst [vmem:[#allocation26_spill] sm:$0xff] %v5283_v55  ;;  %v3766_v63 = vld [vmem:[%s5199_s17 + $0xbc] sm:$0xf0]  ;;  %v5301_v2 = vor.u32 %v4663_v61, %v3764_v60  ;;  %v4768_v4 = vld [vmem:[#allocation5 + $0x184] sm:$0xf] }
  0x67   : > { %1847 = vmatmul.bf16.gmra.mxu2 %v5241_v14  ;;  %6693 = vst [vmem:[#allocation27_spill] sm:$0xff] %v5297_v0  ;;  %v5303_v3 = vor.u32 %v4661_v62, %v3766_v63  ;;  %v4190_v5 = vld [vmem:[#allocation5 + $0x190] sm:$0xf0]  ;;  %v4572_v6 = vld [vmem:[#allocation5 + $0x480] sm:$0xf] }
  0x68   : > { %1936 = vmatmul.bf16.gmra.mxu3 %v5243_v15  ;;  %6694 = vst [vmem:[#allocation28_spill] sm:$0xff] %v5299_v1  ;;  %v4193_v7 = vor.u32 %v4768_v4, %v4190_v5  ;;  %v4866_v8 = vld [vmem:[#allocation5 + $0x48c] sm:$0xf0]  ;;  %v4800_v9 = vld [vmem:[#allocation5 + $0x284] sm:$0xf] }
  0x69   : > { %6695 = vst [vmem:[#allocation29_spill] sm:$0xff] %v5301_v2  ;;  %v4318_v10 = vld [vmem:[#allocation5 + $0x290] sm:$0xf0]  ;;  %v4573_v11 = vor.u32 %v4866_v8, %v4572_v6  ;;  %v4736_v17 = vld [vmem:[#allocation5 + $0x84] sm:$0xf] }
  0x6a   : > { %6696 = vst [vmem:[#allocation30_spill] sm:$0xff] %v5303_v3  ;;  %v4321_v16 = vor.u32 %v4800_v9, %v4318_v10  ;;  %v4062_v18 = vld [vmem:[#allocation5 + $0x90] sm:$0xf0]  ;;  %2193 = vmatpush.bf16.msrb.mxu2 %v4193_v7  ;;  %v3776_v20 = vld [vmem:[%s5199_s17 + $0xc8] sm:$0xf] }
  0x6b   : > { %v4065_v19 = vor.u32 %v4736_v17, %v4062_v18  ;;  %2015 = vmatpush.bf16.msrb.mxu0 %v4573_v11  ;;  %v4667_v21 = vld [vmem:[%s5199_s17 + $0xd8] sm:$0xf0]  ;;  %v4665_v22 = vld [vmem:[%s5199_s17 + $0xcc] sm:$0xf]  ;;  %v3778_v23 = vld [vmem:[%s5199_s17 + $0xdc] sm:$0xf0] }
  0x6c   : > { %2282 = vmatpush.bf16.msrb.mxu3 %v4321_v16  ;;  %v3784_v28 = vld [vmem:[%s5199_s17 + $0xd0] sm:$0xf]  ;;  %v4668_v29 = vld [vmem:[%s5199_s17 + $0xe0] sm:$0xf0]  ;;  %v4666_v30 = vld [vmem:[%s5199_s17 + $0xd4] sm:$0xf]  ;;  %v5317_v32 = vor.u32 %v4667_v21, %v3776_v20  ;;  %v5319_v33 = vor.u32 %v4665_v22, %v3778_v23 }
  0x6d   : > { %2104 = vmatpush.bf16.msrb.mxu1 %v4065_v19  ;;  %v3786_v31 = vld [vmem:[%s5199_s17 + $0xe4] sm:$0xf0]  ;;  %v5321_v34 = vor.u32 %v4668_v29, %v3784_v28  ;;  %v3796_v36 = vld [vmem:[%s5199_s17 + $0xf0] sm:$0xf]  ;;  %v4672_v37 = vld [vmem:[%s5199_s17 + $0x100] sm:$0xf0] }
  0x6e   : > { %6697 = vst [vmem:[#allocation31_spill] sm:$0xff] %v5317_v32  ;;  %v5323_v35 = vor.u32 %v4666_v30, %v3786_v31  ;;  %v4670_v38 = vld [vmem:[%s5199_s17 + $0xf4] sm:$0xf]  ;;  %v3798_v39 = vld [vmem:[%s5199_s17 + $0x104] sm:$0xf0]  ;;  %v5337_v44 = vor.u32 %v4672_v37, %v3796_v36 }
  0x6f   : > { %6698 = vst [vmem:[#allocation32_spill] sm:$0xff] %v5319_v33  ;;  %v3804_v40 = vld [vmem:[%s5199_s17 + $0xf8] sm:$0xf]  ;;  %v4673_v41 = vld [vmem:[%s5199_s17 + $0x108] sm:$0xf0]  ;;  %v5339_v45 = vor.u32 %v4670_v38, %v3798_v39 }
  0x70   : > { %6699 = vst [vmem:[#allocation33_spill] sm:$0xff] %v5321_v34  ;;  %v4671_v42 = vld [vmem:[%s5199_s17 + $0xfc] sm:$0xf]  ;;  %v3806_v43 = vld [vmem:[%s5199_s17 + $0x10c] sm:$0xf0]  ;;  %v5341_v46 = vor.u32 %v4673_v41, %v3804_v40 }
  0x71   : > { %6700 = vst [vmem:[#allocation34_spill] sm:$0xff] %v5323_v35  ;;  %v5343_v48 = vor.u32 %v4671_v42, %v3806_v43  ;;  %v4764_v56 = vld [vmem:[#allocation5 + $0x164] sm:$0xf]  ;;  %v4174_v57 = vld [vmem:[#allocation5 + $0x170] sm:$0xf0] }
  0x72   : > { %6701 = vst [vmem:[#allocation35_spill] sm:$0xff] %v5337_v44  ;;  %v4556_v58 = vld [vmem:[#allocation5 + $0x460] sm:$0xf]  ;;  %v4177_v59 = vor.u32 %v4764_v56, %v4174_v57  ;;  %v4862_v60 = vld [vmem:[#allocation5 + $0x46c] sm:$0xf0] }
  0x73   : > { %6702 = vst [vmem:[#allocation36_spill] sm:$0xff] %v5339_v45  ;;  %v4796_v61 = vld [vmem:[#allocation5 + $0x264] sm:$0xf]  ;;  %v4302_v62 = vld [vmem:[#allocation5 + $0x270] sm:$0xf0]  ;;  %v4557_v63 = vor.u32 %v4862_v60, %v4556_v58 }
  0x74   : > { %6703 = vst [vmem:[#allocation37_spill] sm:$0xff] %v5341_v46  ;;  %v4305_v4 = vor.u32 %v4796_v61, %v4302_v62  ;;  %2194 = vmatpush.bf16.msrb.mxu2 %v4177_v59  ;;  %v4732_v5 = vld [vmem:[#allocation5 + $0x64] sm:$0xf]  ;;  %v4046_v6 = vld [vmem:[#allocation5 + $0x70] sm:$0xf0] }
  0x75   : > { %6704 = vst [vmem:[#allocation38_spill] sm:$0xff] %v5343_v48  ;;  %2016 = vmatpush.bf16.msrb.mxu0 %v4557_v63  ;;  %v4049_v7 = vor.u32 %v4732_v5, %v4046_v6  ;;  %v3816_v8 = vld [vmem:[%s5199_s17 + $0x118] sm:$0xf]  ;;  %v4677_v9 = vld [vmem:[%s5199_s17 + $0x128] sm:$0xf0] }
  0x76   : > { %1674 = vmatmul.bf16.gmra.mxu0 %v5257_v24  ;;  %1763 = vmatmul.bf16.gmra.mxu1 %v5259_v25  ;;  %v4675_v10 = vld [vmem:[%s5199_s17 + $0x11c] sm:$0xf]  ;;  %v3818_v11 = vld [vmem:[%s5199_s17 + $0x12c] sm:$0xf0]  ;;  %v3824_v16 = vld [vmem:[%s5199_s17 + $0x120] sm:$0xf]  ;;  %v5357_v20 = vor.u32 %v4677_v9, %v3816_v8 }
  0x77   : > { %1852 = vmatmul.bf16.gmra.mxu2 %v5261_v26  ;;  %2283 = vmatpush.bf16.msrb.mxu3 %v4305_v4  ;;  %v4678_v17 = vld [vmem:[%s5199_s17 + $0x130] sm:$0xf0]  ;;  %v4676_v18 = vld [vmem:[%s5199_s17 + $0x124] sm:$0xf]  ;;  %v3826_v19 = vld [vmem:[%s5199_s17 + $0x134] sm:$0xf0]  ;;  %v5359_v21 = vor.u32 %v4675_v10, %v3818_v11 }
  0x78   : > { %1941 = vmatmul.bf16.gmra.mxu3 %v5263_v27  ;;  %2105 = vmatpush.bf16.msrb.mxu1 %v4049_v7  ;;  %v5361_v22 = vor.u32 %v4678_v17, %v3824_v16  ;;  %v5363_v23 = vor.u32 %v4676_v18, %v3826_v19  ;;  %v3836_v28 = vld [vmem:[%s5199_s17 + $0x140] sm:$0xf]  ;;  %v4682_v29 = vld [vmem:[%s5199_s17 + $0x150] sm:$0xf0]  ;;  %v4680_v30 = vld [vmem:[%s5199_s17 + $0x144] sm:$0xf] }
  0x79   : > { %6705 = vst [vmem:[#allocation39_spill] sm:$0xff] %v5359_v21  ;;  %v3838_v31 = vld [vmem:[%s5199_s17 + $0x154] sm:$0xf0]  ;;  %v3844_v36 = vld [vmem:[%s5199_s17 + $0x148] sm:$0xf]  ;;  %v5377_v40 = vor.u32 %v4682_v29, %v3836_v28 }
  0x7a   : > { %6706 = vst [vmem:[#allocation40_spill] sm:$0xff] %v5361_v22  ;;  %v4683_v37 = vld [vmem:[%s5199_s17 + $0x158] sm:$0xf0]  ;;  %v4681_v38 = vld [vmem:[%s5199_s17 + $0x14c] sm:$0xf]  ;;  %v5379_v42 = vor.u32 %v4680_v30, %v3838_v31 }
  0x7b   : > { %6707 = vst [vmem:[#allocation41_spill] sm:$0xff] %v5363_v23  ;;  %v3846_v39 = vld [vmem:[%s5199_s17 + $0x15c] sm:$0xf0]  ;;  %v5381_v43 = vor.u32 %v4683_v37, %v3844_v36  ;;  %v4760_v59 = vld [vmem:[#allocation5 + $0x144] sm:$0xf] }
  0x7c   : > { %6708 = vst [vmem:[#allocation42_spill] sm:$0xff] %v5377_v40  ;;  %v5383_v57 = vor.u32 %v4681_v38, %v3846_v39  ;;  %v4158_v60 = vld [vmem:[#allocation5 + $0x150] sm:$0xf0]  ;;  %v4540_v61 = vld [vmem:[#allocation5 + $0x440] sm:$0xf] }
  0x7d   : > { %6709 = vst [vmem:[#allocation43_spill] sm:$0xff] %v5379_v42  ;;  %v4161_v62 = vor.u32 %v4760_v59, %v4158_v60  ;;  %v4858_v63 = vld [vmem:[#allocation5 + $0x44c] sm:$0xf0]  ;;  %v4792_v4 = vld [vmem:[#allocation5 + $0x244] sm:$0xf] }
  0x7e   : > { %6710 = vst [vmem:[#allocation44_spill] sm:$0xff] %v5381_v43  ;;  %v4286_v5 = vld [vmem:[#allocation5 + $0x250] sm:$0xf0]  ;;  %v4541_v7 = vor.u32 %v4858_v63, %v4540_v61  ;;  %v4728_v19 = vld [vmem:[#allocation5 + $0x44] sm:$0xf] }
  0x7f   : > { %6711 = vst [vmem:[#allocation45_spill] sm:$0xff] %v5383_v57  ;;  %v4289_v8 = vor.u32 %v4792_v4, %v4286_v5  ;;  %2195 = vmatpush.bf16.msrb.mxu2 %v4161_v62  ;;  %v4030_v28 = vld [vmem:[#allocation5 + $0x50] sm:$0xf0]  ;;  %v3856_v30 = vld [vmem:[%s5199_s17 + $0x168] sm:$0xf] }
  0x80   : > { %2017 = vmatpush.bf16.msrb.mxu0 %v4541_v7  ;;  %v4033_v29 = vor.u32 %v4728_v19, %v4030_v28  ;;  %v4687_v31 = vld [vmem:[%s5199_s17 + $0x178] sm:$0xf0]  ;;  %v4685_v36 = vld [vmem:[%s5199_s17 + $0x16c] sm:$0xf]  ;;  %v3858_v37 = vld [vmem:[%s5199_s17 + $0x17c] sm:$0xf0] }
  0x81   : > { %2284 = vmatpush.bf16.msrb.mxu3 %v4289_v8  ;;  %v3864_v38 = vld [vmem:[%s5199_s17 + $0x170] sm:$0xf]  ;;  %v4688_v39 = vld [vmem:[%s5199_s17 + $0x180] sm:$0xf0]  ;;  %v5399_v59 = vor.u32 %v4687_v31, %v3856_v30  ;;  %v5401_v63 = vor.u32 %v4685_v36, %v3858_v37  ;;  %v4690_v31 = vld [vmem:[%s5199_s17 + $0x194] sm:$0xf] }
  0x82   : > { %2106 = vmatpush.bf16.msrb.mxu1 %v4033_v29  ;;  %v5403_v4 = vor.u32 %v4688_v39, %v3864_v38  ;;  %v3876_v29 = vld [vmem:[%s5199_s17 + $0x190] sm:$0xf]  ;;  %v4692_v30 = vld [vmem:[%s5199_s17 + $0x1a0] sm:$0xf0]  ;;  %v3878_v36 = vld [vmem:[%s5199_s17 + $0x1a4] sm:$0xf0] }
  0x83   : > { %6712 = vst [vmem:[#allocation46_spill] sm:$0xff] %v5401_v63  ;;  %v3884_v37 = vld [vmem:[%s5199_s17 + $0x198] sm:$0xf]  ;;  %v4693_v38 = vld [vmem:[%s5199_s17 + $0x1a8] sm:$0xf0] }
  0x84   : > { %6713 = vst [vmem:[#allocation47_spill] sm:$0xff] %v5403_v4  ;;  %v4691_v39 = vld [vmem:[%s5199_s17 + $0x19c] sm:$0xf]  ;;  %v3998_v53 = vld [vmem:[#allocation5 + $0x10] sm:$0xf0] }
  0x86   : > { %1679 = vmatmul.bf16.gmra.mxu0 %v5277_v49  ;;  %1768 = vmatmul.bf16.gmra.mxu1 %v5279_v50 }
  0x87   : > { %1857 = vmatmul.bf16.gmra.mxu2 %v5281_v54 }
  0x88   : > { %1946 = vmatmul.bf16.gmra.mxu3 %v5283_v55 }
  0x96   : > { %1684 = vmatmul.bf16.gmra.mxu0 %v5297_v0  ;;  %1773 = vmatmul.bf16.gmra.mxu1 %v5299_v1 }
  0x97   : > { %1862 = vmatmul.bf16.gmra.mxu2 %v5301_v2 }
  0x98   : > { %1951 = vmatmul.bf16.gmra.mxu3 %v5303_v3 }
  0xa6   : > { %1689 = vmatmul.bf16.gmra.mxu0 %v5317_v32  ;;  %1778 = vmatmul.bf16.gmra.mxu1 %v5319_v33 }
  0xa7   : > { %1867 = vmatmul.bf16.gmra.mxu2 %v5321_v34 }
  0xa8   : > { %1956 = vmatmul.bf16.gmra.mxu3 %v5323_v35  ;;  %v3926_v35 = vld [vmem:[%s5199_s17 + $0x1fc] sm:$0xf0] }
  0xb6   : > { %1694 = vmatmul.bf16.gmra.mxu0 %v5337_v44  ;;  %1783 = vmatmul.bf16.gmra.mxu1 %v5339_v45 }
  0xb7   : > { %1872 = vmatmul.bf16.gmra.mxu2 %v5341_v46 }
  0xb8   : > { %1961 = vmatmul.bf16.gmra.mxu3 %v5343_v48 }
  0xc6   : > { %1699 = vmatmul.bf16.gmra.mxu0 %v5357_v20  ;;  %1788 = vmatmul.bf16.gmra.mxu1 %v5359_v21 }
  0xc7   : > { %1877 = vmatmul.bf16.gmra.mxu2 %v5361_v22 }
  0xc8   : > { %1966 = vmatmul.bf16.gmra.mxu3 %v5363_v23 }
  0xd3   : > { %v1665_v41 = vpop.f32.mrf.mxu0  ;;  %v1754_v56 = vpop.f32.mrf.mxu1 }
  0xd4   : > { %v1755_v58 = vadd.f32 %v1754_v56, %v1665_v41  ;;  %v4686_v41 = vld [vmem:[%s5199_s17 + $0x174] sm:$0xf]  ;;  %v3866_v56 = vld [vmem:[%s5199_s17 + $0x184] sm:$0xf0] }
  0xd6   : > { %1704 = vmatmul.bf16.gmra.mxu0 %v5377_v40  ;;  %1793 = vmatmul.bf16.gmra.mxu1 %v5379_v42 }
  0xd7   : > { %1882 = vmatmul.bf16.gmra.mxu2 %v5381_v43 }
  0xd8   : > { %1971 = vmatmul.bf16.gmra.mxu3 %v5383_v57  ;;  %v4696_v57 = vld [vmem:[%s5199_s17 + $0x1c4] sm:$0xf] }
  0xda   : > { %v1843_v6 = vpop.f32.mrf.mxu2 }
  0xdb   : > { %v1844_v9 = vadd.f32 %v1843_v6, %v1755_v58  ;;  %v1932_v10 = vpop.f32.mrf.mxu3  ;;  %v1667_v11 = vpop.f32.mrf.mxu0  ;;  %v5405_v6 = vor.u32 %v4686_v41, %v3866_v56  ;;  %v3886_v41 = vld [vmem:[%s5199_s17 + $0x1ac] sm:$0xf0] }
  0xdc   : > { %v1756_v16 = vpop.f32.mrf.mxu1 }
  0xdd   : > { %v5389_v17 = vadd.f32 %v1932_v10, %v1844_v9  ;;  %v1757_v18 = vadd.f32 %v1756_v16, %v1667_v11  ;;  %6714 = vst [vmem:[#allocation48_spill] sm:$0xff] %v5405_v6 }
  0xe2   : > { %v1845_v58 = vpop.f32.mrf.mxu2 }
  0xe3   : > { %v1846_v60 = vadd.f32 %v1845_v58, %v1757_v18  ;;  %v1934_v61 = vpop.f32.mrf.mxu3  ;;  %v1670_v62 = vpop.f32.mrf.mxu0  ;;  %v5423_v58 = vor.u32 %v4692_v30, %v3876_v29  ;;  %v4524_v29 = vld [vmem:[#allocation5 + $0x420] sm:$0xf] }
  0xe4   : > { %v1759_v5 = vpop.f32.mrf.mxu1 }
  0xe5   : > { %v5407_v7 = vadd.f32 %v1934_v61, %v1846_v60  ;;  %v1760_v8 = vadd.f32 %v1759_v5, %v1670_v62  ;;  %6715 = vst [vmem:[#allocation49_spill] sm:$0xff] %v5423_v58  ;;  %v5425_v5 = vor.u32 %v4690_v31, %v3878_v36  ;;  %v4854_v31 = vld [vmem:[#allocation5 + $0x42c] sm:$0xf0]  ;;  %v4788_v36 = vld [vmem:[#allocation5 + $0x224] sm:$0xf] }
  0xe6   : > { %1709 = vmatmul.bf16.gmra.mxu0 %v5399_v59  ;;  %1798 = vmatmul.bf16.gmra.mxu1 %v5401_v63 }
  0xe7   : > { %1887 = vmatmul.bf16.gmra.mxu2 %v5403_v4  ;;  %6716 = vst [vmem:[#allocation50_spill] sm:$0xff] %v5425_v5 }
  0xe8   : > { %1976 = vmatmul.bf16.gmra.mxu3 %v5405_v6  ;;  %v4698_v6 = vld [vmem:[%s5199_s17 + $0x1d0] sm:$0xf0] }
  0xea   : > { %v1848_v9 = vpop.f32.mrf.mxu2 }
  0xeb   : > { %v1849_v10 = vadd.f32 %v1848_v9, %v1760_v8  ;;  %v1937_v11 = vpop.f32.mrf.mxu3  ;;  %v1672_v16 = vpop.f32.mrf.mxu0  ;;  %v5427_v8 = vor.u32 %v4693_v38, %v3884_v37  ;;  %v4270_v37 = vld [vmem:[#allocation5 + $0x230] sm:$0xf0] }
  0xec   : > { %v1761_v18 = vpop.f32.mrf.mxu1 }
  0xed   : > { %v5413_v19 = vadd.f32 %v1937_v11, %v1849_v10  ;;  %v1762_v28 = vadd.f32 %v1761_v18, %v1672_v16  ;;  %6717 = vst [vmem:[#allocation51_spill] sm:$0xff] %v5427_v8  ;;  %v5429_v10 = vor.u32 %v4691_v39, %v3886_v41  ;;  %v4756_v18 = vld [vmem:[#allocation5 + $0x124] sm:$0xf]  ;;  %v4525_v39 = vor.u32 %v4854_v31, %v4524_v29  ;;  %v3896_v31 = vld [vmem:[%s5199_s17 + $0x1b8] sm:$0xf] }
  0xee   : > { %v4273_v41 = vor.u32 %v4788_v36, %v4270_v37  ;;  %v4697_v36 = vld [vmem:[%s5199_s17 + $0x1c8] sm:$0xf0]  ;;  %v4695_v37 = vld [vmem:[%s5199_s17 + $0x1bc] sm:$0xf] }
  0xef   : > { %6718 = vst [vmem:[#allocation52_spill] sm:$0xff] %v5429_v10  ;;  %2018 = vmatpush.bf16.msrb.mxu0 %v4525_v39  ;;  %v5447_v48 = vor.u32 %v4697_v36, %v3896_v31 }
  0xf0   : > { %2285 = vmatpush.bf16.msrb.mxu3 %v4273_v41 }
  0xf1   : > { %6719 = vst [vmem:[#allocation53_spill] sm:$0xff] %v5447_v48 }
  0xf2   : > { %v1850_v56 = vpop.f32.mrf.mxu2 }
  0xf3   : > { %v1851_v60 = vadd.f32 %v1850_v56, %v1762_v28  ;;  %v1939_v61 = vpop.f32.mrf.mxu3  ;;  %v1675_v62 = vpop.f32.mrf.mxu0  ;;  %v4142_v28 = vld [vmem:[#allocation5 + $0x130] sm:$0xf0] }
  0xf4   : > { %v1764_v9 = vpop.f32.mrf.mxu1  ;;  %v4145_v30 = vor.u32 %v4756_v18, %v4142_v28  ;;  %v4724_v28 = vld [vmem:[#allocation5 + $0x24] sm:$0xf] }
  0xf5   : > { %v5431_v11 = vadd.f32 %v1939_v61, %v1851_v60  ;;  %v1765_v16 = vadd.f32 %v1764_v9, %v1675_v62 }
  0xf6   : > { %1714 = vmatmul.bf16.gmra.mxu0 %v5423_v58  ;;  %1803 = vmatmul.bf16.gmra.mxu1 %v5425_v5 }
  0xf7   : > { %1892 = vmatmul.bf16.gmra.mxu2 %v5427_v8 }
  0xf8   : > { %1981 = vmatmul.bf16.gmra.mxu3 %v5429_v10  ;;  %2196 = vmatpush.bf16.msrb.mxu2 %v4145_v30  ;;  %v4014_v10 = vld [vmem:[#allocation5 + $0x30] sm:$0xf0]  ;;  %v3906_v30 = vld [vmem:[%s5199_s17 + $0x1d4] sm:$0xf0] }
  0xf9   : > { %v4017_v29 = vor.u32 %v4724_v28, %v4014_v10 }
  0xfa   : > { %v1853_v38 = vpop.f32.mrf.mxu2 }
  0xfb   : > { %v1854_v56 = vadd.f32 %v1853_v38, %v1765_v16  ;;  %v1942_v60 = vpop.f32.mrf.mxu3  ;;  %v1677_v61 = vpop.f32.mrf.mxu0  ;;  %v3898_v16 = vld [vmem:[%s5199_s17 + $0x1cc] sm:$0xf0]  ;;  %v3904_v38 = vld [vmem:[%s5199_s17 + $0x1c0] sm:$0xf]  ;;  %2107 = vmatpush.bf16.msrb.mxu1 %v4017_v29 }
  0xfc   : > { %v1766_v62 = vpop.f32.mrf.mxu1 }
  0xfd   : > { %v5437_v9 = vadd.f32 %v1942_v60, %v1854_v56  ;;  %v1767_v18 = vadd.f32 %v1766_v62, %v1677_v61  ;;  %v5449_v60 = vor.u32 %v4695_v37, %v3898_v16  ;;  %v5451_v61 = vor.u32 %v4698_v6, %v3904_v38  ;;  %v3916_v16 = vld [vmem:[%s5199_s17 + $0x1e0] sm:$0xf]  ;;  %v4702_v38 = vld [vmem:[%s5199_s17 + $0x1f0] sm:$0xf0] }
  0xfe   : > { %v5453_v62 = vor.u32 %v4696_v57, %v3906_v30  ;;  %v4700_v30 = vld [vmem:[%s5199_s17 + $0x1e4] sm:$0xf]  ;;  %v5471_v55 = vor.u32 %v4702_v38, %v3916_v16  ;;  %v4508_v16 = vld [vmem:[#allocation5 + $0x400] sm:$0xf] }
  0xff   : > { %6720 = vst [vmem:[#allocation54_spill] sm:$0xff] %v5449_v60 }
 0x100   : > { %6721 = vst [vmem:[#allocation55_spill] sm:$0xff] %v5451_v61 }
 0x101   : > { %6722 = vst [vmem:[#allocation56_spill] sm:$0xff] %v5453_v62 }
 0x102   : > { %v1855_v23 = vpop.f32.mrf.mxu2  ;;  %6723 = vst [vmem:[#allocation57_spill] sm:$0xff] %v5471_v55 }
 0x103   : > { %v1856_v39 = vadd.f32 %v1855_v23, %v1767_v18  ;;  %v1944_v41 = vpop.f32.mrf.mxu3  ;;  %v1680_v56 = vpop.f32.mrf.mxu0 }
 0x104   : > { %v1769_v10 = vpop.f32.mrf.mxu1 }
 0x105   : > { %v5455_v28 = vadd.f32 %v1944_v41, %v1856_v39  ;;  %v1770_v29 = vadd.f32 %v1769_v10, %v1680_v56  ;;  %v3918_v39 = vld [vmem:[%s5199_s17 + $0x1f4] sm:$0xf0]  ;;  %v3924_v41 = vld [vmem:[%s5199_s17 + $0x1e8] sm:$0xf]  ;;  %v4703_v56 = vld [vmem:[%s5199_s17 + $0x1f8] sm:$0xf0] }
 0x106   : > { %1719 = vmatmul.bf16.gmra.mxu0 %v5447_v48  ;;  %1808 = vmatmul.bf16.gmra.mxu1 %v5449_v60  ;;  %v4701_v10 = vld [vmem:[%s5199_s17 + $0x1ec] sm:$0xf]  ;;  %v5475_v15 = vor.u32 %v4703_v56, %v3924_v41  ;;  %v4254_v41 = vld [vmem:[#allocation5 + $0x210] sm:$0xf0] }
 0x107   : > { %1897 = vmatmul.bf16.gmra.mxu2 %v5451_v61 }
 0x108   : > { %1986 = vmatmul.bf16.gmra.mxu3 %v5453_v62  ;;  %6725 = vst [vmem:[#allocation59_spill] sm:$0xff] %v5475_v15 }
 0x10a   : > { %v1858_v23 = vpop.f32.mrf.mxu2 }
 0x10b   : > { %v1859_v57 = vadd.f32 %v1858_v23, %v1770_v29  ;;  %v1947_v6 = vpop.f32.mrf.mxu3  ;;  %v1682_v18 = vpop.f32.mrf.mxu0  ;;  %v5473_v23 = vor.u32 %v4700_v30, %v3918_v39  ;;  %v4850_v30 = vld [vmem:[#allocation5 + $0x40c] sm:$0xf0]  ;;  %v4784_v39 = vld [vmem:[#allocation5 + $0x204] sm:$0xf] }
 0x10c   : > { %v1771_v31 = vpop.f32.mrf.mxu1 }
 0x10d   : > { %v5461_v36 = vadd.f32 %v1947_v6, %v1859_v57  ;;  %v1772_v37 = vadd.f32 %v1771_v31, %v1682_v18  ;;  %6724 = vst [vmem:[#allocation58_spill] sm:$0xff] %v5473_v23  ;;  %v5477_v6 = vor.u32 %v4701_v10, %v3926_v35 }
 0x10f   : > { %6726 = vst [vmem:[#allocation60_spill] sm:$0xff] %v5477_v6 }
 0x112   : > { %v1860_v3 = vpop.f32.mrf.mxu2 }
 0x113   : > { %v1861_v62 = vadd.f32 %v1860_v3, %v1772_v37  ;;  %v1949_v27 = vpop.f32.mrf.mxu3  ;;  %v1685_v29 = vpop.f32.mrf.mxu0  ;;  %v4752_v3 = vld [vmem:[#allocation5 + $0x104] sm:$0xf]  ;;  %v4126_v37 = vld [vmem:[#allocation5 + $0x110] sm:$0xf0] }
 0x114   : > { %v1774_v57 = vpop.f32.mrf.mxu1  ;;  %v4129_v38 = vor.u32 %v4752_v3, %v4126_v37 }
 0x115   : > { %v5479_v18 = vadd.f32 %v1949_v27, %v1861_v62  ;;  %v1775_v31 = vadd.f32 %v1774_v57, %v1685_v29  ;;  %v4509_v27 = vor.u32 %v4850_v30, %v4508_v16  ;;  %v4257_v62 = vor.u32 %v4784_v39, %v4254_v41  ;;  %v3936_v30 = vld [vmem:[%s5199_s17 + $0x208] sm:$0xf]  ;;  %v4707_v39 = vld [vmem:[%s5199_s17 + $0x218] sm:$0xf0]  ;;  %v4705_v41 = vld [vmem:[%s5199_s17 + $0x20c] sm:$0xf] }
 0x116   : > { %1724 = vmatmul.bf16.gmra.mxu0 %v5471_v55  ;;  %1813 = vmatmul.bf16.gmra.mxu1 %v5473_v23  ;;  %v4706_v23 = vld [vmem:[%s5199_s17 + $0x214] sm:$0xf] }
 0x117   : > { %6727 = vst [vmem:[#allocation61_spill] sm:$0xff] %v5479_v18  ;;  %1902 = vmatmul.bf16.gmra.mxu2 %v5475_v15  ;;  %2019 = vmatpush.bf16.msrb.mxu0 %v4509_v27  ;;  %v4708_v15 = vld [vmem:[%s5199_s17 + $0x220] sm:$0xf0]  ;;  %v5495_v18 = vor.u32 %v4707_v39, %v3936_v30 }
 0x118   : > { %1991 = vmatmul.bf16.gmra.mxu3 %v5477_v6  ;;  %2197 = vmatpush.bf16.msrb.mxu2 %v4129_v38  ;;  %v4720_v6 = vld [vmem:[#allocation5 + $0x4] sm:$0xf]  ;;  %v3946_v38 = vld [vmem:[%s5199_s17 + $0x224] sm:$0xf0] }
 0x119   : > { %2286 = vmatpush.bf16.msrb.mxu3 %v4257_v62  ;;  %v4001_v16 = vor.u32 %v4720_v6, %v3998_v53  ;;  %6729 = vst [vmem:[#allocation63_spill] sm:$0xff] %v5495_v18  ;;  %v5501_v6 = vor.u32 %v4706_v23, %v3946_v38  ;;  %v4710_v38 = vld [vmem:[%s5199_s17 + $0x234] sm:$0xf] }
 0x11a   : > { %v1863_v35 = vpop.f32.mrf.mxu2 }
 0x11b   : > { %v1864_v56 = vadd.f32 %v1863_v35, %v1775_v31  ;;  %v1952_v10 = vpop.f32.mrf.mxu3  ;;  %v1687_v29 = vpop.f32.mrf.mxu0  ;;  %v3938_v31 = vld [vmem:[%s5199_s17 + $0x21c] sm:$0xf0]  ;;  %v3944_v35 = vld [vmem:[%s5199_s17 + $0x210] sm:$0xf]  ;;  %2108 = vmatpush.bf16.msrb.mxu1 %v4001_v16  ;;  %6732 = vst [vmem:[#allocation66_spill] sm:$0xff] %v5501_v6 }
 0x11c   : > { %v1776_v57 = vpop.f32.mrf.mxu1 }
 0x11d   : > { %v5485_v3 = vadd.f32 %v1952_v10, %v1864_v56  ;;  %v1777_v37 = vadd.f32 %v1776_v57, %v1687_v29  ;;  %v5497_v10 = vor.u32 %v4705_v41, %v3938_v31  ;;  %v5499_v29 = vor.u32 %v4708_v15, %v3944_v35  ;;  %v3956_v31 = vld [vmem:[%s5199_s17 + $0x230] sm:$0xf]  ;;  %v4712_v35 = vld [vmem:[%s5199_s17 + $0x240] sm:$0xf0] }
 0x11f   : > { %6728 = vst [vmem:[#allocation62_spill] sm:$0xff] %v5485_v3 }
 0x120   : > { %6730 = vst [vmem:[#allocation64_spill] sm:$0xff] %v5497_v10 }
 0x121   : > { %6731 = vst [vmem:[#allocation65_spill] sm:$0xff] %v5499_v29 }
 0x122   : > { %v1865_v55 = vpop.f32.mrf.mxu2 }
 0x123   : > { %v1866_v27 = vadd.f32 %v1865_v55, %v1777_v37  ;;  %v1954_v62 = vpop.f32.mrf.mxu3  ;;  %v1690_v56 = vpop.f32.mrf.mxu0 }
 0x124   : > { %v1779_v53 = vpop.f32.mrf.mxu1 }
 0x125   : > { %v5503_v57 = vadd.f32 %v1954_v62, %v1866_v27  ;;  %v1780_v16 = vadd.f32 %v1779_v53, %v1690_v56  ;;  %v3958_v27 = vld [vmem:[%s5199_s17 + $0x244] sm:$0xf0]  ;;  %v3964_v62 = vld [vmem:[%s5199_s17 + $0x238] sm:$0xf]  ;;  %v4713_v56 = vld [vmem:[%s5199_s17 + $0x248] sm:$0xf0] }
 0x126   : > { %1729 = vmatmul.bf16.gmra.mxu0 %v5495_v18  ;;  %1818 = vmatmul.bf16.gmra.mxu1 %v5497_v10  ;;  %v4711_v53 = vld [vmem:[%s5199_s17 + $0x23c] sm:$0xf]  ;;  %v3966_v10 = vld [vmem:[%s5199_s17 + $0x24c] sm:$0xf0]  ;;  %v5519_v18 = vor.u32 %v4712_v35, %v3956_v31  ;;  %v5523_v3 = vor.u32 %v4713_v56, %v3964_v62  ;;  %v4844_v31 = vld [vmem:[#allocation5 + $0x3e4] sm:$0xf] }
 0x127   : > { %6733 = vst [vmem:[#allocation67_spill] sm:$0xff] %v5503_v57  ;;  %1907 = vmatmul.bf16.gmra.mxu2 %v5499_v29  ;;  %v4783_v62 = vld [vmem:[#allocation5 + $0x1f4] sm:$0xf0] }
 0x128   : > { %1996 = vmatmul.bf16.gmra.mxu3 %v5501_v6  ;;  %6735 = vst [vmem:[#allocation69_spill] sm:$0xff] %v5519_v18 }
 0x129   : > { %6737 = vst [vmem:[#allocation71_spill] sm:$0xff] %v5523_v3 }
 0x12a   : > { %v1868_v15 = vpop.f32.mrf.mxu2 }
 0x12b   : > { %v1869_v55 = vadd.f32 %v1868_v15, %v1780_v16  ;;  %v1957_v23 = vpop.f32.mrf.mxu3  ;;  %v1692_v37 = vpop.f32.mrf.mxu0  ;;  %v5521_v15 = vor.u32 %v4710_v38, %v3958_v27  ;;  %v4494_v38 = vld [vmem:[#allocation5 + $0x3f0] sm:$0xf0]  ;;  %v4244_v27 = vld [vmem:[#allocation5 + $0x1e8] sm:$0xf] }
 0x12c   : > { %v1781_v30 = vpop.f32.mrf.mxu1 }
 0x12d   : > { %v5509_v39 = vadd.f32 %v1957_v23, %v1869_v55  ;;  %v1782_v41 = vadd.f32 %v1781_v30, %v1692_v37  ;;  %6736 = vst [vmem:[#allocation70_spill] sm:$0xff] %v5521_v15  ;;  %v5525_v23 = vor.u32 %v4711_v53, %v3966_v10 }
 0x12f   : > { %6734 = vst [vmem:[#allocation68_spill] sm:$0xff] %v5509_v39 }
 0x130   : > { %6738 = vst [vmem:[#allocation72_spill] sm:$0xff] %v5525_v23 }
 0x132   : > { %v1870_v29 = vpop.f32.mrf.mxu2 }
 0x133   : > { %v1871_v6 = vadd.f32 %v1870_v29, %v1782_v41  ;;  %v1959_v57 = vpop.f32.mrf.mxu3  ;;  %v1695_v16 = vpop.f32.mrf.mxu0  ;;  %v4116_v29 = vld [vmem:[#allocation5 + $0xe8] sm:$0xf]  ;;  %v4751_v41 = vld [vmem:[#allocation5 + $0xf4] sm:$0xf0] }
 0x134   : > { %v1784_v55 = vpop.f32.mrf.mxu1  ;;  %v4117_v35 = vor.u32 %v4751_v41, %v4116_v29 }
 0x135   : > { %v5527_v37 = vadd.f32 %v1959_v57, %v1871_v6  ;;  %v1785_v30 = vadd.f32 %v1784_v55, %v1695_v16  ;;  %v4497_v6 = vor.u32 %v4844_v31, %v4494_v38  ;;  %v4245_v57 = vor.u32 %v4783_v62, %v4244_v27  ;;  %v3976_v38 = vld [vmem:[%s5199_s17 + $0x258] sm:$0xf]  ;;  %v4717_v27 = vld [vmem:[%s5199_s17 + $0x268] sm:$0xf0]  ;;  %v4715_v62 = vld [vmem:[%s5199_s17 + $0x25c] sm:$0xf] }
 0x136   : > { %1734 = vmatmul.bf16.gmra.mxu0 %v5519_v18  ;;  %1823 = vmatmul.bf16.gmra.mxu1 %v5521_v15  ;;  %v4718_v15 = vld [vmem:[%s5199_s17 + $0x270] sm:$0xf0]  ;;  %v4716_v18 = vld [vmem:[%s5199_s17 + $0x264] sm:$0xf]  ;;  %v5543_v39 = vor.u32 %v4717_v27, %v3976_v38 }
 0x137   : > { %6739 = vst [vmem:[#allocation73_spill] sm:$0xff] %v5527_v37  ;;  %1912 = vmatmul.bf16.gmra.mxu2 %v5523_v3  ;;  %2368 = vmatpush.bf16.msra.mxu0 %v4497_v6  ;;  %v4622_v3 = vld [vmem:[#allocation5 + $0x4f0] sm:$0xf0] }
 0x138   : > { %2001 = vmatmul.bf16.gmra.mxu3 %v5525_v23  ;;  %2546 = vmatpush.bf16.msra.mxu2 %v4117_v35  ;;  %v4876_v23 = vld [vmem:[#allocation5 + $0x4e4] sm:$0xf]  ;;  %v3986_v35 = vld [vmem:[%s5199_s17 + $0x274] sm:$0xf0]  ;;  %6740 = vst [vmem:[#allocation74_spill] sm:$0xff] %v5543_v39 }
 0x139   : > { %2635 = vmatpush.bf16.msra.mxu3 %v4245_v57  ;;  %v4625_v31 = vor.u32 %v4876_v23, %v4622_v3  ;;  %v5549_v23 = vor.u32 %v4716_v18, %v3986_v35 }
 0x13a   : > { %v1873_v10 = vpop.f32.mrf.mxu2 }
 0x13b   : > { %v1874_v56 = vadd.f32 %v1873_v10, %v1785_v30  ;;  %v1962_v53 = vpop.f32.mrf.mxu3  ;;  %v1697_v16 = vpop.f32.mrf.mxu0  ;;  %v3978_v30 = vld [vmem:[%s5199_s17 + $0x26c] sm:$0xf0]  ;;  %v3984_v10 = vld [vmem:[%s5199_s17 + $0x260] sm:$0xf]  ;;  %2457 = vmatpush.bf16.msra.mxu1 %v4625_v31  ;;  %6743 = vst [vmem:[#allocation77_spill] sm:$0xff] %v5549_v23 }
 0x13c   : > { %v1786_v55 = vpop.f32.mrf.mxu1 }
 0x13d   : > { %v5533_v29 = vadd.f32 %v1962_v53, %v1874_v56  ;;  %v1787_v41 = vadd.f32 %v1786_v55, %v1697_v16  ;;  %v5545_v53 = vor.u32 %v4715_v62, %v3978_v30  ;;  %v5547_v16 = vor.u32 %v4718_v15, %v3984_v10  ;;  %v3692_v30 = vld [vmem:[%s5199_s17 + $0x10] sm:$0xf]  ;;  %v4644_v10 = vld [vmem:[%s5199_s17 + $0x20] sm:$0xf0] }
 0x13f   : > { %6741 = vst [vmem:[#allocation75_spill] sm:$0xff] %v5545_v53 }
 0x140   : > { %6742 = vst [vmem:[#allocation76_spill] sm:$0xff] %v5547_v16 }
 0x142   : > { %v1875_v37 = vpop.f32.mrf.mxu2 }
 0x143   : > { %v1876_v6 = vadd.f32 %v1875_v37, %v1787_v41  ;;  %v1964_v57 = vpop.f32.mrf.mxu3  ;;  %v1700_v56 = vpop.f32.mrf.mxu0 }
 0x144   : > { %v1789_v3 = vpop.f32.mrf.mxu1 }
 0x145   : > { %v5551_v55 = vadd.f32 %v1964_v57, %v1876_v6  ;;  %v1790_v31 = vadd.f32 %v1789_v3, %v1700_v56  ;;  %v5561_v6 = vor.u32 %v4644_v10, %v3692_v30 }
 0x146   : > { %1739 = vmatmul.bf16.gmra.mxu0 %v5543_v39  ;;  %1828 = vmatmul.bf16.gmra.mxu1 %v5545_v53 }
 0x147   : > { %1917 = vmatmul.bf16.gmra.mxu2 %v5547_v16  ;;  %6745 = vst [vmem:[#allocation79_spill] sm:$0xff] %v5561_v6 }
 0x148   : > { %2006 = vmatmul.bf16.gmra.mxu3 %v5549_v23 }
 0x14a   : > { %v1878_v37 = vpop.f32.mrf.mxu2 }
 0x14b   : > { %v1879_v41 = vadd.f32 %v1878_v37, %v1790_v31  ;;  %v1967_v15 = vpop.f32.mrf.mxu3  ;;  %v1702_v38 = vpop.f32.mrf.mxu0  ;;  %v4100_v31 = vld [vmem:[#allocation5 + $0xc8] sm:$0xf]  ;;  %v4747_v37 = vld [vmem:[#allocation5 + $0xd4] sm:$0xf0] }
 0x14c   : > { %v1791_v27 = vpop.f32.mrf.mxu1 }
 0x14d   : > { %v5557_v62 = vadd.f32 %v1967_v15, %v1879_v41  ;;  %v1792_v18 = vadd.f32 %v1791_v27, %v1702_v38  ;;  %v4840_v41 = vld [vmem:[#allocation5 + $0x3c4] sm:$0xf]  ;;  %v4101_v15 = vor.u32 %v4747_v37, %v4100_v31  ;;  %v4478_v38 = vld [vmem:[#allocation5 + $0x3d0] sm:$0xf0]  ;;  %v4228_v27 = vld [vmem:[#allocation5 + $0x1c8] sm:$0xf] }
 0x14e   : > { %v4481_v10 = vor.u32 %v4840_v41, %v4478_v38  ;;  %v4606_v31 = vld [vmem:[#allocation5 + $0x4d0] sm:$0xf0] }
 0x14f   : > { %6744 = vst [vmem:[#allocation78_spill] sm:$0xff] %v5557_v62  ;;  %2547 = vmatpush.bf16.msra.mxu2 %v4101_v15 }
 0x150   : > { %2369 = vmatpush.bf16.msra.mxu0 %v4481_v10 }
 0x152   : > { %v1880_v35 = vpop.f32.mrf.mxu2 }
 0x153   : > { %v1881_v57 = vadd.f32 %v1880_v35, %v1792_v18  ;;  %v1969_v56 = vpop.f32.mrf.mxu3  ;;  %v1705_v3 = vpop.f32.mrf.mxu0  ;;  %v4779_v18 = vld [vmem:[#allocation5 + $0x1d4] sm:$0xf0] }
 0x154   : > { %v1794_v53 = vpop.f32.mrf.mxu1 }
 0x155   : > { %v5563_v16 = vadd.f32 %v1969_v56, %v1881_v57  ;;  %v1795_v23 = vadd.f32 %v1794_v53, %v1705_v3  ;;  %v4229_v53 = vor.u32 %v4779_v18, %v4228_v27 }
 0x156   : > { %2020 = vmatmul.bf16.vlgmr.msrb.gmra.mxu0 %v5561_v6  ;;  %2109 = vmatmul.bf16.vlgmr.msrb.gmra.mxu1 %v5217_v47  ;;  %v4872_v47 = vld [vmem:[#allocation5 + $0x4c4] sm:$0xf]  ;;  %v3712_v6 = vld [vmem:[%s5199_s17 + $0x38] sm:$0xf] }
 0x157   : > { %6746 = vst [vmem:[#allocation80_spill] sm:$0xff] %v5563_v16  ;;  %2198 = vmatmul.bf16.vlgmr.msrb.gmra.mxu2 %v5219_v51  ;;  %2636 = vmatpush.bf16.msra.mxu3 %v4229_v53  ;;  %v4609_v37 = vor.u32 %v4872_v47, %v4606_v31  ;;  %v4649_v16 = vld [vmem:[%s5199_s17 + $0x48] sm:$0xf0]  ;;  %v3732_v53 = vld [vmem:[%s5199_s17 + $0x60] sm:$0xf] }
 0x158   : > { %2287 = vmatmul.bf16.vlgmr.msrb.gmra.mxu3 %v5221_v52  ;;  %v5573_v62 = vor.u32 %v4649_v16, %v3712_v6 }
 0x159   : > { %2458 = vmatpush.bf16.msra.mxu1 %v4609_v37 }
 0x15a   : > { %v1883_v30 = vpop.f32.mrf.mxu2 }
 0x15b   : > { %v1884_v35 = vadd.f32 %v1883_v30, %v1795_v23  ;;  %v1972_v57 = vpop.f32.mrf.mxu3  ;;  %v1707_v56 = vpop.f32.mrf.mxu0 }
 0x15c   : > { %v1796_v3 = vpop.f32.mrf.mxu1 }
 0x15d   : > { %v5569_v52 = vadd.f32 %v1972_v57, %v1884_v35  ;;  %v1797_v51 = vadd.f32 %v1796_v3, %v1707_v56  ;;  %v4654_v35 = vld [vmem:[%s5199_s17 + $0x70] sm:$0xf0] }
 0x15e   : > { %v5585_v56 = vor.u32 %v4654_v35, %v3732_v53 }
 0x160   : > { %6747 = vst [vmem:[#allocation81_spill] sm:$0xff] %v5585_v56 }
 0x162   : > { %v1885_v39 = vpop.f32.mrf.mxu2 }
 0x163   : > { %v1886_v41 = vadd.f32 %v1885_v39, %v1797_v51  ;;  %v1974_v23 = vpop.f32.mrf.mxu3  ;;  %v1710_v38 = vpop.f32.mrf.mxu0 }
 0x164   : > { %v1799_v15 = vpop.f32.mrf.mxu1 }
 0x165   : > { %v5575_v27 = vadd.f32 %v1974_v23, %v1886_v41  ;;  %v1800_v18 = vadd.f32 %v1799_v15, %v1710_v38  ;;  %v4084_v15 = vld [vmem:[#allocation5 + $0xa8] sm:$0xf] }
 0x166   : > { %2025 = vmatmul.bf16.gmra.mxu0 %v5573_v62  ;;  %2114 = vmatmul.bf16.gmra.mxu1 %v5237_v12 }
 0x167   : > { %2203 = vmatmul.bf16.gmra.mxu2 %v5239_v13 }
 0x168   : > { %2292 = vmatmul.bf16.gmra.mxu3 %v5241_v14  ;;  %v4868_v14 = vld [vmem:[#allocation5 + $0x4a4] sm:$0xf] }
 0x16a   : > { %v1888_v47 = vpop.f32.mrf.mxu2 }
 0x16b   : > { %v1889_v16 = vadd.f32 %v1888_v47, %v1800_v18  ;;  %v1977_v6 = vpop.f32.mrf.mxu3  ;;  %v1712_v51 = vpop.f32.mrf.mxu0  ;;  %v4743_v18 = vld [vmem:[#allocation5 + $0xb4] sm:$0xf0]  ;;  %v4836_v47 = vld [vmem:[#allocation5 + $0x3a4] sm:$0xf] }
 0x16c   : > { %v1801_v39 = vpop.f32.mrf.mxu1 }
 0x16d   : > { %v5581_v30 = vadd.f32 %v1977_v6, %v1889_v16  ;;  %v1802_v10 = vadd.f32 %v1801_v39, %v1712_v51  ;;  %v4085_v16 = vor.u32 %v4743_v18, %v4084_v15  ;;  %v4462_v6 = vld [vmem:[#allocation5 + $0x3b0] sm:$0xf0]  ;;  %v4212_v51 = vld [vmem:[#allocation5 + $0x1a8] sm:$0xf]  ;;  %v4775_v39 = vld [vmem:[#allocation5 + $0x1b4] sm:$0xf0] }
 0x16e   : > { %v4465_v53 = vor.u32 %v4836_v47, %v4462_v6  ;;  %v4213_v35 = vor.u32 %v4775_v39, %v4212_v51  ;;  %v4590_v15 = vld [vmem:[#allocation5 + $0x4b0] sm:$0xf0] }
 0x16f   : > { %2548 = vmatpush.bf16.msra.mxu2 %v4085_v16  ;;  %v4593_v18 = vor.u32 %v4868_v14, %v4590_v15 }
 0x170   : > { %2370 = vmatpush.bf16.msra.mxu0 %v4465_v53  ;;  %2637 = vmatpush.bf16.msra.mxu3 %v4213_v35  ;;  %v3772_v35 = vld [vmem:[%s5199_s17 + $0xb0] sm:$0xf] }
 0x171   : > { %2459 = vmatpush.bf16.msra.mxu1 %v4593_v18 }
 0x172   : > { %v1890_v57 = vpop.f32.mrf.mxu2 }
 0x173   : > { %v1891_v3 = vadd.f32 %v1890_v57, %v1802_v10  ;;  %v1979_v31 = vpop.f32.mrf.mxu3  ;;  %v1715_v37 = vpop.f32.mrf.mxu0 }
 0x174   : > { %v1804_v41 = vpop.f32.mrf.mxu1 }
 0x175   : > { %v5587_v23 = vadd.f32 %v1979_v31, %v1891_v3  ;;  %v1805_v38 = vadd.f32 %v1804_v41, %v1715_v37 }
 0x176   : > { %2030 = vmatmul.bf16.gmra.mxu0 %v5585_v56  ;;  %2119 = vmatmul.bf16.gmra.mxu1 %v5257_v24  ;;  %v4659_v24 = vld [vmem:[%s5199_s17 + $0x98] sm:$0xf0] }
 0x177   : > { %6748 = vst [vmem:[#allocation82_spill] sm:$0xff] %v5587_v23  ;;  %2208 = vmatmul.bf16.gmra.mxu2 %v5259_v25  ;;  %v3752_v25 = vld [vmem:[%s5199_s17 + $0x88] sm:$0xf] }
 0x178   : > { %2297 = vmatmul.bf16.gmra.mxu3 %v5261_v26  ;;  %v5597_v23 = vor.u32 %v4659_v24, %v3752_v25 }
 0x17a   : > { %v1893_v10 = vpop.f32.mrf.mxu2 }
 0x17b   : > { %v1894_v57 = vadd.f32 %v1893_v10, %v1805_v38  ;;  %v1982_v3 = vpop.f32.mrf.mxu3  ;;  %v1717_v31 = vpop.f32.mrf.mxu0 }
 0x17c   : > { %v1806_v37 = vpop.f32.mrf.mxu1 }
 0x17d   : > { %v5593_v41 = vadd.f32 %v1982_v3, %v1894_v57  ;;  %v1807_v26 = vadd.f32 %v1806_v37, %v1717_v31  ;;  %v4664_v57 = vld [vmem:[%s5199_s17 + $0xc0] sm:$0xf0] }
 0x17e   : > { %v5609_v31 = vor.u32 %v4664_v57, %v3772_v35 }
 0x180   : > { %6749 = vst [vmem:[#allocation83_spill] sm:$0xff] %v5609_v31 }
 0x182   : > { %v1895_v56 = vpop.f32.mrf.mxu2 }
 0x183   : > { %v1896_v47 = vadd.f32 %v1895_v56, %v1807_v26  ;;  %v1984_v38 = vpop.f32.mrf.mxu3  ;;  %v1720_v6 = vpop.f32.mrf.mxu0 }
 0x184   : > { %v1809_v16 = vpop.f32.mrf.mxu1 }
 0x185   : > { %v5599_v51 = vadd.f32 %v1984_v38, %v1896_v47  ;;  %v1810_v39 = vadd.f32 %v1809_v16, %v1720_v6  ;;  %v4068_v16 = vld [vmem:[#allocation5 + $0x88] sm:$0xf] }
 0x186   : > { %2035 = vmatmul.bf16.gmra.mxu0 %v5597_v23  ;;  %2124 = vmatmul.bf16.gmra.mxu1 %v5277_v49 }
 0x187   : > { %2213 = vmatmul.bf16.gmra.mxu2 %v5279_v50 }
 0x188   : > { %2302 = vmatmul.bf16.gmra.mxu3 %v5281_v54  ;;  %v4864_v54 = vld [vmem:[#allocation5 + $0x484] sm:$0xf] }
 0x18a   : > { %v1898_v14 = vpop.f32.mrf.mxu2 }
 0x18b   : > { %v1899_v24 = vadd.f32 %v1898_v14, %v1810_v39  ;;  %v1987_v25 = vpop.f32.mrf.mxu3  ;;  %v1722_v26 = vpop.f32.mrf.mxu0  ;;  %v4739_v39 = vld [vmem:[#allocation5 + $0x94] sm:$0xf0]  ;;  %v4832_v14 = vld [vmem:[#allocation5 + $0x384] sm:$0xf] }
 0x18c   : > { %v1811_v56 = vpop.f32.mrf.mxu1 }
 0x18d   : > { %v5605_v10 = vadd.f32 %v1987_v25, %v1899_v24  ;;  %v1812_v53 = vadd.f32 %v1811_v56, %v1722_v26  ;;  %v4069_v24 = vor.u32 %v4739_v39, %v4068_v16  ;;  %v4446_v25 = vld [vmem:[#allocation5 + $0x390] sm:$0xf0]  ;;  %v4196_v26 = vld [vmem:[#allocation5 + $0x188] sm:$0xf]  ;;  %v4771_v56 = vld [vmem:[#allocation5 + $0x194] sm:$0xf0] }
 0x18e   : > { %v4449_v35 = vor.u32 %v4832_v14, %v4446_v25  ;;  %v4197_v57 = vor.u32 %v4771_v56, %v4196_v26  ;;  %v4574_v16 = vld [vmem:[#allocation5 + $0x490] sm:$0xf0] }
 0x18f   : > { %2549 = vmatpush.bf16.msra.mxu2 %v4069_v24  ;;  %v4577_v39 = vor.u32 %v4864_v54, %v4574_v16 }
 0x190   : > { %2371 = vmatpush.bf16.msra.mxu0 %v4449_v35  ;;  %2638 = vmatpush.bf16.msra.mxu3 %v4197_v57  ;;  %v3812_v57 = vld [vmem:[%s5199_s17 + $0x100] sm:$0xf] }
 0x191   : > { %2460 = vmatpush.bf16.msra.mxu1 %v4577_v39 }
 0x192   : > { %v1900_v3 = vpop.f32.mrf.mxu2 }
 0x193   : > { %v1901_v37 = vadd.f32 %v1900_v3, %v1812_v53  ;;  %v1989_v15 = vpop.f32.mrf.mxu3  ;;  %v1725_v18 = vpop.f32.mrf.mxu0 }
 0x194   : > { %v1814_v47 = vpop.f32.mrf.mxu1 }
 0x195   : > { %v5611_v38 = vadd.f32 %v1989_v15, %v1901_v37  ;;  %v1815_v6 = vadd.f32 %v1814_v47, %v1725_v18 }
 0x196   : > { %2040 = vmatmul.bf16.gmra.mxu0 %v5609_v31  ;;  %2129 = vmatmul.bf16.gmra.mxu1 %v5297_v0  ;;  %v4669_v0 = vld [vmem:[%s5199_s17 + $0xe8] sm:$0xf0] }
 0x197   : > { %6750 = vst [vmem:[#allocation84_spill] sm:$0xff] %v5611_v38  ;;  %2218 = vmatmul.bf16.gmra.mxu2 %v5299_v1  ;;  %v3792_v1 = vld [vmem:[%s5199_s17 + $0xd8] sm:$0xf] }
 0x198   : > { %2307 = vmatmul.bf16.gmra.mxu3 %v5301_v2  ;;  %v5621_v38 = vor.u32 %v4669_v0, %v3792_v1 }
 0x19a   : > { %v1903_v53 = vpop.f32.mrf.mxu2  ;;  %6751 = vst [vmem:[#allocation85_spill] sm:$0xff] %v5621_v38 }
 0x19b   : > { %v1904_v3 = vadd.f32 %v1903_v53, %v1815_v6  ;;  %v1992_v37 = vpop.f32.mrf.mxu3  ;;  %v1727_v15 = vpop.f32.mrf.mxu0 }
 0x19c   : > { %v1816_v18 = vpop.f32.mrf.mxu1 }
 0x19d   : > { %v5617_v47 = vadd.f32 %v1992_v37, %v1904_v3  ;;  %v1817_v2 = vadd.f32 %v1816_v18, %v1727_v15  ;;  %v4674_v3 = vld [vmem:[%s5199_s17 + $0x110] sm:$0xf0] }
 0x19e   : > { %v5633_v15 = vor.u32 %v4674_v3, %v3812_v57 }
 0x1a0   : > { %6752 = vst [vmem:[#allocation86_spill] sm:$0xff] %v5633_v15 }
 0x1a2   : > { %v1905_v31 = vpop.f32.mrf.mxu2 }
 0x1a3   : > { %v1906_v14 = vadd.f32 %v1905_v31, %v1817_v2  ;;  %v1994_v6 = vpop.f32.mrf.mxu3  ;;  %v1730_v25 = vpop.f32.mrf.mxu0 }
 0x1a4   : > { %v1819_v24 = vpop.f32.mrf.mxu1 }
 0x1a5   : > { %v5623_v26 = vadd.f32 %v1994_v6, %v1906_v14  ;;  %v1820_v56 = vadd.f32 %v1819_v24, %v1730_v25  ;;  %v4052_v24 = vld [vmem:[#allocation5 + $0x68] sm:$0xf] }
 0x1a6   : > { %2045 = vmatmul.bf16.gmra.mxu0 %v5621_v38  ;;  %2134 = vmatmul.bf16.gmra.mxu1 %v5317_v32 }
 0x1a7   : > { %2223 = vmatmul.bf16.gmra.mxu2 %v5319_v33 }
 0x1a8   : > { %2312 = vmatmul.bf16.gmra.mxu3 %v5321_v34  ;;  %v4860_v34 = vld [vmem:[#allocation5 + $0x464] sm:$0xf] }
 0x1aa   : > { %v1908_v54 = vpop.f32.mrf.mxu2 }
 0x1ab   : > { %v1909_v0 = vadd.f32 %v1908_v54, %v1820_v56  ;;  %v1997_v1 = vpop.f32.mrf.mxu3  ;;  %v1732_v2 = vpop.f32.mrf.mxu0  ;;  %v4735_v56 = vld [vmem:[#allocation5 + $0x74] sm:$0xf0]  ;;  %v4828_v54 = vld [vmem:[#allocation5 + $0x364] sm:$0xf] }
 0x1ac   : > { %v1821_v31 = vpop.f32.mrf.mxu1 }
 0x1ad   : > { %v5629_v53 = vadd.f32 %v1997_v1, %v1909_v0  ;;  %v1822_v35 = vadd.f32 %v1821_v31, %v1732_v2  ;;  %v4053_v0 = vor.u32 %v4735_v56, %v4052_v24  ;;  %v4430_v1 = vld [vmem:[#allocation5 + $0x370] sm:$0xf0]  ;;  %v4180_v2 = vld [vmem:[#allocation5 + $0x168] sm:$0xf]  ;;  %v4767_v31 = vld [vmem:[#allocation5 + $0x174] sm:$0xf0] }
 0x1ae   : > { %v4433_v57 = vor.u32 %v4828_v54, %v4430_v1  ;;  %v4181_v3 = vor.u32 %v4767_v31, %v4180_v2  ;;  %v4558_v24 = vld [vmem:[#allocation5 + $0x470] sm:$0xf0] }
 0x1af   : > { %2550 = vmatpush.bf16.msra.mxu2 %v4053_v0  ;;  %v4561_v56 = vor.u32 %v4860_v34, %v4558_v24 }
 0x1b0   : > { %2372 = vmatpush.bf16.msra.mxu0 %v4433_v57  ;;  %2639 = vmatpush.bf16.msra.mxu3 %v4181_v3  ;;  %v3852_v3 = vld [vmem:[%s5199_s17 + $0x150] sm:$0xf] }
 0x1b1   : > { %2461 = vmatpush.bf16.msra.mxu1 %v4561_v56 }
 0x1b2   : > { %v1910_v37 = vpop.f32.mrf.mxu2 }
 0x1b3   : > { %v1911_v18 = vadd.f32 %v1910_v37, %v1822_v35  ;;  %v1999_v16 = vpop.f32.mrf.mxu3  ;;  %v1735_v39 = vpop.f32.mrf.mxu0 }
 0x1b4   : > { %v1824_v14 = vpop.f32.mrf.mxu1 }
 0x1b5   : > { %v5635_v6 = vadd.f32 %v1999_v16, %v1911_v18  ;;  %v1825_v25 = vadd.f32 %v1824_v14, %v1735_v39 }
 0x1b6   : > { %2050 = vmatmul.bf16.gmra.mxu0 %v5633_v15  ;;  %2139 = vmatmul.bf16.gmra.mxu1 %v5337_v44  ;;  %v4679_v44 = vld [vmem:[%s5199_s17 + $0x138] sm:$0xf0] }
 0x1b7   : > { %6753 = vst [vmem:[#allocation87_spill] sm:$0xff] %v5635_v6  ;;  %2228 = vmatmul.bf16.gmra.mxu2 %v5339_v45  ;;  %v3832_v45 = vld [vmem:[%s5199_s17 + $0x128] sm:$0xf] }
 0x1b8   : > { %2317 = vmatmul.bf16.gmra.mxu3 %v5341_v46  ;;  %v5645_v6 = vor.u32 %v4679_v44, %v3832_v45 }
 0x1ba   : > { %v1913_v35 = vpop.f32.mrf.mxu2 }
 0x1bb   : > { %v1914_v37 = vadd.f32 %v1913_v35, %v1825_v25  ;;  %v2002_v18 = vpop.f32.mrf.mxu3  ;;  %v1737_v16 = vpop.f32.mrf.mxu0 }
 0x1bc   : > { %v1826_v39 = vpop.f32.mrf.mxu1 }
 0x1bd   : > { %v5641_v14 = vadd.f32 %v2002_v18, %v1914_v37  ;;  %v1827_v46 = vadd.f32 %v1826_v39, %v1737_v16  ;;  %v4684_v37 = vld [vmem:[%s5199_s17 + $0x160] sm:$0xf0] }
 0x1be   : > { %v5657_v16 = vor.u32 %v4684_v37, %v3852_v3 }
 0x1c0   : > { %6754 = vst [vmem:[#allocation88_spill] sm:$0xff] %v5657_v16 }
 0x1c2   : > { %v1915_v15 = vpop.f32.mrf.mxu2 }
 0x1c3   : > { %v1916_v54 = vadd.f32 %v1915_v15, %v1827_v46  ;;  %v2004_v25 = vpop.f32.mrf.mxu3  ;;  %v1740_v1 = vpop.f32.mrf.mxu0 }
 0x1c4   : > { %v1829_v0 = vpop.f32.mrf.mxu1 }
 0x1c5   : > { %v5647_v2 = vadd.f32 %v2004_v25, %v1916_v54  ;;  %v1830_v31 = vadd.f32 %v1829_v0, %v1740_v1  ;;  %v4036_v0 = vld [vmem:[#allocation5 + $0x48] sm:$0xf] }
 0x1c6   : > { %2055 = vmatmul.bf16.gmra.mxu0 %v5645_v6  ;;  %2144 = vmatmul.bf16.gmra.mxu1 %v5357_v20 }
 0x1c7   : > { %2233 = vmatmul.bf16.gmra.mxu2 %v5359_v21 }
 0x1c8   : > { %2322 = vmatmul.bf16.gmra.mxu3 %v5361_v22 }
 0x1ca   : > { %v1918_v34 = vpop.f32.mrf.mxu2 }
 0x1cb   : > { %v1919_v44 = vadd.f32 %v1918_v34, %v1830_v31  ;;  %v2007_v45 = vpop.f32.mrf.mxu3  ;;  %v1742_v46 = vpop.f32.mrf.mxu0  ;;  %v4731_v31 = vld [vmem:[#allocation5 + $0x54] sm:$0xf0]  ;;  %v4824_v34 = vld [vmem:[#allocation5 + $0x344] sm:$0xf] }
 0x1cc   : > { %v1831_v15 = vpop.f32.mrf.mxu1 }
 0x1cd   : > { %v5653_v35 = vadd.f32 %v2007_v45, %v1919_v44  ;;  %v1832_v57 = vadd.f32 %v1831_v15, %v1742_v46  ;;  %v4037_v44 = vor.u32 %v4731_v31, %v4036_v0  ;;  %v4414_v45 = vld [vmem:[#allocation5 + $0x350] sm:$0xf0]  ;;  %v4164_v46 = vld [vmem:[#allocation5 + $0x148] sm:$0xf]  ;;  %v4763_v15 = vld [vmem:[#allocation5 + $0x154] sm:$0xf0] }
 0x1ce   : > { %v4165_v3 = vor.u32 %v4763_v15, %v4164_v46  ;;  %v4856_v0 = vld [vmem:[#allocation5 + $0x444] sm:$0xf]  ;;  %v4542_v31 = vld [vmem:[#allocation5 + $0x450] sm:$0xf0] }
 0x1cf   : > { %2551 = vmatpush.bf16.msra.mxu2 %v4037_v44  ;;  %v4545_v22 = vor.u32 %v4856_v0, %v4542_v31 }
 0x1d0   : > { %2640 = vmatpush.bf16.msra.mxu3 %v4165_v3 }
 0x1d1   : > { %2462 = vmatpush.bf16.msra.mxu1 %v4545_v22 }
 0x1d2   : > { %v1920_v18 = vpop.f32.mrf.mxu2 }
 0x1d3   : > { %v1921_v39 = vadd.f32 %v1920_v18, %v1832_v57  ;;  %v2009_v24 = vpop.f32.mrf.mxu3  ;;  %v2021_v56 = vpop.f32.mrf.mxu0  ;;  %v4417_v57 = vor.u32 %v4824_v34, %v4414_v45 }
 0x1d4   : > { %v5660_v54 = vadd.f32 %v2021_v56, %v5389_v17  ;;  %v2110_v25 = vpop.f32.mrf.mxu1 }
 0x1d5   : > { %v5662_v1 = vadd.f32 %v2009_v24, %v1921_v39  ;;  %2373 = vmatpush.bf16.msra.mxu0 %v4417_v57 }
 0x1d6   : > { %6755 = vst [vmem:[#allocation89_spill] sm:$0xff] %v5660_v54  ;;  %2060 = vmatmul.bf16.gmra.mxu0 %v5657_v16  ;;  %2149 = vmatmul.bf16.gmra.mxu1 %v5377_v40  ;;  %v4689_v54 = vld [vmem:[%s5199_s17 + $0x188] sm:$0xf0] }
 0x1d7   : > { %2238 = vmatmul.bf16.gmra.mxu2 %v5379_v42  ;;  %v3872_v42 = vld [vmem:[%s5199_s17 + $0x178] sm:$0xf] }
 0x1d8   : > { %2327 = vmatmul.bf16.gmra.mxu3 %v5381_v43  ;;  %v5675_v45 = vor.u32 %v4689_v54, %v3872_v42 }
 0x1da   : > { %v2199_v17 = vpop.f32.mrf.mxu2 }
 0x1db   : > { %v2200_v37 = vadd.f32 %v2199_v17, %v2110_v25  ;;  %v2288_v18 = vpop.f32.mrf.mxu3  ;;  %v2023_v39 = vpop.f32.mrf.mxu0 }
 0x1dc   : > { %v5669_v24 = vadd.f32 %v2023_v39, %v5407_v7  ;;  %v2112_v56 = vpop.f32.mrf.mxu1  ;;  %v4694_v39 = vld [vmem:[%s5199_s17 + $0x1b0] sm:$0xf0] }
 0x1dd   : > { %v5671_v43 = vadd.f32 %v2288_v18, %v2200_v37  ;;  %v3892_v18 = vld [vmem:[%s5199_s17 + $0x1a0] sm:$0xf] }
 0x1de   : > { %v5693_v0 = vor.u32 %v4694_v39, %v3892_v18  ;;  %v4759_v18 = vld [vmem:[#allocation5 + $0x134] sm:$0xf0] }
 0x1e0   : > { %6756 = vst [vmem:[#allocation90_spill] sm:$0xff] %v5693_v0 }
 0x1e2   : > { %v2201_v34 = vpop.f32.mrf.mxu2 }
 0x1e3   : > { %v2202_v25 = vadd.f32 %v2201_v34, %v2112_v56  ;;  %v2290_v46 = vpop.f32.mrf.mxu3  ;;  %v2026_v44 = vpop.f32.mrf.mxu0 }
 0x1e4   : > { %v5678_v7 = vadd.f32 %v2026_v44, %v5413_v19  ;;  %v2115_v15 = vpop.f32.mrf.mxu1 }
 0x1e5   : > { %v5680_v17 = vadd.f32 %v2290_v46, %v2202_v25 }
 0x1e6   : > { %2065 = vmatmul.bf16.gmra.mxu0 %v5675_v45  ;;  %2154 = vmatmul.bf16.gmra.mxu1 %v5399_v59 }
 0x1e7   : > { %2243 = vmatmul.bf16.gmra.mxu2 %v5401_v63 }
 0x1e8   : > { %2332 = vmatmul.bf16.gmra.mxu3 %v5403_v4 }
 0x1ea   : > { %v2204_v22 = vpop.f32.mrf.mxu2 }
 0x1eb   : > { %v2205_v42 = vadd.f32 %v2204_v22, %v2115_v15  ;;  %v2293_v54 = vpop.f32.mrf.mxu3  ;;  %v2028_v57 = vpop.f32.mrf.mxu0  ;;  %v4727_v22 = vld [vmem:[#allocation5 + $0x34] sm:$0xf0] }
 0x1ec   : > { %v5687_v3 = vadd.f32 %v2028_v57, %v5431_v11  ;;  %v2117_v19 = vpop.f32.mrf.mxu1  ;;  %v4020_v11 = vld [vmem:[#allocation5 + $0x28] sm:$0xf]  ;;  %v4398_v57 = vld [vmem:[#allocation5 + $0x330] sm:$0xf0] }
 0x1ed   : > { %v5689_v37 = vadd.f32 %v2293_v54, %v2205_v42  ;;  %v4820_v42 = vld [vmem:[#allocation5 + $0x324] sm:$0xf]  ;;  %v4021_v54 = vor.u32 %v4727_v22, %v4020_v11  ;;  %v4526_v22 = vld [vmem:[#allocation5 + $0x430] sm:$0xf0] }
 0x1ee   : > { %v4401_v39 = vor.u32 %v4820_v42, %v4398_v57  ;;  %v4852_v11 = vld [vmem:[#allocation5 + $0x424] sm:$0xf] }
 0x1ef   : > { %2552 = vmatpush.bf16.msra.mxu2 %v4021_v54 }
 0x1f0   : > { %2374 = vmatpush.bf16.msra.mxu0 %v4401_v39  ;;  %v6760_v39 = vld [vmem:[#allocation61_spill] sm:$0xff] }
 0x1f2   : > { %v2206_v56 = vpop.f32.mrf.mxu2 }
 0x1f3   : > { %v2207_v31 = vadd.f32 %v2206_v56, %v2117_v19  ;;  %v2295_v34 = vpop.f32.mrf.mxu3  ;;  %v2031_v25 = vpop.f32.mrf.mxu0  ;;  %v4148_v19 = vld [vmem:[#allocation5 + $0x128] sm:$0xf] }
 0x1f4   : > { %v5696_v46 = vadd.f32 %v2031_v25, %v5437_v9  ;;  %v2120_v44 = vpop.f32.mrf.mxu1  ;;  %v4149_v56 = vor.u32 %v4759_v18, %v4148_v19 }
 0x1f5   : > { %v5698_v15 = vadd.f32 %v2295_v34, %v2207_v31 }
 0x1f6   : > { %6757 = vst [vmem:[#allocation91_spill] sm:$0xff] %v5696_v46  ;;  %2070 = vmatmul.bf16.gmra.mxu0 %v5693_v0  ;;  %2159 = vmatmul.bf16.gmra.mxu1 %v5423_v58  ;;  %v4529_v46 = vor.u32 %v4852_v11, %v4526_v22  ;;  %v3912_v58 = vld [vmem:[%s5199_s17 + $0x1c8] sm:$0xf]  ;;  %v4699_v0 = vld [vmem:[%s5199_s17 + $0x1d8] sm:$0xf0] }
 0x1f7   : > { %2248 = vmatmul.bf16.gmra.mxu2 %v5425_v5  ;;  %2641 = vmatpush.bf16.msra.mxu3 %v4149_v56  ;;  %v5711_v57 = vor.u32 %v4699_v0, %v3912_v58 }
 0x1f8   : > { %2337 = vmatmul.bf16.gmra.mxu3 %v5427_v8  ;;  %2463 = vmatpush.bf16.msra.mxu1 %v4529_v46 }
 0x1f9   : > { %6758 = vst [vmem:[#allocation92_spill] sm:$0xff] %v5711_v57 }
 0x1fa   : > { %v2209_v9 = vpop.f32.mrf.mxu2 }
 0x1fb   : > { %v2210_v31 = vadd.f32 %v2209_v9, %v2120_v44  ;;  %v2298_v34 = vpop.f32.mrf.mxu3  ;;  %v2033_v25 = vpop.f32.mrf.mxu0 }
 0x1fc   : > { %v5705_v4 = vadd.f32 %v2033_v25, %v5455_v28  ;;  %v2122_v8 = vpop.f32.mrf.mxu1  ;;  %v4704_v25 = vld [vmem:[%s5199_s17 + $0x200] sm:$0xf0] }
 0x1fd   : > { %v5707_v5 = vadd.f32 %v2298_v34, %v2210_v31  ;;  %v3932_v34 = vld [vmem:[%s5199_s17 + $0x1f0] sm:$0xf] }
 0x1fe   : > { %v5729_v22 = vor.u32 %v4704_v25, %v3932_v34  ;;  %v4723_v34 = vld [vmem:[#allocation5 + $0x14] sm:$0xf0]  ;;  %v4816_v25 = vld [vmem:[#allocation5 + $0x304] sm:$0xf] }
 0x200   : > { %6762 = vst [vmem:[#allocation94_spill] sm:$0xff] %v5729_v22 }
 0x202   : > { %v2211_v42 = vpop.f32.mrf.mxu2 }
 0x203   : > { %v2212_v44 = vadd.f32 %v2211_v42, %v2122_v8  ;;  %v2300_v19 = vpop.f32.mrf.mxu3  ;;  %v2036_v54 = vpop.f32.mrf.mxu0 }
 0x204   : > { %v5714_v28 = vadd.f32 %v2036_v54, %v5461_v36  ;;  %v2125_v18 = vpop.f32.mrf.mxu1  ;;  %v6763_v54 = vld [vmem:[#allocation62_spill] sm:$0xff] }
 0x205   : > { %v5716_v9 = vadd.f32 %v2300_v19, %v2212_v44 }
 0x206   : > { %6759 = vst [vmem:[#allocation93_spill] sm:$0xff] %v5714_v28  ;;  %2075 = vmatmul.bf16.gmra.mxu0 %v5711_v57  ;;  %2164 = vmatmul.bf16.gmra.mxu1 %v5447_v48  ;;  %v3952_v48 = vld [vmem:[%s5199_s17 + $0x218] sm:$0xf]  ;;  %v4709_v57 = vld [vmem:[%s5199_s17 + $0x228] sm:$0xf0] }
 0x207   : > { %2253 = vmatmul.bf16.gmra.mxu2 %v5449_v60  ;;  %v4755_v60 = vld [vmem:[#allocation5 + $0x114] sm:$0xf0] }
 0x208   : > { %2342 = vmatmul.bf16.gmra.mxu3 %v5451_v61 }
 0x20a   : > { %v2214_v58 = vpop.f32.mrf.mxu2 }
 0x20b   : > { %v2215_v8 = vadd.f32 %v2214_v58, %v2125_v18  ;;  %v2303_v0 = vpop.f32.mrf.mxu3  ;;  %v2038_v46 = vpop.f32.mrf.mxu0 }
 0x20c   : > { %v5723_v56 = vadd.f32 %v2038_v46, %v6760_v39  ;;  %v2127_v36 = vpop.f32.mrf.mxu1  ;;  %v6766_v46 = vld [vmem:[#allocation57_spill] sm:$0xff]  ;;  %v4004_v39 = vld [vmem:[#allocation5 + $0x8] sm:$0xf] }
 0x20d   : > { %v5725_v31 = vadd.f32 %v2303_v0, %v2215_v8  ;;  %v6767_v8 = vld [vmem:[#allocation58_spill] sm:$0xff]  ;;  %v6768_v0 = vld [vmem:[#allocation59_spill] sm:$0xff] }
 0x20e   : > { %6761 = vst [vmem:[#allocation61_spill] sm:$0xff] %v5723_v56  ;;  %v4132_v56 = vld [vmem:[#allocation5 + $0x108] sm:$0xf] }
 0x212   : > { %v2216_v11 = vpop.f32.mrf.mxu2 }
 0x213   : > { %v2217_v42 = vadd.f32 %v2216_v11, %v2127_v36  ;;  %v2305_v44 = vpop.f32.mrf.mxu3  ;;  %v2041_v19 = vpop.f32.mrf.mxu0  ;;  %v4005_v36 = vor.u32 %v4723_v34, %v4004_v39  ;;  %v4382_v11 = vld [vmem:[#allocation5 + $0x310] sm:$0xf0]  ;;  %v4848_v39 = vld [vmem:[#allocation5 + $0x404] sm:$0xf] }
 0x214   : > { %v5732_v61 = vadd.f32 %v2041_v19, %v6763_v54  ;;  %v2130_v18 = vpop.f32.mrf.mxu1  ;;  %v4510_v34 = vld [vmem:[#allocation5 + $0x410] sm:$0xf0] }
 0x215   : > { %v5734_v58 = vadd.f32 %v2305_v44, %v2217_v42  ;;  %v4385_v42 = vor.u32 %v4816_v25, %v4382_v11  ;;  %v4133_v44 = vor.u32 %v4755_v60, %v4132_v56  ;;  %2553 = vmatpush.bf16.msra.mxu2 %v4005_v36  ;;  %v4513_v28 = vor.u32 %v4848_v39, %v4510_v34 }
 0x216   : > { %6764 = vst [vmem:[#allocation62_spill] sm:$0xff] %v5732_v61  ;;  %2080 = vmatmul.bf16.gmra.mxu0 %v5729_v22  ;;  %2169 = vmatmul.bf16.gmra.mxu1 %v6766_v46  ;;  %v6769_v46 = vld [vmem:[#allocation67_spill] sm:$0xff]  ;;  %v5747_v60 = vor.u32 %v4709_v57, %v3952_v48 }
 0x217   : > { %6765 = vst [vmem:[#allocation95_spill] sm:$0xff] %v5734_v58  ;;  %2258 = vmatmul.bf16.gmra.mxu2 %v6767_v8  ;;  %2375 = vmatpush.bf16.msra.mxu0 %v4385_v42  ;;  %v6775_v42 = vld [vmem:[#allocation64_spill] sm:$0xff] }
 0x218   : > { %2347 = vmatmul.bf16.gmra.mxu3 %v6768_v0  ;;  %2464 = vmatpush.bf16.msra.mxu1 %v4513_v28  ;;  %6771 = vst [vmem:[#allocation96_spill] sm:$0xff] %v5747_v60  ;;  %v6776_v28 = vld [vmem:[#allocation65_spill] sm:$0xff] }
 0x219   : > { %2642 = vmatpush.bf16.msra.mxu3 %v4133_v44 }
 0x21a   : > { %v2219_v19 = vpop.f32.mrf.mxu2 }
 0x21b   : > { %v2220_v54 = vadd.f32 %v2219_v19, %v2130_v18  ;;  %v2308_v61 = vpop.f32.mrf.mxu3  ;;  %v2043_v22 = vpop.f32.mrf.mxu0  ;;  %v6774_v19 = vld [vmem:[#allocation63_spill] sm:$0xff] }
 0x21c   : > { %v5741_v8 = vadd.f32 %v2043_v22, %v6769_v46  ;;  %v2132_v0 = vpop.f32.mrf.mxu1  ;;  %v6772_v22 = vld [vmem:[#allocation68_spill] sm:$0xff] }
 0x21d   : > { %v5743_v58 = vadd.f32 %v2308_v61, %v2220_v54  ;;  %v6777_v54 = vld [vmem:[#allocation73_spill] sm:$0xff] }
 0x21e   : > { %6770 = vst [vmem:[#allocation67_spill] sm:$0xff] %v5741_v8  ;;  %v4719_v8 = vld [vmem:[%s5199_s17 + $0x278] sm:$0xf0] }
 0x222   : > { %v2221_v25 = vpop.f32.mrf.mxu2 }
 0x223   : > { %v2222_v56 = vadd.f32 %v2221_v25, %v2132_v0  ;;  %v2310_v18 = vpop.f32.mrf.mxu3  ;;  %v2046_v36 = vpop.f32.mrf.mxu0 }
 0x224   : > { %v5750_v46 = vadd.f32 %v2046_v36, %v6772_v22  ;;  %v2135_v11 = vpop.f32.mrf.mxu1 }
 0x225   : > { %v5752_v61 = vadd.f32 %v2310_v18, %v2222_v56  ;;  %v3972_v56 = vld [vmem:[%s5199_s17 + $0x240] sm:$0xf]  ;;  %v4714_v18 = vld [vmem:[%s5199_s17 + $0x250] sm:$0xf0] }
 0x226   : > { %6773 = vst [vmem:[#allocation68_spill] sm:$0xff] %v5750_v46  ;;  %2085 = vmatmul.bf16.gmra.mxu0 %v5747_v60  ;;  %2174 = vmatmul.bf16.gmra.mxu1 %v6774_v19  ;;  %v5765_v22 = vor.u32 %v4714_v18, %v3972_v56  ;;  %v4879_v56 = vld [vmem:[#allocation5 + $0x4f4] sm:$0xf0]  ;;  %v4372_v18 = vld [vmem:[#allocation5 + $0x2e8] sm:$0xf] }
 0x227   : > { %2263 = vmatmul.bf16.gmra.mxu2 %v6775_v42  ;;  %v4118_v60 = vld [vmem:[#allocation5 + $0xf8] sm:$0xf0] }
 0x228   : > { %2352 = vmatmul.bf16.gmra.mxu3 %v6776_v28  ;;  %6780 = vst [vmem:[#allocation98_spill] sm:$0xff] %v5765_v22 }
 0x22a   : > { %v2224_v48 = vpop.f32.mrf.mxu2 }
 0x22b   : > { %v2225_v57 = vadd.f32 %v2224_v48, %v2135_v11  ;;  %v2313_v0 = vpop.f32.mrf.mxu3  ;;  %v2048_v44 = vpop.f32.mrf.mxu0 }
 0x22c   : > { %v5759_v39 = vadd.f32 %v2048_v44, %v6777_v54  ;;  %v2137_v34 = vpop.f32.mrf.mxu1  ;;  %v6783_v44 = vld [vmem:[#allocation69_spill] sm:$0xff]  ;;  %v4628_v54 = vld [vmem:[#allocation5 + $0x4e8] sm:$0xf] }
 0x22d   : > { %v5761_v25 = vadd.f32 %v2313_v0, %v2225_v57  ;;  %v6784_v57 = vld [vmem:[#allocation70_spill] sm:$0xff]  ;;  %v6785_v0 = vld [vmem:[#allocation71_spill] sm:$0xff] }
 0x22e   : > { %6778 = vst [vmem:[#allocation73_spill] sm:$0xff] %v5759_v39  ;;  %v4749_v39 = vld [vmem:[#allocation5 + $0xec] sm:$0xf] }
 0x22f   : > { %6779 = vst [vmem:[#allocation97_spill] sm:$0xff] %v5761_v25  ;;  %v3992_v25 = vld [vmem:[%s5199_s17 + $0x268] sm:$0xf] }
 0x232   : > { %v2226_v36 = vpop.f32.mrf.mxu2 }
 0x233   : > { %v2227_v46 = vadd.f32 %v2226_v36, %v2137_v34  ;;  %v2315_v19 = vpop.f32.mrf.mxu3  ;;  %v2051_v42 = vpop.f32.mrf.mxu0  ;;  %v4629_v34 = vor.u32 %v4879_v56, %v4628_v54  ;;  %v4815_v36 = vld [vmem:[#allocation5 + $0x2f4] sm:$0xf0]  ;;  %v4500_v54 = vld [vmem:[#allocation5 + $0x3e8] sm:$0xf] }
 0x234   : > { %v5768_v28 = vadd.f32 %v2051_v42, %v5533_v29  ;;  %v2140_v11 = vpop.f32.mrf.mxu1  ;;  %v4847_v56 = vld [vmem:[#allocation5 + $0x3f4] sm:$0xf0] }
 0x235   : > { %v5770_v48 = vadd.f32 %v2315_v19, %v2227_v46  ;;  %v4373_v46 = vor.u32 %v4815_v36, %v4372_v18  ;;  %v4121_v19 = vor.u32 %v4749_v39, %v4118_v60  ;;  %2902 = vmatpush.bf16.msrb.mxu2 %v4629_v34  ;;  %v5783_v60 = vor.u32 %v4719_v8, %v3992_v25  ;;  %v6788_v36 = vld [vmem:[#allocation78_spill] sm:$0xff] }
 0x236   : > { %6781 = vst [vmem:[#allocation99_spill] sm:$0xff] %v5768_v28  ;;  %2090 = vmatmul.bf16.gmra.mxu0 %v5765_v22  ;;  %2179 = vmatmul.bf16.gmra.mxu1 %v6783_v44 }
 0x237   : > { %6782 = vst [vmem:[#allocation100_spill] sm:$0xff] %v5770_v48  ;;  %2268 = vmatmul.bf16.gmra.mxu2 %v6784_v57  ;;  %2724 = vmatpush.bf16.msrb.mxu0 %v4373_v46  ;;  %v4501_v48 = vor.u32 %v4847_v56, %v4500_v54  ;;  %v6791_v46 = vld [vmem:[#allocation75_spill] sm:$0xff] }
 0x238   : > { %2357 = vmatmul.bf16.gmra.mxu3 %v6785_v0  ;;  %6787 = vst [vmem:[#allocation102_spill] sm:$0xff] %v5783_v60 }
 0x239   : > { %2991 = vmatpush.bf16.msrb.mxu3 %v4121_v19  ;;  %2813 = vmatpush.bf16.msrb.mxu1 %v4501_v48  ;;  %v6792_v19 = vld [vmem:[#allocation76_spill] sm:$0xff] }
 0x23a   : > { %v2229_v29 = vpop.f32.mrf.mxu2 }
 0x23b   : > { %v2230_v42 = vadd.f32 %v2229_v29, %v2140_v11  ;;  %v2318_v28 = vpop.f32.mrf.mxu3  ;;  %v2053_v22 = vpop.f32.mrf.mxu0 }
 0x23c   : > { %v5777_v57 = vadd.f32 %v2053_v22, %v5551_v55  ;;  %v2142_v0 = vpop.f32.mrf.mxu1 }
 0x23d   : > { %v5779_v44 = vadd.f32 %v2318_v28, %v2230_v42  ;;  %v6790_v28 = vld [vmem:[#allocation74_spill] sm:$0xff]  ;;  %v6793_v42 = vld [vmem:[#allocation80_spill] sm:$0xff] }
 0x23e   : > { %6786 = vst [vmem:[#allocation101_spill] sm:$0xff] %v5777_v57 }
 0x242   : > { %v2231_v18 = vpop.f32.mrf.mxu2 }
 0x243   : > { %v2232_v39 = vadd.f32 %v2231_v18, %v2142_v0  ;;  %v2320_v11 = vpop.f32.mrf.mxu3  ;;  %v2056_v34 = vpop.f32.mrf.mxu0 }
 0x244   : > { %v5786_v55 = vadd.f32 %v2056_v34, %v6788_v36  ;;  %v2145_v22 = vpop.f32.mrf.mxu1 }
 0x245   : > { %v5788_v29 = vadd.f32 %v2320_v11, %v2232_v39 }
 0x246   : > { %6789 = vst [vmem:[#allocation78_spill] sm:$0xff] %v5786_v55  ;;  %2095 = vmatmul.bf16.gmra.mxu0 %v5783_v60  ;;  %2184 = vmatmul.bf16.gmra.mxu1 %v6790_v28  ;;  %v4102_v60 = vld [vmem:[#allocation5 + $0xd8] sm:$0xf0] }
 0x247   : > { %2273 = vmatmul.bf16.gmra.mxu2 %v6791_v46 }
 0x248   : > { %2362 = vmatmul.bf16.gmra.mxu3 %v6792_v19  ;;  %v6798_v19 = vld [vmem:[#allocation14_spill] sm:$0xff] }
 0x24a   : > { %v2234_v48 = vpop.f32.mrf.mxu2 }
 0x24b   : > { %v2235_v8 = vadd.f32 %v2234_v48, %v2145_v22  ;;  %v2323_v25 = vpop.f32.mrf.mxu3  ;;  %v2058_v0 = vpop.f32.mrf.mxu0  ;;  %v6799_v22 = vld [vmem:[#allocation79_spill] sm:$0xff] }
 0x24c   : > { %v5795_v54 = vadd.f32 %v2058_v0, %v6793_v42  ;;  %v2147_v56 = vpop.f32.mrf.mxu1  ;;  %v6800_v48 = vld [vmem:[#allocation11_spill] sm:$0xff]  ;;  %v6801_v0 = vld [vmem:[#allocation12_spill] sm:$0xff] }
 0x24d   : > { %v5797_v18 = vadd.f32 %v2323_v25, %v2235_v8  ;;  %v4612_v8 = vld [vmem:[#allocation5 + $0x4c8] sm:$0xf]  ;;  %v4875_v25 = vld [vmem:[#allocation5 + $0x4d4] sm:$0xf0] }
 0x24e   : > { %6794 = vst [vmem:[#allocation80_spill] sm:$0xff] %v5795_v54  ;;  %v4356_v42 = vld [vmem:[#allocation5 + $0x2c8] sm:$0xf]  ;;  %v4745_v54 = vld [vmem:[#allocation5 + $0xcc] sm:$0xf] }
 0x24f   : > { %6795 = vst [vmem:[#allocation103_spill] sm:$0xff] %v5797_v18 }
 0x252   : > { %v2236_v39 = vpop.f32.mrf.mxu2 }
 0x253   : > { %v2237_v11 = vadd.f32 %v2236_v39, %v2147_v56  ;;  %v2325_v34 = vpop.f32.mrf.mxu3  ;;  %v2061_v36 = vpop.f32.mrf.mxu0  ;;  %v4613_v56 = vor.u32 %v4875_v25, %v4612_v8  ;;  %v4811_v39 = vld [vmem:[#allocation5 + $0x2d4] sm:$0xf0] }
 0x254   : > { %v5800_v55 = vadd.f32 %v2061_v36, %v5569_v52  ;;  %v2150_v46 = vpop.f32.mrf.mxu1  ;;  %v4357_v36 = vor.u32 %v4811_v39, %v4356_v42  ;;  %v4843_v8 = vld [vmem:[#allocation5 + $0x3d4] sm:$0xf0] }
 0x255   : > { %v5802_v28 = vadd.f32 %v2325_v34, %v2237_v11  ;;  %2903 = vmatpush.bf16.msrb.mxu2 %v4613_v56 }
 0x256   : > { %6796 = vst [vmem:[#allocation104_spill] sm:$0xff] %v5800_v55  ;;  %2376 = vmatmul.bf16.vlgmr.msra.gmra.mxu0 %v6798_v19  ;;  %2465 = vmatmul.bf16.vlgmr.msra.gmra.mxu1 %v6799_v22  ;;  %v4105_v55 = vor.u32 %v4745_v54, %v4102_v60  ;;  %v4484_v19 = vld [vmem:[#allocation5 + $0x3c8] sm:$0xf] }
 0x257   : > { %6797 = vst [vmem:[#allocation105_spill] sm:$0xff] %v5802_v28  ;;  %2554 = vmatmul.bf16.vlgmr.msra.gmra.mxu2 %v6800_v48  ;;  %2725 = vmatpush.bf16.msrb.mxu0 %v4357_v36  ;;  %v4485_v25 = vor.u32 %v4843_v8, %v4484_v19 }
 0x258   : > { %2643 = vmatmul.bf16.vlgmr.msra.gmra.mxu3 %v6801_v0 }
 0x259   : > { %2992 = vmatpush.bf16.msrb.mxu3 %v4105_v55  ;;  %2814 = vmatpush.bf16.msrb.mxu1 %v4485_v25 }
 0x25a   : > { %v2239_v52 = vpop.f32.mrf.mxu2 }
 0x25b   : > { %v2240_v11 = vadd.f32 %v2239_v52, %v2150_v46  ;;  %v2328_v34 = vpop.f32.mrf.mxu3  ;;  %v2063_v28 = vpop.f32.mrf.mxu0 }
 0x25c   : > { %v5809_v22 = vadd.f32 %v2063_v28, %v5575_v27  ;;  %v2152_v48 = vpop.f32.mrf.mxu1  ;;  %v6803_v27 = vld [vmem:[#allocation18_spill] sm:$0xff] }
 0x25d   : > { %v5811_v0 = vadd.f32 %v2328_v34, %v2240_v11 }
 0x262   : > { %v2241_v18 = vpop.f32.mrf.mxu2 }
 0x263   : > { %v2242_v57 = vadd.f32 %v2241_v18, %v2152_v48  ;;  %v2330_v42 = vpop.f32.mrf.mxu3  ;;  %v2066_v60 = vpop.f32.mrf.mxu0  ;;  %v6804_v48 = vld [vmem:[#allocation82_spill] sm:$0xff] }
 0x264   : > { %v5814_v46 = vadd.f32 %v2066_v60, %v5581_v30  ;;  %v2155_v54 = vpop.f32.mrf.mxu1  ;;  %v6808_v60 = vld [vmem:[#allocation22_spill] sm:$0xff] }
 0x265   : > { %v5816_v56 = vadd.f32 %v2330_v42, %v2242_v57 }
 0x266   : > { %6802 = vst [vmem:[#allocation106_spill] sm:$0xff] %v5814_v46  ;;  %2381 = vmatmul.bf16.gmra.mxu0 %v6803_v27  ;;  %2470 = vmatmul.bf16.gmra.mxu1 %v5573_v62 }
 0x267   : > { %2559 = vmatmul.bf16.gmra.mxu2 %v5237_v12 }
 0x268   : > { %2648 = vmatmul.bf16.gmra.mxu3 %v5239_v13  ;;  %v4741_v13 = vld [vmem:[#allocation5 + $0xac] sm:$0xf] }
 0x26a   : > { %v2244_v55 = vpop.f32.mrf.mxu2 }
 0x26b   : > { %v2245_v28 = vadd.f32 %v2244_v55, %v2155_v54  ;;  %v2333_v19 = vpop.f32.mrf.mxu3  ;;  %v2068_v18 = vpop.f32.mrf.mxu0  ;;  %v6809_v54 = vld [vmem:[#allocation81_spill] sm:$0xff]  ;;  %v6810_v55 = vld [vmem:[#allocation19_spill] sm:$0xff] }
 0x26c   : > { %v5823_v39 = vadd.f32 %v2068_v18, %v6804_v48  ;;  %v2157_v30 = vpop.f32.mrf.mxu1  ;;  %v6811_v18 = vld [vmem:[#allocation20_spill] sm:$0xff] }
 0x26d   : > { %v5825_v52 = vadd.f32 %v2333_v19, %v2245_v28  ;;  %v4596_v28 = vld [vmem:[#allocation5 + $0x4a8] sm:$0xf]  ;;  %v4871_v19 = vld [vmem:[#allocation5 + $0x4b4] sm:$0xf0] }
 0x26e   : > { %6805 = vst [vmem:[#allocation18_spill] sm:$0xff] %v5823_v39  ;;  %v4340_v48 = vld [vmem:[#allocation5 + $0x2a8] sm:$0xf]  ;;  %v4086_v39 = vld [vmem:[#allocation5 + $0xb8] sm:$0xf0] }
 0x272   : > { %v2246_v57 = vpop.f32.mrf.mxu2 }
 0x273   : > { %v2247_v36 = vadd.f32 %v2246_v57, %v2157_v30  ;;  %v2335_v11 = vpop.f32.mrf.mxu3  ;;  %v2071_v34 = vpop.f32.mrf.mxu0  ;;  %v4597_v30 = vor.u32 %v4871_v19, %v4596_v28  ;;  %v4807_v57 = vld [vmem:[#allocation5 + $0x2b4] sm:$0xf0] }
 0x274   : > { %v5828_v8 = vadd.f32 %v2071_v34, %v5593_v41  ;;  %v2160_v25 = vpop.f32.mrf.mxu1  ;;  %v4341_v34 = vor.u32 %v4807_v57, %v4340_v48  ;;  %v4839_v28 = vld [vmem:[#allocation5 + $0x3b4] sm:$0xf0] }
 0x275   : > { %v5830_v42 = vadd.f32 %v2335_v11, %v2247_v36  ;;  %2904 = vmatpush.bf16.msrb.mxu2 %v4597_v30 }
 0x276   : > { %6806 = vst [vmem:[#allocation82_spill] sm:$0xff] %v5828_v8  ;;  %2386 = vmatmul.bf16.gmra.mxu0 %v6808_v60  ;;  %2475 = vmatmul.bf16.gmra.mxu1 %v6809_v54  ;;  %v4089_v8 = vor.u32 %v4741_v13, %v4086_v39  ;;  %v4468_v60 = vld [vmem:[#allocation5 + $0x3a8] sm:$0xf] }
 0x277   : > { %6807 = vst [vmem:[#allocation107_spill] sm:$0xff] %v5830_v42  ;;  %2564 = vmatmul.bf16.gmra.mxu2 %v6810_v55  ;;  %2726 = vmatpush.bf16.msrb.mxu0 %v4341_v34  ;;  %v4469_v19 = vor.u32 %v4839_v28, %v4468_v60 }
 0x278   : > { %2653 = vmatmul.bf16.gmra.mxu3 %v6811_v18 }
 0x279   : > { %2993 = vmatpush.bf16.msrb.mxu3 %v4089_v8  ;;  %2815 = vmatpush.bf16.msrb.mxu1 %v4469_v19 }
 0x27a   : > { %v2249_v41 = vpop.f32.mrf.mxu2 }
 0x27b   : > { %v2250_v36 = vadd.f32 %v2249_v41, %v2160_v25  ;;  %v2338_v11 = vpop.f32.mrf.mxu3  ;;  %v2073_v42 = vpop.f32.mrf.mxu0 }
 0x27c   : > { %v5837_v54 = vadd.f32 %v2073_v42, %v5599_v51  ;;  %v2162_v55 = vpop.f32.mrf.mxu1  ;;  %v6813_v51 = vld [vmem:[#allocation26_spill] sm:$0xff] }
 0x27d   : > { %v5839_v18 = vadd.f32 %v2338_v11, %v2250_v36 }
 0x282   : > { %v2251_v12 = vpop.f32.mrf.mxu2 }
 0x283   : > { %v2252_v46 = vadd.f32 %v2251_v12, %v2162_v55  ;;  %v2340_v48 = vpop.f32.mrf.mxu3  ;;  %v2076_v13 = vpop.f32.mrf.mxu0  ;;  %v6814_v55 = vld [vmem:[#allocation84_spill] sm:$0xff] }
 0x284   : > { %v5842_v39 = vadd.f32 %v2076_v13, %v5605_v10  ;;  %v2165_v25 = vpop.f32.mrf.mxu1  ;;  %v6818_v13 = vld [vmem:[#allocation30_spill] sm:$0xff] }
 0x285   : > { %v5844_v30 = vadd.f32 %v2340_v48, %v2252_v46 }
 0x286   : > { %6812 = vst [vmem:[#allocation108_spill] sm:$0xff] %v5842_v39  ;;  %2391 = vmatmul.bf16.gmra.mxu0 %v6813_v51  ;;  %2480 = vmatmul.bf16.gmra.mxu1 %v5597_v23 }
 0x287   : > { %2569 = vmatmul.bf16.gmra.mxu2 %v5277_v49 }
 0x288   : > { %2658 = vmatmul.bf16.gmra.mxu3 %v5279_v50  ;;  %v4737_v50 = vld [vmem:[#allocation5 + $0x8c] sm:$0xf] }
 0x28a   : > { %v2254_v8 = vpop.f32.mrf.mxu2 }
 0x28b   : > { %v2255_v42 = vadd.f32 %v2254_v8, %v2165_v25  ;;  %v2343_v60 = vpop.f32.mrf.mxu3  ;;  %v2078_v12 = vpop.f32.mrf.mxu0  ;;  %v6819_v25 = vld [vmem:[#allocation83_spill] sm:$0xff] }
 0x28c   : > { %v5851_v57 = vadd.f32 %v2078_v12, %v6814_v55  ;;  %v2167_v10 = vpop.f32.mrf.mxu1  ;;  %v6820_v8 = vld [vmem:[#allocation27_spill] sm:$0xff]  ;;  %v6821_v12 = vld [vmem:[#allocation28_spill] sm:$0xff] }
 0x28d   : > { %v5853_v41 = vadd.f32 %v2343_v60, %v2255_v42  ;;  %v4580_v42 = vld [vmem:[#allocation5 + $0x488] sm:$0xf]  ;;  %v4867_v60 = vld [vmem:[#allocation5 + $0x494] sm:$0xf0] }
 0x28e   : > { %6815 = vst [vmem:[#allocation26_spill] sm:$0xff] %v5851_v57  ;;  %v4324_v55 = vld [vmem:[#allocation5 + $0x288] sm:$0xf]  ;;  %v4070_v57 = vld [vmem:[#allocation5 + $0x98] sm:$0xf0] }
 0x292   : > { %v2256_v46 = vpop.f32.mrf.mxu2 }
 0x293   : > { %v2257_v34 = vadd.f32 %v2256_v46, %v2167_v10  ;;  %v2345_v36 = vpop.f32.mrf.mxu3  ;;  %v2081_v11 = vpop.f32.mrf.mxu0  ;;  %v4581_v10 = vor.u32 %v4867_v60, %v4580_v42  ;;  %v4803_v46 = vld [vmem:[#allocation5 + $0x294] sm:$0xf0] }
 0x294   : > { %v5856_v28 = vadd.f32 %v2081_v11, %v5617_v47  ;;  %v2170_v19 = vpop.f32.mrf.mxu1  ;;  %v4325_v11 = vor.u32 %v4803_v46, %v4324_v55  ;;  %v4835_v42 = vld [vmem:[#allocation5 + $0x394] sm:$0xf0] }
 0x295   : > { %v5858_v48 = vadd.f32 %v2345_v36, %v2257_v34  ;;  %2905 = vmatpush.bf16.msrb.mxu2 %v4581_v10 }
 0x296   : > { %6816 = vst [vmem:[#allocation84_spill] sm:$0xff] %v5856_v28  ;;  %2396 = vmatmul.bf16.gmra.mxu0 %v6818_v13  ;;  %2485 = vmatmul.bf16.gmra.mxu1 %v6819_v25  ;;  %v4073_v28 = vor.u32 %v4737_v50, %v4070_v57  ;;  %v4452_v13 = vld [vmem:[#allocation5 + $0x388] sm:$0xf] }
 0x297   : > { %6817 = vst [vmem:[#allocation109_spill] sm:$0xff] %v5858_v48  ;;  %2574 = vmatmul.bf16.gmra.mxu2 %v6820_v8  ;;  %2727 = vmatpush.bf16.msrb.mxu0 %v4325_v11  ;;  %v4453_v60 = vor.u32 %v4835_v42, %v4452_v13 }
 0x298   : > { %2663 = vmatmul.bf16.gmra.mxu3 %v6821_v12 }
 0x299   : > { %2994 = vmatpush.bf16.msrb.mxu3 %v4073_v28  ;;  %2816 = vmatpush.bf16.msrb.mxu1 %v4453_v60 }
 0x29a   : > { %v2259_v47 = vpop.f32.mrf.mxu2 }
 0x29b   : > { %v2260_v34 = vadd.f32 %v2259_v47, %v2170_v19  ;;  %v2348_v36 = vpop.f32.mrf.mxu3  ;;  %v2083_v48 = vpop.f32.mrf.mxu0 }
 0x29c   : > { %v5865_v25 = vadd.f32 %v2083_v48, %v5623_v26  ;;  %v2172_v8 = vpop.f32.mrf.mxu1  ;;  %v6823_v26 = vld [vmem:[#allocation34_spill] sm:$0xff] }
 0x29d   : > { %v5867_v12 = vadd.f32 %v2348_v36, %v2260_v34 }
 0x2a2   : > { %v2261_v49 = vpop.f32.mrf.mxu2 }
 0x2a3   : > { %v2262_v39 = vadd.f32 %v2261_v49, %v2172_v8  ;;  %v2350_v55 = vpop.f32.mrf.mxu3  ;;  %v2086_v50 = vpop.f32.mrf.mxu0  ;;  %v6824_v8 = vld [vmem:[#allocation87_spill] sm:$0xff] }
 0x2a4   : > { %v5870_v57 = vadd.f32 %v2086_v50, %v5629_v53  ;;  %v2175_v19 = vpop.f32.mrf.mxu1  ;;  %v6828_v50 = vld [vmem:[#allocation38_spill] sm:$0xff] }
 0x2a5   : > { %v5872_v10 = vadd.f32 %v2350_v55, %v2262_v39 }
 0x2a6   : > { %6822 = vst [vmem:[#allocation110_spill] sm:$0xff] %v5870_v57  ;;  %2401 = vmatmul.bf16.gmra.mxu0 %v6823_v26  ;;  %2490 = vmatmul.bf16.gmra.mxu1 %v5621_v38 }
 0x2a7   : > { %2579 = vmatmul.bf16.gmra.mxu2 %v5317_v32  ;;  %v4831_v32 = vld [vmem:[#allocation5 + $0x374] sm:$0xf0] }
 0x2a8   : > { %2668 = vmatmul.bf16.gmra.mxu3 %v5319_v33 }
 0x2aa   : > { %v2264_v28 = vpop.f32.mrf.mxu2 }
 0x2ab   : > { %v2265_v48 = vadd.f32 %v2264_v28, %v2175_v19  ;;  %v2353_v13 = vpop.f32.mrf.mxu3  ;;  %v2088_v49 = vpop.f32.mrf.mxu0  ;;  %v6829_v19 = vld [vmem:[#allocation86_spill] sm:$0xff]  ;;  %v6830_v28 = vld [vmem:[#allocation35_spill] sm:$0xff] }
 0x2ac   : > { %v5879_v46 = vadd.f32 %v2088_v49, %v6824_v8  ;;  %v2177_v53 = vpop.f32.mrf.mxu1  ;;  %v6831_v49 = vld [vmem:[#allocation36_spill] sm:$0xff]  ;;  %v4863_v8 = vld [vmem:[#allocation5 + $0x474] sm:$0xf0] }
 0x2ad   : > { %v5881_v47 = vadd.f32 %v2353_v13, %v2265_v48  ;;  %v4564_v13 = vld [vmem:[#allocation5 + $0x468] sm:$0xf] }
 0x2ae   : > { %6825 = vst [vmem:[#allocation34_spill] sm:$0xff] %v5879_v46 }
 0x2b2   : > { %v2266_v39 = vpop.f32.mrf.mxu2 }
 0x2b3   : > { %v2267_v11 = vadd.f32 %v2266_v39, %v2177_v53  ;;  %v2355_v34 = vpop.f32.mrf.mxu3  ;;  %v2091_v36 = vpop.f32.mrf.mxu0  ;;  %v4308_v53 = vld [vmem:[#allocation5 + $0x268] sm:$0xf] }
 0x2b4   : > { %v5884_v42 = vadd.f32 %v2091_v36, %v5641_v14  ;;  %v2180_v60 = vpop.f32.mrf.mxu1  ;;  %v4565_v14 = vor.u32 %v4863_v8, %v4564_v13  ;;  %v4799_v36 = vld [vmem:[#allocation5 + $0x274] sm:$0xf0] }
 0x2b5   : > { %v5886_v55 = vadd.f32 %v2355_v34, %v2267_v11  ;;  %v4054_v11 = vld [vmem:[#allocation5 + $0x78] sm:$0xf0] }
 0x2b6   : > { %6826 = vst [vmem:[#allocation87_spill] sm:$0xff] %v5884_v42  ;;  %2406 = vmatmul.bf16.gmra.mxu0 %v6828_v50  ;;  %2495 = vmatmul.bf16.gmra.mxu1 %v6829_v19  ;;  %v4733_v42 = vld [vmem:[#allocation5 + $0x6c] sm:$0xf]  ;;  %v4309_v19 = vor.u32 %v4799_v36, %v4308_v53 }
 0x2b7   : > { %6827 = vst [vmem:[#allocation111_spill] sm:$0xff] %v5886_v55  ;;  %2584 = vmatmul.bf16.gmra.mxu2 %v6830_v28  ;;  %v4057_v55 = vor.u32 %v4733_v42, %v4054_v11  ;;  %v4436_v28 = vld [vmem:[#allocation5 + $0x368] sm:$0xf]  ;;  %v6832_v42 = vld [vmem:[#allocation41_spill] sm:$0xff] }
 0x2b8   : > { %2673 = vmatmul.bf16.gmra.mxu3 %v6831_v49  ;;  %2906 = vmatpush.bf16.msrb.mxu2 %v4565_v14  ;;  %v4437_v57 = vor.u32 %v4831_v32, %v4436_v28 }
 0x2b9   : > { %2728 = vmatpush.bf16.msrb.mxu0 %v4309_v19  ;;  %2995 = vmatpush.bf16.msrb.mxu3 %v4057_v55 }
 0x2ba   : > { %v2269_v48 = vpop.f32.mrf.mxu2  ;;  %2817 = vmatpush.bf16.msrb.mxu1 %v4437_v57 }
 0x2bb   : > { %v2270_v39 = vadd.f32 %v2269_v48, %v2180_v60  ;;  %v2358_v33 = vpop.f32.mrf.mxu3  ;;  %v2093_v46 = vpop.f32.mrf.mxu0 }
 0x2bc   : > { %v5893_v34 = vadd.f32 %v2093_v46, %v5647_v2  ;;  %v2182_v50 = vpop.f32.mrf.mxu1 }
 0x2bd   : > { %v5895_v49 = vadd.f32 %v2358_v33, %v2270_v39 }
 0x2c2   : > { %v2271_v60 = vpop.f32.mrf.mxu2 }
 0x2c3   : > { %v2272_v48 = vadd.f32 %v2271_v60, %v2182_v50  ;;  %v2360_v13 = vpop.f32.mrf.mxu3  ;;  %v2096_v8 = vpop.f32.mrf.mxu0 }
 0x2c4   : > { %v5898_v38 = vadd.f32 %v2096_v8, %v5653_v35  ;;  %v2185_v2 = vpop.f32.mrf.mxu1 }
 0x2c5   : > { %v5900_v46 = vadd.f32 %v2360_v13, %v2272_v48  ;;  %v6833_v13 = vld [vmem:[#allocation45_spill] sm:$0xff] }
 0x2c6   : > { %2411 = vmatmul.bf16.gmra.mxu0 %v6832_v42  ;;  %2500 = vmatmul.bf16.gmra.mxu1 %v5645_v6 }
 0x2c7   : > { %2589 = vmatmul.bf16.gmra.mxu2 %v5357_v20 }
 0x2c8   : > { %2678 = vmatmul.bf16.gmra.mxu3 %v5359_v21  ;;  %v4420_v21 = vld [vmem:[#allocation5 + $0x348] sm:$0xf] }
 0x2ca   : > { %v2274_v32 = vpop.f32.mrf.mxu2 }
 0x2cb   : > { %v2275_v33 = vadd.f32 %v2274_v32, %v2185_v2  ;;  %v2363_v57 = vpop.f32.mrf.mxu3  ;;  %v2098_v55 = vpop.f32.mrf.mxu0  ;;  %v6835_v2 = vld [vmem:[#allocation43_spill] sm:$0xff]  ;;  %v4548_v32 = vld [vmem:[#allocation5 + $0x448] sm:$0xf] }
 0x2cc   : > { %v5907_v50 = vadd.f32 %v2098_v55, %v5662_v1  ;;  %v2187_v35 = vpop.f32.mrf.mxu1  ;;  %v6834_v1 = vld [vmem:[#allocation89_spill] sm:$0xff] }
 0x2cd   : > { %v5909_v19 = vadd.f32 %v2363_v57, %v2275_v33  ;;  %v4859_v33 = vld [vmem:[#allocation5 + $0x454] sm:$0xf0]  ;;  %v4292_v57 = vld [vmem:[#allocation5 + $0x248] sm:$0xf] }
 0x2d2   : > { %v2276_v28 = vpop.f32.mrf.mxu2 }
 0x2d3   : > { %v2277_v53 = vadd.f32 %v2276_v28, %v2187_v35  ;;  %v2365_v39 = vpop.f32.mrf.mxu3  ;;  %v2377_v14 = vpop.f32.mrf.mxu0  ;;  %v4549_v28 = vor.u32 %v4859_v33, %v4548_v32 }
 0x2d4   : > { %v2378_v36 = vadd.f32 %v2377_v14, %v5671_v43  ;;  %v2466_v11 = vpop.f32.mrf.mxu1  ;;  %v4038_v14 = vld [vmem:[#allocation5 + $0x58] sm:$0xf0] }
 0x2d5   : > { %v5913_v60 = vadd.f32 %v2365_v39, %v2277_v53  ;;  %v4795_v53 = vld [vmem:[#allocation5 + $0x254] sm:$0xf0]  ;;  %v4729_v39 = vld [vmem:[#allocation5 + $0x4c] sm:$0xf]  ;;  %2907 = vmatpush.bf16.msrb.mxu2 %v4549_v28 }
 0x2d6   : > { %v2467_v48 = vadd.f32 %v2466_v11, %v2378_v36  ;;  %2416 = vmatmul.bf16.gmra.mxu0 %v6833_v13  ;;  %2505 = vmatmul.bf16.gmra.mxu1 %v5657_v16  ;;  %v6836_v28 = vld [vmem:[#allocation48_spill] sm:$0xff] }
 0x2d7   : > { %2594 = vmatmul.bf16.gmra.mxu2 %v5377_v40 }
 0x2d8   : > { %v3436_v8 = vpack.c.bf16 %v2467_v48, %v6834_v1  ;;  %2683 = vmatmul.bf16.gmra.mxu3 %v6835_v2  ;;  %v4293_v1 = vor.u32 %v4795_v53, %v4292_v57  ;;  %v4041_v2 = vor.u32 %v4729_v39, %v4038_v14 }
 0x2da   : > { %3500 = vst [vmem:[%s5920_s20] sm:$0xff] %v3436_v8  ;;  %v2555_v43 = vpop.f32.mrf.mxu2  ;;  %v4827_v8 = vld [vmem:[#allocation5 + $0x354] sm:$0xf0]  ;;  %2729 = vmatpush.bf16.msrb.mxu0 %v4293_v1  ;;  %2996 = vmatpush.bf16.msrb.mxu3 %v4041_v2 }
 0x2db   : > { %v2644_v55 = vpop.f32.mrf.mxu3  ;;  %v2379_v35 = vpop.f32.mrf.mxu0  ;;  %v4421_v40 = vor.u32 %v4827_v8, %v4420_v21 }
 0x2dc   : > { %v5923_v36 = vadd.f32 %v2644_v55, %v2555_v43  ;;  %v2380_v11 = vadd.f32 %v2379_v35, %v5680_v17  ;;  %v2468_v48 = vpop.f32.mrf.mxu1 }
 0x2dd   : > { %2818 = vmatpush.bf16.msrb.mxu1 %v4421_v40 }
 0x2de   : > { %v2469_v16 = vadd.f32 %v2468_v48, %v2380_v11 }
 0x2e0   : > { %v3438_v32 = vpack.c.bf16 %v2469_v16, %v5669_v24 }
 0x2e2   : > { %3502 = vst [vmem:[%s5920_s20 + $0x10] sm:$0xff] %v3438_v32  ;;  %v2557_v33 = vpop.f32.mrf.mxu2 }
 0x2e3   : > { %v2646_v43 = vpop.f32.mrf.mxu3  ;;  %v2382_v55 = vpop.f32.mrf.mxu0 }
 0x2e4   : > { %v5928_v13 = vadd.f32 %v2646_v43, %v2557_v33  ;;  %v2383_v17 = vadd.f32 %v2382_v55, %v5689_v37  ;;  %v2471_v57 = vpop.f32.mrf.mxu1  ;;  %v6837_v43 = vld [vmem:[#allocation52_spill] sm:$0xff]  ;;  %v6838_v55 = vld [vmem:[#allocation90_spill] sm:$0xff] }
 0x2e6   : > { %v2472_v35 = vadd.f32 %v2471_v57, %v2383_v17  ;;  %2421 = vmatmul.bf16.gmra.mxu0 %v6836_v28  ;;  %2510 = vmatmul.bf16.gmra.mxu1 %v5675_v45  ;;  %v6840_v17 = vld [vmem:[#allocation91_spill] sm:$0xff] }
 0x2e7   : > { %2599 = vmatmul.bf16.gmra.mxu2 %v5399_v59 }
 0x2e8   : > { %v3440_v21 = vpack.c.bf16 %v2472_v35, %v5678_v7  ;;  %2688 = vmatmul.bf16.gmra.mxu3 %v5401_v63  ;;  %v6841_v35 = vld [vmem:[#allocation50_spill] sm:$0xff]  ;;  %v6850_v63 = vld [vmem:[#allocation60_spill] sm:$0xff] }
 0x2ea   : > { %3504 = vst [vmem:[%s5920_s20 + $0x20] sm:$0xff] %v3440_v21  ;;  %v2560_v40 = vpop.f32.mrf.mxu2  ;;  %v4532_v21 = vld [vmem:[#allocation5 + $0x428] sm:$0xf] }
 0x2eb   : > { %v2649_v16 = vpop.f32.mrf.mxu3  ;;  %v2384_v24 = vpop.f32.mrf.mxu0 }
 0x2ec   : > { %v5937_v2 = vadd.f32 %v2649_v16, %v2560_v40  ;;  %v2385_v37 = vadd.f32 %v2384_v24, %v5698_v15  ;;  %v2473_v53 = vpop.f32.mrf.mxu1  ;;  %v6839_v15 = vld [vmem:[#allocation49_spill] sm:$0xff]  ;;  %v4855_v40 = vld [vmem:[#allocation5 + $0x434] sm:$0xf0] }
 0x2ee   : > { %v2474_v39 = vadd.f32 %v2473_v53, %v2385_v37  ;;  %v4533_v37 = vor.u32 %v4855_v40, %v4532_v21  ;;  %v4791_v53 = vld [vmem:[#allocation5 + $0x234] sm:$0xf0] }
 0x2f0   : > { %v3442_v14 = vpack.c.bf16 %v2474_v39, %v5687_v3  ;;  %v4725_v39 = vld [vmem:[#allocation5 + $0x2c] sm:$0xf]  ;;  %2908 = vmatpush.bf16.msrb.mxu2 %v4533_v37 }
 0x2f2   : > { %3506 = vst [vmem:[%s5920_s20 + $0x30] sm:$0xff] %v3442_v14  ;;  %v2562_v11 = vpop.f32.mrf.mxu2 }
 0x2f3   : > { %v2651_v48 = vpop.f32.mrf.mxu3  ;;  %v2387_v1 = vpop.f32.mrf.mxu0 }
 0x2f4   : > { %v5942_v7 = vadd.f32 %v2651_v48, %v2562_v11  ;;  %v2388_v8 = vadd.f32 %v2387_v1, %v5707_v5  ;;  %v2476_v32 = vpop.f32.mrf.mxu1  ;;  %v4276_v5 = vld [vmem:[#allocation5 + $0x228] sm:$0xf] }
 0x2f5   : > { %v4277_v1 = vor.u32 %v4791_v53, %v4276_v5  ;;  %v6842_v53 = vld [vmem:[#allocation56_spill] sm:$0xff] }
 0x2f6   : > { %v2477_v33 = vadd.f32 %v2476_v32, %v2388_v8  ;;  %2426 = vmatmul.bf16.gmra.mxu0 %v6837_v43  ;;  %2515 = vmatmul.bf16.gmra.mxu1 %v6838_v55  ;;  %v4022_v8 = vld [vmem:[#allocation5 + $0x38] sm:$0xf0]  ;;  %v4404_v32 = vld [vmem:[#allocation5 + $0x328] sm:$0xf] }
 0x2f7   : > { %2604 = vmatmul.bf16.gmra.mxu2 %v6839_v15  ;;  %2730 = vmatpush.bf16.msrb.mxu0 %v4277_v1 }
 0x2f8   : > { %v3444_v57 = vpack.c.bf16 %v2477_v33, %v6840_v17  ;;  %2693 = vmatmul.bf16.gmra.mxu3 %v6841_v35  ;;  %v4823_v33 = vld [vmem:[#allocation5 + $0x334] sm:$0xf0]  ;;  %v4025_v17 = vor.u32 %v4725_v39, %v4022_v8  ;;  %v6843_v39 = vld [vmem:[#allocation92_spill] sm:$0xff] }
 0x2fa   : > { %3508 = vst [vmem:[%s5920_s20 + $0x40] sm:$0xff] %v3444_v57  ;;  %v2565_v3 = vpop.f32.mrf.mxu2  ;;  %v4405_v57 = vor.u32 %v4823_v33, %v4404_v32  ;;  %2997 = vmatpush.bf16.msrb.mxu3 %v4025_v17 }
 0x2fb   : > { %v2654_v16 = vpop.f32.mrf.mxu3  ;;  %v2389_v24 = vpop.f32.mrf.mxu0 }
 0x2fc   : > { %v5951_v14 = vadd.f32 %v2654_v16, %v2565_v3  ;;  %v2390_v11 = vadd.f32 %v2389_v24, %v5716_v9  ;;  %v2478_v48 = vpop.f32.mrf.mxu1  ;;  %2819 = vmatpush.bf16.msrb.mxu1 %v4405_v57 }
 0x2fe   : > { %v2479_v35 = vadd.f32 %v2478_v48, %v2390_v11  ;;  %v6844_v11 = vld [vmem:[#allocation53_spill] sm:$0xff] }
 0x2ff   : > { %v6845_v48 = vld [vmem:[#allocation93_spill] sm:$0xff] }
 0x300   : > { %v3446_v21 = vpack.c.bf16 %v2479_v35, %v5705_v4  ;;  %v6846_v4 = vld [vmem:[#allocation54_spill] sm:$0xff] }
 0x302   : > { %3510 = vst [vmem:[%s5920_s20 + $0x50] sm:$0xff] %v3446_v21  ;;  %v2567_v3 = vpop.f32.mrf.mxu2 }
 0x303   : > { %v2656_v40 = vpop.f32.mrf.mxu3  ;;  %v2392_v16 = vpop.f32.mrf.mxu0 }
 0x304   : > { %v5956_v9 = vadd.f32 %v2656_v40, %v2567_v3  ;;  %v2393_v24 = vadd.f32 %v2392_v16, %v5725_v31  ;;  %v2481_v5 = vpop.f32.mrf.mxu1  ;;  %v6847_v31 = vld [vmem:[#allocation95_spill] sm:$0xff]  ;;  %v6848_v3 = vld [vmem:[#allocation61_spill] sm:$0xff] }
 0x306   : > { %v2482_v37 = vadd.f32 %v2481_v5, %v2393_v24  ;;  %2431 = vmatmul.bf16.gmra.mxu0 %v6842_v53  ;;  %2520 = vmatmul.bf16.gmra.mxu1 %v6843_v39 }
 0x307   : > { %2609 = vmatmul.bf16.gmra.mxu2 %v6844_v11 }
 0x308   : > { %v3448_v1 = vpack.c.bf16 %v2482_v37, %v6845_v48  ;;  %2698 = vmatmul.bf16.gmra.mxu3 %v6846_v4 }
 0x30a   : > { %3512 = vst [vmem:[%s5920_s20 + $0x60] sm:$0xff] %v3448_v1  ;;  %v2570_v35 = vpop.f32.mrf.mxu2 }
 0x30b   : > { %v2659_v8 = vpop.f32.mrf.mxu3  ;;  %v2394_v32 = vpop.f32.mrf.mxu0 }
 0x30c   : > { %v5965_v33 = vadd.f32 %v2659_v8, %v2570_v35  ;;  %v2395_v17 = vadd.f32 %v2394_v32, %v6847_v31  ;;  %v2483_v57 = vpop.f32.mrf.mxu1  ;;  %v6851_v35 = vld [vmem:[#allocation94_spill] sm:$0xff]  ;;  %v6852_v8 = vld [vmem:[#allocation57_spill] sm:$0xff] }
 0x30d   : > { %v6853_v32 = vld [vmem:[#allocation62_spill] sm:$0xff] }
 0x30e   : > { %v2484_v21 = vadd.f32 %v2483_v57, %v2395_v17  ;;  %v6854_v17 = vld [vmem:[#allocation58_spill] sm:$0xff] }
 0x310   : > { %v3450_v40 = vpack.c.bf16 %v2484_v21, %v6848_v3  ;;  %v4516_v21 = vld [vmem:[#allocation5 + $0x408] sm:$0xf]  ;;  %v4851_v3 = vld [vmem:[#allocation5 + $0x414] sm:$0xf0] }
 0x312   : > { %3514 = vst [vmem:[%s5920_s20 + $0x70] sm:$0xff] %v3450_v40  ;;  %v2572_v16 = vpop.f32.mrf.mxu2 }
 0x313   : > { %v2661_v24 = vpop.f32.mrf.mxu3  ;;  %v2397_v5 = vpop.f32.mrf.mxu0 }
 0x314   : > { %v5970_v37 = vadd.f32 %v2661_v24, %v2572_v16  ;;  %v2398_v48 = vadd.f32 %v2397_v5, %v5743_v58  ;;  %v2486_v1 = vpop.f32.mrf.mxu1  ;;  %v4517_v24 = vor.u32 %v4851_v3, %v4516_v21  ;;  %v4260_v58 = vld [vmem:[#allocation5 + $0x208] sm:$0xf]  ;;  %v4787_v5 = vld [vmem:[#allocation5 + $0x214] sm:$0xf0]  ;;  %v6856_v21 = vld [vmem:[#allocation67_spill] sm:$0xff] }
 0x316   : > { %6849 = vst [vmem:[#allocation41_spill] sm:$0xff] %v5970_v37  ;;  %v2487_v4 = vadd.f32 %v2486_v1, %v2398_v48  ;;  %2436 = vmatmul.bf16.gmra.mxu0 %v6850_v63  ;;  %2525 = vmatmul.bf16.gmra.mxu1 %v6851_v35  ;;  %v4721_v48 = vld [vmem:[#allocation5 + $0xc] sm:$0xf]  ;;  %v4261_v63 = vor.u32 %v4787_v5, %v4260_v58 }
 0x317   : > { %2614 = vmatmul.bf16.gmra.mxu2 %v6852_v8 }
 0x318   : > { %v3452_v31 = vpack.c.bf16 %v2487_v4, %v6853_v32  ;;  %2703 = vmatmul.bf16.gmra.mxu3 %v6854_v17  ;;  %v4006_v4 = vld [vmem:[#allocation5 + $0x18] sm:$0xf0]  ;;  %v4388_v32 = vld [vmem:[#allocation5 + $0x308] sm:$0xf]  ;;  %v4819_v17 = vld [vmem:[#allocation5 + $0x314] sm:$0xf0]  ;;  %2909 = vmatpush.bf16.msrb.mxu2 %v4517_v24 }
 0x319   : > { %v4389_v37 = vor.u32 %v4819_v17, %v4388_v32  ;;  %2731 = vmatpush.bf16.msrb.mxu0 %v4261_v63  ;;  %v6860_v63 = vld [vmem:[#allocation63_spill] sm:$0xff] }
 0x31a   : > { %3516 = vst [vmem:[%s5920_s20 + $0x80] sm:$0xff] %v3452_v31  ;;  %v2575_v57 = vpop.f32.mrf.mxu2  ;;  %v4009_v31 = vor.u32 %v4721_v48, %v4006_v4  ;;  %v6858_v48 = vld [vmem:[#allocation66_spill] sm:$0xff] }
 0x31b   : > { %v2664_v40 = vpop.f32.mrf.mxu3  ;;  %v2399_v16 = vpop.f32.mrf.mxu0  ;;  %2820 = vmatpush.bf16.msrb.mxu1 %v4389_v37  ;;  %v6861_v37 = vld [vmem:[#allocation68_spill] sm:$0xff] }
 0x31c   : > { %v5979_v1 = vadd.f32 %v2664_v40, %v2575_v57  ;;  %v2400_v35 = vadd.f32 %v2399_v16, %v5752_v61  ;;  %v2488_v8 = vpop.f32.mrf.mxu1  ;;  %2998 = vmatpush.bf16.msrb.mxu3 %v4009_v31  ;;  %v6857_v16 = vld [vmem:[#allocation97_spill] sm:$0xff] }
 0x31e   : > { %6855 = vst [vmem:[#allocation89_spill] sm:$0xff] %v5979_v1  ;;  %v2489_v11 = vadd.f32 %v2488_v8, %v2400_v35  ;;  %v6859_v35 = vld [vmem:[#allocation96_spill] sm:$0xff] }
 0x320   : > { %v3454_v3 = vpack.c.bf16 %v2489_v11, %v6856_v21  ;;  %v6862_v11 = vld [vmem:[#allocation64_spill] sm:$0xff] }
 0x322   : > { %3518 = vst [vmem:[%s5920_s20 + $0x90] sm:$0xff] %v3454_v3  ;;  %v2577_v57 = vpop.f32.mrf.mxu2 }
 0x323   : > { %v2666_v40 = vpop.f32.mrf.mxu3  ;;  %v2402_v1 = vpop.f32.mrf.mxu0 }
 0x324   : > { %v5984_v61 = vadd.f32 %v2666_v40, %v2577_v57  ;;  %v2403_v58 = vadd.f32 %v2402_v1, %v6857_v16  ;;  %v2491_v5 = vpop.f32.mrf.mxu1  ;;  %v6863_v1 = vld [vmem:[#allocation100_spill] sm:$0xff]  ;;  %v6864_v40 = vld [vmem:[#allocation73_spill] sm:$0xff] }
 0x326   : > { %v2492_v24 = vadd.f32 %v2491_v5, %v2403_v58  ;;  %2441 = vmatmul.bf16.gmra.mxu0 %v6858_v48  ;;  %2530 = vmatmul.bf16.gmra.mxu1 %v6859_v35  ;;  %v6866_v35 = vld [vmem:[#allocation72_spill] sm:$0xff] }
 0x327   : > { %2619 = vmatmul.bf16.gmra.mxu2 %v6860_v63 }
 0x328   : > { %v3456_v8 = vpack.c.bf16 %v2492_v24, %v6861_v37  ;;  %2708 = vmatmul.bf16.gmra.mxu3 %v6862_v11 }
 0x32a   : > { %3520 = vst [vmem:[%s5920_s20 + $0xa0] sm:$0xff] %v3456_v8  ;;  %v2580_v17 = vpop.f32.mrf.mxu2 }
 0x32b   : > { %v2669_v4 = vpop.f32.mrf.mxu3  ;;  %v2404_v32 = vpop.f32.mrf.mxu0 }
 0x32c   : > { %v5993_v31 = vadd.f32 %v2669_v4, %v2580_v17  ;;  %v2405_v21 = vadd.f32 %v2404_v32, %v6863_v1  ;;  %v2493_v3 = vpop.f32.mrf.mxu1  ;;  %v6867_v17 = vld [vmem:[#allocation98_spill] sm:$0xff]  ;;  %v6868_v4 = vld [vmem:[#allocation69_spill] sm:$0xff]  ;;  %v6869_v32 = vld [vmem:[#allocation99_spill] sm:$0xff] }
 0x32e   : > { %v2494_v57 = vadd.f32 %v2493_v3, %v2405_v21  ;;  %v6870_v21 = vld [vmem:[#allocation70_spill] sm:$0xff] }
 0x330   : > { %v3458_v16 = vpack.c.bf16 %v2494_v57, %v6864_v40  ;;  %v4845_v57 = vld [vmem:[#allocation5 + $0x3ec] sm:$0xf]  ;;  %v4502_v40 = vld [vmem:[#allocation5 + $0x3f8] sm:$0xf0] }
 0x332   : > { %3522 = vst [vmem:[%s5920_s20 + $0xb0] sm:$0xff] %v3458_v16  ;;  %v2582_v58 = vpop.f32.mrf.mxu2 }
 0x333   : > { %v2671_v5 = vpop.f32.mrf.mxu3  ;;  %v2407_v63 = vpop.f32.mrf.mxu0 }
 0x334   : > { %v5998_v24 = vadd.f32 %v2671_v5, %v2582_v58  ;;  %v2408_v37 = vadd.f32 %v2407_v63, %v5779_v44  ;;  %v2496_v8 = vpop.f32.mrf.mxu1  ;;  %v4505_v5 = vor.u32 %v4845_v57, %v4502_v40  ;;  %v4781_v44 = vld [vmem:[#allocation5 + $0x1ec] sm:$0xf]  ;;  %v4246_v63 = vld [vmem:[#allocation5 + $0x1f8] sm:$0xf0]  ;;  %v6872_v57 = vld [vmem:[#allocation101_spill] sm:$0xff] }
 0x336   : > { %6865 = vst [vmem:[#allocation48_spill] sm:$0xff] %v5998_v24  ;;  %v2497_v11 = vadd.f32 %v2496_v8, %v2408_v37  ;;  %2446 = vmatmul.bf16.gmra.mxu0 %v6866_v35  ;;  %2535 = vmatmul.bf16.gmra.mxu1 %v6867_v17  ;;  %v4877_v37 = vld [vmem:[#allocation5 + $0x4ec] sm:$0xf]  ;;  %v4249_v35 = vor.u32 %v4781_v44, %v4246_v63 }
 0x337   : > { %2624 = vmatmul.bf16.gmra.mxu2 %v6868_v4 }
 0x338   : > { %v3460_v1 = vpack.c.bf16 %v2497_v11, %v6869_v32  ;;  %2713 = vmatmul.bf16.gmra.mxu3 %v6870_v21  ;;  %v4630_v11 = vld [vmem:[#allocation5 + $0x4f8] sm:$0xf0]  ;;  %v4813_v32 = vld [vmem:[#allocation5 + $0x2ec] sm:$0xf]  ;;  %3258 = vmatpush.bf16.msra.mxu2 %v4505_v5 }
 0x339   : > { %v4374_v21 = vld [vmem:[#allocation5 + $0x2f8] sm:$0xf0]  ;;  %3080 = vmatpush.bf16.msra.mxu0 %v4249_v35 }
 0x33a   : > { %3524 = vst [vmem:[%s5920_s20 + $0xc0] sm:$0xff] %v3460_v1  ;;  %v2585_v3 = vpop.f32.mrf.mxu2  ;;  %v4633_v1 = vor.u32 %v4877_v37, %v4630_v11  ;;  %v4377_v24 = vor.u32 %v4813_v32, %v4374_v21  ;;  %v6874_v37 = vld [vmem:[#allocation77_spill] sm:$0xff]  ;;  %v6876_v35 = vld [vmem:[#allocation74_spill] sm:$0xff] }
 0x33b   : > { %v2674_v16 = vpop.f32.mrf.mxu3  ;;  %v2409_v58 = vpop.f32.mrf.mxu0 }
 0x33c   : > { %v6007_v8 = vadd.f32 %v2674_v16, %v2585_v3  ;;  %v2410_v17 = vadd.f32 %v2409_v58, %v5788_v29  ;;  %v2498_v4 = vpop.f32.mrf.mxu1  ;;  %3347 = vmatpush.bf16.msra.mxu3 %v4633_v1  ;;  %3169 = vmatpush.bf16.msra.mxu1 %v4377_v24  ;;  %v6873_v58 = vld [vmem:[#allocation103_spill] sm:$0xff]  ;;  %v6877_v24 = vld [vmem:[#allocation78_spill] sm:$0xff] }
 0x33e   : > { %6871 = vst [vmem:[#allocation49_spill] sm:$0xff] %v6007_v8  ;;  %v2499_v48 = vadd.f32 %v2498_v4, %v2410_v17  ;;  %v6875_v17 = vld [vmem:[#allocation102_spill] sm:$0xff] }
 0x340   : > { %v3462_v40 = vpack.c.bf16 %v2499_v48, %v6872_v57  ;;  %v6878_v48 = vld [vmem:[#allocation75_spill] sm:$0xff] }
 0x342   : > { %3526 = vst [vmem:[%s5920_s20 + $0xd0] sm:$0xff] %v3462_v40  ;;  %v2587_v3 = vpop.f32.mrf.mxu2 }
 0x343   : > { %v2676_v16 = vpop.f32.mrf.mxu3  ;;  %v2412_v8 = vpop.f32.mrf.mxu0 }
 0x344   : > { %v6012_v29 = vadd.f32 %v2676_v16, %v2587_v3  ;;  %v2413_v44 = vadd.f32 %v2412_v8, %v6873_v58  ;;  %v2501_v63 = vpop.f32.mrf.mxu1  ;;  %v6879_v8 = vld [vmem:[#allocation105_spill] sm:$0xff]  ;;  %v6880_v16 = vld [vmem:[#allocation80_spill] sm:$0xff] }
 0x346   : > { %v2502_v5 = vadd.f32 %v2501_v63, %v2413_v44  ;;  %2451 = vmatmul.bf16.gmra.mxu0 %v6874_v37  ;;  %2540 = vmatmul.bf16.gmra.mxu1 %v6875_v17  ;;  %v6882_v17 = vld [vmem:[#allocation13_spill] sm:$0xff] }
 0x347   : > { %2629 = vmatmul.bf16.gmra.mxu2 %v6876_v35 }
 0x348   : > { %v3464_v4 = vpack.c.bf16 %v2502_v5, %v6877_v24  ;;  %2718 = vmatmul.bf16.gmra.mxu3 %v6878_v48 }
 0x34a   : > { %3528 = vst [vmem:[%s5920_s20 + $0xe0] sm:$0xff] %v3464_v4  ;;  %v2590_v21 = vpop.f32.mrf.mxu2 }
 0x34b   : > { %v2679_v11 = vpop.f32.mrf.mxu3  ;;  %v2414_v32 = vpop.f32.mrf.mxu0 }
 0x34c   : > { %v6021_v1 = vadd.f32 %v2679_v11, %v2590_v21  ;;  %v2415_v57 = vadd.f32 %v2414_v32, %v6879_v8  ;;  %v2503_v40 = vpop.f32.mrf.mxu1  ;;  %v6883_v21 = vld [vmem:[#allocation14_spill] sm:$0xff]  ;;  %v6884_v11 = vld [vmem:[#allocation79_spill] sm:$0xff]  ;;  %v6885_v32 = vld [vmem:[#allocation104_spill] sm:$0xff] }
 0x34e   : > { %v2504_v3 = vadd.f32 %v2503_v40, %v2415_v57  ;;  %v6886_v57 = vld [vmem:[#allocation11_spill] sm:$0xff] }
 0x350   : > { %v3466_v58 = vpack.c.bf16 %v2504_v3, %v6880_v16  ;;  %v4841_v3 = vld [vmem:[#allocation5 + $0x3cc] sm:$0xf]  ;;  %v4486_v16 = vld [vmem:[#allocation5 + $0x3d8] sm:$0xf0] }
 0x352   : > { %3530 = vst [vmem:[%s5920_s20 + $0xf0] sm:$0xff] %v3466_v58  ;;  %v2592_v44 = vpop.f32.mrf.mxu2 }
 0x353   : > { %v2681_v63 = vpop.f32.mrf.mxu3  ;;  %v2417_v35 = vpop.f32.mrf.mxu0 }
 0x354   : > { %v6026_v5 = vadd.f32 %v2681_v63, %v2592_v44  ;;  %v2418_v24 = vadd.f32 %v2417_v35, %v5811_v0  ;;  %v2506_v4 = vpop.f32.mrf.mxu1  ;;  %v4489_v63 = vor.u32 %v4841_v3, %v4486_v16  ;;  %v4777_v0 = vld [vmem:[#allocation5 + $0x1cc] sm:$0xf]  ;;  %v4230_v35 = vld [vmem:[#allocation5 + $0x1d8] sm:$0xf0] }
 0x356   : > { %6881 = vst [vmem:[#allocation91_spill] sm:$0xff] %v6026_v5  ;;  %v2507_v48 = vadd.f32 %v2506_v4, %v2418_v24  ;;  %2732 = vmatmul.bf16.vlgmr.msrb.gmra.mxu0 %v6882_v17  ;;  %2821 = vmatmul.bf16.vlgmr.msrb.gmra.mxu1 %v6883_v21  ;;  %v4873_v24 = vld [vmem:[#allocation5 + $0x4cc] sm:$0xf]  ;;  %v4233_v17 = vor.u32 %v4777_v0, %v4230_v35  ;;  %v6887_v35 = vld [vmem:[#allocation17_spill] sm:$0xff] }
 0x357   : > { %2910 = vmatmul.bf16.vlgmr.msrb.gmra.mxu2 %v6884_v11 }
 0x358   : > { %v3468_v8 = vpack.c.bf16 %v2507_v48, %v6885_v32  ;;  %2999 = vmatmul.bf16.vlgmr.msrb.gmra.mxu3 %v6886_v57  ;;  %v4614_v48 = vld [vmem:[#allocation5 + $0x4d8] sm:$0xf0]  ;;  %v4809_v32 = vld [vmem:[#allocation5 + $0x2cc] sm:$0xf]  ;;  %3259 = vmatpush.bf16.msra.mxu2 %v4489_v63 }
 0x359   : > { %v4358_v57 = vld [vmem:[#allocation5 + $0x2d8] sm:$0xf0]  ;;  %3081 = vmatpush.bf16.msra.mxu0 %v4233_v17 }
 0x35a   : > { %3532 = vst [vmem:[%s5920_s20 + $0x100] sm:$0xff] %v3468_v8  ;;  %v2595_v40 = vpop.f32.mrf.mxu2  ;;  %v4617_v8 = vor.u32 %v4873_v24, %v4614_v48  ;;  %v4361_v5 = vor.u32 %v4809_v32, %v4358_v57  ;;  %v6888_v17 = vld [vmem:[#allocation106_spill] sm:$0xff] }
 0x35b   : > { %v2684_v58 = vpop.f32.mrf.mxu3  ;;  %v2419_v44 = vpop.f32.mrf.mxu0 }
 0x35c   : > { %v6035_v4 = vadd.f32 %v2684_v58, %v2595_v40  ;;  %v2420_v21 = vadd.f32 %v2419_v44, %v5816_v56  ;;  %v2508_v11 = vpop.f32.mrf.mxu1  ;;  %3348 = vmatpush.bf16.msra.mxu3 %v4617_v8  ;;  %3170 = vmatpush.bf16.msra.mxu1 %v4361_v5  ;;  %v6891_v8 = vld [vmem:[#allocation18_spill] sm:$0xff] }
 0x35e   : > { %v2509_v37 = vadd.f32 %v2508_v11, %v2420_v21 }
 0x360   : > { %v3470_v3 = vpack.c.bf16 %v2509_v37, %v5809_v22  ;;  %v6889_v22 = vld [vmem:[#allocation15_spill] sm:$0xff] }
 0x362   : > { %3534 = vst [vmem:[%s5920_s20 + $0x110] sm:$0xff] %v3470_v3  ;;  %v2597_v40 = vpop.f32.mrf.mxu2 }
 0x363   : > { %v2686_v16 = vpop.f32.mrf.mxu3  ;;  %v2422_v58 = vpop.f32.mrf.mxu0 }
 0x364   : > { %v6040_v56 = vadd.f32 %v2686_v16, %v2597_v40  ;;  %v2423_v44 = vadd.f32 %v2422_v58, %v5825_v52  ;;  %v2511_v0 = vpop.f32.mrf.mxu1  ;;  %v6890_v52 = vld [vmem:[#allocation107_spill] sm:$0xff] }
 0x366   : > { %v2512_v63 = vadd.f32 %v2511_v0, %v2423_v44  ;;  %2737 = vmatmul.bf16.gmra.mxu0 %v6887_v35  ;;  %2826 = vmatmul.bf16.gmra.mxu1 %v6803_v27 }
 0x367   : > { %2915 = vmatmul.bf16.gmra.mxu2 %v5573_v62 }
 0x368   : > { %v3472_v5 = vpack.c.bf16 %v2512_v63, %v6888_v17  ;;  %3004 = vmatmul.bf16.gmra.mxu3 %v6889_v22  ;;  %v6894_v22 = vld [vmem:[#allocation22_spill] sm:$0xff] }
 0x36a   : > { %3536 = vst [vmem:[%s5920_s20 + $0x120] sm:$0xff] %v3472_v5  ;;  %v2600_v37 = vpop.f32.mrf.mxu2  ;;  %v6893_v5 = vld [vmem:[#allocation21_spill] sm:$0xff] }
 0x36b   : > { %v2689_v21 = vpop.f32.mrf.mxu3  ;;  %v2424_v11 = vpop.f32.mrf.mxu0 }
 0x36c   : > { %v6049_v24 = vadd.f32 %v2689_v21, %v2600_v37  ;;  %v2425_v48 = vadd.f32 %v2424_v11, %v6890_v52  ;;  %v2513_v32 = vpop.f32.mrf.mxu1  ;;  %v6895_v37 = vld [vmem:[#allocation81_spill] sm:$0xff]  ;;  %v6896_v21 = vld [vmem:[#allocation82_spill] sm:$0xff]  ;;  %v6897_v52 = vld [vmem:[#allocation19_spill] sm:$0xff] }
 0x36e   : > { %v2514_v57 = vadd.f32 %v2513_v32, %v2425_v48  ;;  %v4837_v32 = vld [vmem:[#allocation5 + $0x3ac] sm:$0xf] }
 0x370   : > { %v3474_v3 = vpack.c.bf16 %v2514_v57, %v6891_v8  ;;  %v4470_v57 = vld [vmem:[#allocation5 + $0x3b8] sm:$0xf0] }
 0x372   : > { %3538 = vst [vmem:[%s5920_s20 + $0x130] sm:$0xff] %v3474_v3  ;;  %v2602_v40 = vpop.f32.mrf.mxu2 }
 0x373   : > { %v2691_v16 = vpop.f32.mrf.mxu3  ;;  %v2427_v58 = vpop.f32.mrf.mxu0 }
 0x374   : > { %v6054_v44 = vadd.f32 %v2691_v16, %v2602_v40  ;;  %v2428_v0 = vadd.f32 %v2427_v58, %v5839_v18  ;;  %v2516_v63 = vpop.f32.mrf.mxu1  ;;  %v4473_v40 = vor.u32 %v4837_v32, %v4470_v57  ;;  %v4773_v18 = vld [vmem:[#allocation5 + $0x1ac] sm:$0xf]  ;;  %v4214_v16 = vld [vmem:[#allocation5 + $0x1b8] sm:$0xf0] }
 0x375   : > { %v4869_v58 = vld [vmem:[#allocation5 + $0x4ac] sm:$0xf] }
 0x376   : > { %6892 = vst [vmem:[#allocation93_spill] sm:$0xff] %v6054_v44  ;;  %v2517_v17 = vadd.f32 %v2516_v63, %v2428_v0  ;;  %2742 = vmatmul.bf16.gmra.mxu0 %v6893_v5  ;;  %2831 = vmatmul.bf16.gmra.mxu1 %v6894_v22  ;;  %v4217_v22 = vor.u32 %v4773_v18, %v4214_v16  ;;  %v6898_v16 = vld [vmem:[#allocation25_spill] sm:$0xff] }
 0x377   : > { %2920 = vmatmul.bf16.gmra.mxu2 %v6895_v37 }
 0x378   : > { %v3476_v11 = vpack.c.bf16 %v2517_v17, %v6896_v21  ;;  %3009 = vmatmul.bf16.gmra.mxu3 %v6897_v52  ;;  %v4598_v17 = vld [vmem:[#allocation5 + $0x4b8] sm:$0xf0]  ;;  %v4805_v21 = vld [vmem:[#allocation5 + $0x2ac] sm:$0xf]  ;;  %3260 = vmatpush.bf16.msra.mxu2 %v4473_v40 }
 0x379   : > { %v4342_v52 = vld [vmem:[#allocation5 + $0x2b8] sm:$0xf0]  ;;  %3082 = vmatpush.bf16.msra.mxu0 %v4217_v22 }
 0x37a   : > { %3540 = vst [vmem:[%s5920_s20 + $0x140] sm:$0xff] %v3476_v11  ;;  %v2605_v48 = vpop.f32.mrf.mxu2  ;;  %v4601_v11 = vor.u32 %v4869_v58, %v4598_v17  ;;  %v4345_v5 = vor.u32 %v4805_v21, %v4342_v52 }
 0x37b   : > { %v2694_v8 = vpop.f32.mrf.mxu3  ;;  %v2429_v3 = vpop.f32.mrf.mxu0 }
 0x37c   : > { %v6063_v0 = vadd.f32 %v2694_v8, %v2605_v48  ;;  %v2430_v63 = vadd.f32 %v2429_v3, %v5844_v30  ;;  %v2518_v37 = vpop.f32.mrf.mxu1  ;;  %3349 = vmatpush.bf16.msra.mxu3 %v4601_v11  ;;  %3171 = vmatpush.bf16.msra.mxu1 %v4345_v5  ;;  %v6899_v5 = vld [vmem:[#allocation108_spill] sm:$0xff]  ;;  %v6902_v11 = vld [vmem:[#allocation26_spill] sm:$0xff] }
 0x37e   : > { %v2519_v44 = vadd.f32 %v2518_v37, %v2430_v63 }
 0x380   : > { %v3478_v32 = vpack.c.bf16 %v2519_v44, %v5837_v54  ;;  %v6900_v54 = vld [vmem:[#allocation23_spill] sm:$0xff] }
 0x382   : > { %3542 = vst [vmem:[%s5920_s20 + $0x150] sm:$0xff] %v3478_v32  ;;  %v2607_v48 = vpop.f32.mrf.mxu2 }
 0x383   : > { %v2696_v57 = vpop.f32.mrf.mxu3  ;;  %v2432_v8 = vpop.f32.mrf.mxu0 }
 0x384   : > { %v6068_v30 = vadd.f32 %v2696_v57, %v2607_v48  ;;  %v2433_v3 = vadd.f32 %v2432_v8, %v5853_v41  ;;  %v2521_v18 = vpop.f32.mrf.mxu1  ;;  %v6901_v41 = vld [vmem:[#allocation109_spill] sm:$0xff] }
 0x386   : > { %v2522_v40 = vadd.f32 %v2521_v18, %v2433_v3  ;;  %2747 = vmatmul.bf16.gmra.mxu0 %v6898_v16  ;;  %2836 = vmatmul.bf16.gmra.mxu1 %v6813_v51 }
 0x387   : > { %2925 = vmatmul.bf16.gmra.mxu2 %v5597_v23 }
 0x388   : > { %v3480_v22 = vpack.c.bf16 %v2522_v40, %v6899_v5  ;;  %3014 = vmatmul.bf16.gmra.mxu3 %v6900_v54  ;;  %v6905_v54 = vld [vmem:[#allocation30_spill] sm:$0xff] }
 0x38a   : > { %3544 = vst [vmem:[%s5920_s20 + $0x160] sm:$0xff] %v3480_v22  ;;  %v2610_v44 = vpop.f32.mrf.mxu2  ;;  %v6904_v22 = vld [vmem:[#allocation29_spill] sm:$0xff] }
 0x38b   : > { %v2699_v37 = vpop.f32.mrf.mxu3  ;;  %v2434_v58 = vpop.f32.mrf.mxu0 }
 0x38c   : > { %v6077_v63 = vadd.f32 %v2699_v37, %v2610_v44  ;;  %v2435_v17 = vadd.f32 %v2434_v58, %v6901_v41  ;;  %v2523_v21 = vpop.f32.mrf.mxu1  ;;  %v6906_v44 = vld [vmem:[#allocation83_spill] sm:$0xff]  ;;  %v6907_v37 = vld [vmem:[#allocation84_spill] sm:$0xff] }
 0x38d   : > { %v6908_v41 = vld [vmem:[#allocation27_spill] sm:$0xff] }
 0x38e   : > { %v2524_v52 = vadd.f32 %v2523_v21, %v2435_v17  ;;  %v4833_v21 = vld [vmem:[#allocation5 + $0x38c] sm:$0xf] }
 0x390   : > { %v3482_v32 = vpack.c.bf16 %v2524_v52, %v6902_v11  ;;  %v4454_v52 = vld [vmem:[#allocation5 + $0x398] sm:$0xf0] }
 0x392   : > { %3546 = vst [vmem:[%s5920_s20 + $0x170] sm:$0xff] %v3482_v32  ;;  %v2612_v48 = vpop.f32.mrf.mxu2 }
 0x393   : > { %v2701_v57 = vpop.f32.mrf.mxu3  ;;  %v2437_v8 = vpop.f32.mrf.mxu0 }
 0x394   : > { %v6082_v3 = vadd.f32 %v2701_v57, %v2612_v48  ;;  %v2438_v18 = vadd.f32 %v2437_v8, %v5867_v12  ;;  %v2526_v40 = vpop.f32.mrf.mxu1  ;;  %v4457_v48 = vor.u32 %v4833_v21, %v4454_v52  ;;  %v4769_v12 = vld [vmem:[#allocation5 + $0x18c] sm:$0xf]  ;;  %v4198_v57 = vld [vmem:[#allocation5 + $0x198] sm:$0xf0] }
 0x395   : > { %v4865_v8 = vld [vmem:[#allocation5 + $0x48c] sm:$0xf] }
 0x396   : > { %6903 = vst [vmem:[#allocation95_spill] sm:$0xff] %v6082_v3  ;;  %v2527_v5 = vadd.f32 %v2526_v40, %v2438_v18  ;;  %2752 = vmatmul.bf16.gmra.mxu0 %v6904_v22  ;;  %2841 = vmatmul.bf16.gmra.mxu1 %v6905_v54  ;;  %v4201_v54 = vor.u32 %v4769_v12, %v4198_v57  ;;  %v6909_v57 = vld [vmem:[#allocation33_spill] sm:$0xff] }
 0x397   : > { %2930 = vmatmul.bf16.gmra.mxu2 %v6906_v44 }
 0x398   : > { %v3484_v58 = vpack.c.bf16 %v2527_v5, %v6907_v37  ;;  %3019 = vmatmul.bf16.gmra.mxu3 %v6908_v41  ;;  %v4582_v5 = vld [vmem:[#allocation5 + $0x498] sm:$0xf0]  ;;  %v4801_v37 = vld [vmem:[#allocation5 + $0x28c] sm:$0xf]  ;;  %3261 = vmatpush.bf16.msra.mxu2 %v4457_v48 }
 0x399   : > { %v4326_v41 = vld [vmem:[#allocation5 + $0x298] sm:$0xf0]  ;;  %3083 = vmatpush.bf16.msra.mxu0 %v4201_v54  ;;  %v6910_v54 = vld [vmem:[#allocation85_spill] sm:$0xff] }
 0x39a   : > { %3548 = vst [vmem:[%s5920_s20 + $0x180] sm:$0xff] %v3484_v58  ;;  %v2615_v17 = vpop.f32.mrf.mxu2  ;;  %v4585_v58 = vor.u32 %v4865_v8, %v4582_v5  ;;  %v4329_v22 = vor.u32 %v4801_v37, %v4326_v41 }
 0x39b   : > { %v2704_v11 = vpop.f32.mrf.mxu3  ;;  %v2439_v32 = vpop.f32.mrf.mxu0 }
 0x39c   : > { %v6091_v18 = vadd.f32 %v2704_v11, %v2615_v17  ;;  %v2440_v40 = vadd.f32 %v2439_v32, %v5872_v10  ;;  %v2528_v44 = vpop.f32.mrf.mxu1  ;;  %3350 = vmatpush.bf16.msra.mxu3 %v4585_v58  ;;  %3172 = vmatpush.bf16.msra.mxu1 %v4329_v22  ;;  %v6911_v22 = vld [vmem:[#allocation110_spill] sm:$0xff] }
 0x39e   : > { %v2529_v3 = vadd.f32 %v2528_v44, %v2440_v40 }
 0x3a0   : > { %v3486_v21 = vpack.c.bf16 %v2529_v3, %v5865_v25  ;;  %v6912_v25 = vld [vmem:[#allocation31_spill] sm:$0xff] }
 0x3a2   : > { %3550 = vst [vmem:[%s5920_s20 + $0x190] sm:$0xff] %v3486_v21  ;;  %v2617_v17 = vpop.f32.mrf.mxu2  ;;  %v6914_v21 = vld [vmem:[#allocation34_spill] sm:$0xff] }
 0x3a3   : > { %v2706_v52 = vpop.f32.mrf.mxu3  ;;  %v2442_v11 = vpop.f32.mrf.mxu0 }
 0x3a4   : > { %v6096_v10 = vadd.f32 %v2706_v52, %v2617_v17  ;;  %v2443_v32 = vadd.f32 %v2442_v11, %v5881_v47  ;;  %v2531_v12 = vpop.f32.mrf.mxu1  ;;  %v6913_v47 = vld [vmem:[#allocation111_spill] sm:$0xff] }
 0x3a6   : > { %v2532_v48 = vadd.f32 %v2531_v12, %v2443_v32  ;;  %2757 = vmatmul.bf16.gmra.mxu0 %v6909_v57  ;;  %2846 = vmatmul.bf16.gmra.mxu1 %v6823_v26 }
 0x3a7   : > { %2935 = vmatmul.bf16.gmra.mxu2 %v6910_v54 }
 0x3a8   : > { %v3488_v44 = vpack.c.bf16 %v2532_v48, %v6911_v22  ;;  %3024 = vmatmul.bf16.gmra.mxu3 %v6912_v25  ;;  %v6916_v25 = vld [vmem:[#allocation37_spill] sm:$0xff] }
 0x3aa   : > { %3552 = vst [vmem:[%s5920_s20 + $0x1a0] sm:$0xff] %v3488_v44  ;;  %v2620_v3 = vpop.f32.mrf.mxu2 }
 0x3ab   : > { %v2709_v8 = vpop.f32.mrf.mxu3  ;;  %v2444_v40 = vpop.f32.mrf.mxu0 }
 0x3ac   : > { %v6105_v5 = vadd.f32 %v2709_v8, %v2620_v3  ;;  %v2445_v37 = vadd.f32 %v2444_v40, %v6913_v47  ;;  %v2533_v41 = vpop.f32.mrf.mxu1  ;;  %v6917_v3 = vld [vmem:[#allocation38_spill] sm:$0xff]  ;;  %v6919_v40 = vld [vmem:[#allocation87_spill] sm:$0xff] }
 0x3ad   : > { %v6918_v8 = vld [vmem:[#allocation86_spill] sm:$0xff] }
 0x3ae   : > { %v2534_v58 = vadd.f32 %v2533_v41, %v2445_v37  ;;  %v6920_v37 = vld [vmem:[#allocation35_spill] sm:$0xff]  ;;  %v4829_v41 = vld [vmem:[#allocation5 + $0x36c] sm:$0xf] }
 0x3b0   : > { %v3490_v17 = vpack.c.bf16 %v2534_v58, %v6914_v21  ;;  %v4438_v58 = vld [vmem:[#allocation5 + $0x378] sm:$0xf0]  ;;  %v4765_v21 = vld [vmem:[#allocation5 + $0x16c] sm:$0xf] }
 0x3b2   : > { %3554 = vst [vmem:[%s5920_s20 + $0x1b0] sm:$0xff] %v3490_v17  ;;  %v2622_v52 = vpop.f32.mrf.mxu2  ;;  %v4441_v17 = vor.u32 %v4829_v41, %v4438_v58 }
 0x3b3   : > { %v2711_v11 = vpop.f32.mrf.mxu3  ;;  %v2447_v32 = vpop.f32.mrf.mxu0 }
 0x3b4   : > { %v6110_v12 = vadd.f32 %v2711_v11, %v2622_v52  ;;  %v2448_v48 = vadd.f32 %v2447_v32, %v5895_v49  ;;  %v2536_v22 = vpop.f32.mrf.mxu1  ;;  %v4182_v52 = vld [vmem:[#allocation5 + $0x178] sm:$0xf0]  ;;  %v4861_v11 = vld [vmem:[#allocation5 + $0x46c] sm:$0xf]  ;;  %3262 = vmatpush.bf16.msra.mxu2 %v4441_v17 }
 0x3b5   : > { %v4185_v32 = vor.u32 %v4765_v21, %v4182_v52 }
 0x3b6   : > { %6915 = vst [vmem:[#allocation61_spill] sm:$0xff] %v6110_v12  ;;  %v2537_v44 = vadd.f32 %v2536_v22, %v2448_v48  ;;  %2762 = vmatmul.bf16.gmra.mxu0 %v6916_v25  ;;  %2851 = vmatmul.bf16.gmra.mxu1 %v6917_v3  ;;  %v4566_v12 = vld [vmem:[#allocation5 + $0x478] sm:$0xf0] }
 0x3b7   : > { %2940 = vmatmul.bf16.gmra.mxu2 %v6918_v8  ;;  %v4569_v48 = vor.u32 %v4861_v11, %v4566_v12  ;;  %v4797_v8 = vld [vmem:[#allocation5 + $0x26c] sm:$0xf]  ;;  %v4310_v25 = vld [vmem:[#allocation5 + $0x278] sm:$0xf0]  ;;  %3084 = vmatpush.bf16.msra.mxu0 %v4185_v32 }
 0x3b8   : > { %v3492_v47 = vpack.c.bf16 %v2537_v44, %v6919_v40  ;;  %3029 = vmatmul.bf16.gmra.mxu3 %v6920_v37  ;;  %v4313_v41 = vor.u32 %v4797_v8, %v4310_v25 }
 0x3b9   : > { %3351 = vmatpush.bf16.msra.mxu3 %v4569_v48 }
 0x3ba   : > { %3556 = vst [vmem:[%s5920_s20 + $0x1c0] sm:$0xff] %v3492_v47  ;;  %v2625_v49 = vpop.f32.mrf.mxu2  ;;  %3173 = vmatpush.bf16.msra.mxu1 %v4313_v41 }
 0x3bb   : > { %v2714_v22 = vpop.f32.mrf.mxu3  ;;  %v2449_v3 = vpop.f32.mrf.mxu0 }
 0x3bc   : > { %v6119_v44 = vadd.f32 %v2714_v22, %v2625_v49  ;;  %v2450_v40 = vadd.f32 %v2449_v3, %v5900_v46  ;;  %v2538_v37 = vpop.f32.mrf.mxu1  ;;  %v6921_v3 = vld [vmem:[#allocation40_spill] sm:$0xff] }
 0x3be   : > { %v2539_v58 = vadd.f32 %v2538_v37, %v2450_v40 }
 0x3c0   : > { %v3494_v47 = vpack.c.bf16 %v2539_v58, %v5893_v34 }
 0x3c2   : > { %3558 = vst [vmem:[%s5920_s20 + $0x1d0] sm:$0xff] %v3494_v47  ;;  %v2627_v12 = vpop.f32.mrf.mxu2 }
 0x3c3   : > { %v2716_v21 = vpop.f32.mrf.mxu3  ;;  %v2452_v52 = vpop.f32.mrf.mxu0 }
 0x3c4   : > { %v6124_v17 = vadd.f32 %v2716_v21, %v2627_v12  ;;  %v2453_v11 = vadd.f32 %v2452_v52, %v5909_v19  ;;  %v2541_v49 = vpop.f32.mrf.mxu1  ;;  %v6922_v52 = vld [vmem:[#allocation44_spill] sm:$0xff] }
 0x3c6   : > { %v2542_v46 = vadd.f32 %v2541_v49, %v2453_v11  ;;  %2767 = vmatmul.bf16.gmra.mxu0 %v6921_v3  ;;  %2856 = vmatmul.bf16.gmra.mxu1 %v6832_v42  ;;  %v6923_v11 = vld [vmem:[#allocation45_spill] sm:$0xff]  ;;  %v6924_v49 = vld [vmem:[#allocation88_spill] sm:$0xff] }
 0x3c7   : > { %2945 = vmatmul.bf16.gmra.mxu2 %v5645_v6 }
 0x3c8   : > { %v3496_v25 = vpack.c.bf16 %v2542_v46, %v5898_v38  ;;  %3034 = vmatmul.bf16.gmra.mxu3 %v5357_v20  ;;  %v4825_v46 = vld [vmem:[#allocation5 + $0x34c] sm:$0xf] }
 0x3ca   : > { %3560 = vst [vmem:[%s5920_s20 + $0x1e0] sm:$0xff] %v3496_v25  ;;  %v2630_v34 = vpop.f32.mrf.mxu2  ;;  %v4761_v25 = vld [vmem:[#allocation5 + $0x14c] sm:$0xf] }
 0x3cb   : > { %v2719_v8 = vpop.f32.mrf.mxu3  ;;  %v2454_v32 = vpop.f32.mrf.mxu0 }
 0x3cc   : > { %v6133_v48 = vadd.f32 %v2719_v8, %v2630_v34  ;;  %v2455_v19 = vadd.f32 %v2454_v32, %v5913_v60  ;;  %v2543_v22 = vpop.f32.mrf.mxu1  ;;  %v6925_v60 = vld [vmem:[#allocation42_spill] sm:$0xff]  ;;  %v4857_v32 = vld [vmem:[#allocation5 + $0x44c] sm:$0xf] }
 0x3cd   : > { %v4166_v8 = vld [vmem:[#allocation5 + $0x158] sm:$0xf0] }
 0x3ce   : > { %v2544_v40 = vadd.f32 %v2543_v22, %v2455_v19  ;;  %v4550_v19 = vld [vmem:[#allocation5 + $0x458] sm:$0xf0] }
 0x3d0   : > { %v3498_v37 = vpack.c.bf16 %v2544_v40, %v5907_v50  ;;  %v4422_v50 = vld [vmem:[#allocation5 + $0x358] sm:$0xf0]  ;;  %v4169_v40 = vor.u32 %v4761_v25, %v4166_v8 }
 0x3d1   : > { %v4425_v34 = vor.u32 %v4825_v46, %v4422_v50 }
 0x3d2   : > { %3562 = vst [vmem:[%s5920_s20 + $0x1f0] sm:$0xff] %v3498_v37  ;;  %v2632_v41 = vpop.f32.mrf.mxu2  ;;  %3085 = vmatpush.bf16.msra.mxu0 %v4169_v40 }
 0x3d3   : > { %v2721_v58 = vpop.f32.mrf.mxu3  ;;  %v2733_v47 = vpop.f32.mrf.mxu0  ;;  %3263 = vmatpush.bf16.msra.mxu2 %v4425_v34 }
 0x3d4   : > { %v6138_v12 = vadd.f32 %v2721_v58, %v2632_v41  ;;  %v2734_v20 = vadd.f32 %v2733_v47, %v5923_v36  ;;  %v2822_v38 = vpop.f32.mrf.mxu1  ;;  %v4553_v36 = vor.u32 %v4857_v32, %v4550_v19  ;;  %v4793_v47 = vld [vmem:[#allocation5 + $0x24c] sm:$0xf]  ;;  %v6926_v19 = vld [vmem:[#allocation47_spill] sm:$0xff] }
 0x3d6   : > { %v2823_v21 = vadd.f32 %v2822_v38, %v2734_v20  ;;  %2772 = vmatmul.bf16.gmra.mxu0 %v6922_v52  ;;  %2861 = vmatmul.bf16.gmra.mxu1 %v6923_v11  ;;  %v4294_v20 = vld [vmem:[#allocation5 + $0x258] sm:$0xf0] }
 0x3d7   : > { %2950 = vmatmul.bf16.gmra.mxu2 %v6924_v49  ;;  %3352 = vmatpush.bf16.msra.mxu3 %v4553_v36  ;;  %v4297_v46 = vor.u32 %v4793_v47, %v4294_v20 }
 0x3d8   : > { %3039 = vmatmul.bf16.gmra.mxu3 %v6925_v60 }
 0x3d9   : > { %3174 = vmatpush.bf16.msra.mxu1 %v4297_v46 }
 0x3da   : > { %v2911_v22 = vpop.f32.mrf.mxu2 }
 0x3db   : > { %v6145_v37 = vadd.f32 %v2911_v22, %v2823_v21  ;;  %v6147_v41 = vpop.f32.mrf.mxu3  ;;  %v2735_v58 = vpop.f32.mrf.mxu0 }
 0x3dc   : > { %v2736_v38 = vadd.f32 %v2735_v58, %v5928_v13  ;;  %v2824_v60 = vpop.f32.mrf.mxu1 }
 0x3de   : > { %v2825_v50 = vadd.f32 %v2824_v60, %v2736_v38 }
 0x3e2   : > { %v2913_v49 = vpop.f32.mrf.mxu2 }
 0x3e3   : > { %v6150_v11 = vadd.f32 %v2913_v49, %v2825_v50  ;;  %v6152_v25 = vpop.f32.mrf.mxu3  ;;  %v2738_v21 = vpop.f32.mrf.mxu0 }
 0x3e4   : > { %v2739_v8 = vadd.f32 %v2738_v21, %v5937_v2  ;;  %v2827_v32 = vpop.f32.mrf.mxu1  ;;  %v6928_v21 = vld [vmem:[#allocation51_spill] sm:$0xff] }
 0x3e6   : > { %v2828_v34 = vadd.f32 %v2827_v32, %v2739_v8  ;;  %2777 = vmatmul.bf16.gmra.mxu0 %v6926_v19  ;;  %2866 = vmatmul.bf16.gmra.mxu1 %v6836_v28  ;;  %v4406_v8 = vld [vmem:[#allocation5 + $0x338] sm:$0xf0]  ;;  %v4757_v32 = vld [vmem:[#allocation5 + $0x12c] sm:$0xf] }
 0x3e7   : > { %2955 = vmatmul.bf16.gmra.mxu2 %v5675_v45 }
 0x3e8   : > { %3044 = vmatmul.bf16.gmra.mxu3 %v5399_v59 }
 0x3ea   : > { %v2916_v13 = vpop.f32.mrf.mxu2 }
 0x3eb   : > { %v6159_v22 = vadd.f32 %v2916_v13, %v2828_v34  ;;  %v6161_v49 = vpop.f32.mrf.mxu3  ;;  %v2740_v40 = vpop.f32.mrf.mxu0  ;;  %v4150_v13 = vld [vmem:[#allocation5 + $0x138] sm:$0xf0] }
 0x3ec   : > { %v2741_v36 = vadd.f32 %v2740_v40, %v5942_v7  ;;  %v2829_v58 = vpop.f32.mrf.mxu1  ;;  %v4821_v7 = vld [vmem:[#allocation5 + $0x32c] sm:$0xf] }
 0x3ed   : > { %v4409_v34 = vor.u32 %v4821_v7, %v4406_v8  ;;  %v4853_v40 = vld [vmem:[#allocation5 + $0x42c] sm:$0xf] }
 0x3ee   : > { %v2830_v2 = vadd.f32 %v2829_v58, %v2741_v36  ;;  %v4534_v36 = vld [vmem:[#allocation5 + $0x438] sm:$0xf0] }
 0x3ef   : > { %3264 = vmatpush.bf16.msra.mxu2 %v4409_v34 }
 0x3f2   : > { %v2918_v47 = vpop.f32.mrf.mxu2 }
 0x3f3   : > { %v6164_v20 = vadd.f32 %v2918_v47, %v2830_v2  ;;  %v6166_v38 = vpop.f32.mrf.mxu3  ;;  %v2743_v60 = vpop.f32.mrf.mxu0  ;;  %v4153_v2 = vor.u32 %v4757_v32, %v4150_v13 }
 0x3f4   : > { %v2744_v46 = vadd.f32 %v2743_v60, %v5951_v14  ;;  %v2832_v50 = vpop.f32.mrf.mxu1  ;;  %v4537_v14 = vor.u32 %v4853_v40, %v4534_v36  ;;  %v6930_v36 = vld [vmem:[#allocation55_spill] sm:$0xff] }
 0x3f5   : > { %6927 = vst [vmem:[#allocation62_spill] sm:$0xff] %v6164_v20  ;;  %3086 = vmatpush.bf16.msra.mxu0 %v4153_v2  ;;  %v6933_v2 = vld [vmem:[#allocation41_spill] sm:$0xff] }
 0x3f6   : > { %v2833_v59 = vadd.f32 %v2832_v50, %v2744_v46  ;;  %2782 = vmatmul.bf16.gmra.mxu0 %v6928_v21  ;;  %2871 = vmatmul.bf16.gmra.mxu1 %v6837_v43  ;;  %v4789_v50 = vld [vmem:[#allocation5 + $0x22c] sm:$0xf] }
 0x3f7   : > { %2960 = vmatmul.bf16.gmra.mxu2 %v6838_v55  ;;  %v4278_v55 = vld [vmem:[#allocation5 + $0x238] sm:$0xf0]  ;;  %3353 = vmatpush.bf16.msra.mxu3 %v4537_v14 }
 0x3f8   : > { %3049 = vmatmul.bf16.gmra.mxu3 %v6839_v15  ;;  %v4281_v7 = vor.u32 %v4789_v50, %v4278_v55 }
 0x3fa   : > { %v2921_v58 = vpop.f32.mrf.mxu2  ;;  %3175 = vmatpush.bf16.msra.mxu1 %v4281_v7 }
 0x3fb   : > { %v6173_v47 = vadd.f32 %v2921_v58, %v2833_v59  ;;  %v6175_v60 = vpop.f32.mrf.mxu3  ;;  %v2745_v46 = vpop.f32.mrf.mxu0 }
 0x3fc   : > { %v2746_v15 = vadd.f32 %v2745_v46, %v5956_v9  ;;  %v2834_v43 = vpop.f32.mrf.mxu1  ;;  %v6931_v9 = vld [vmem:[#allocation53_spill] sm:$0xff] }
 0x3fe   : > { %v2835_v8 = vadd.f32 %v2834_v43, %v2746_v15 }
 0x402   : > { %v2923_v21 = vpop.f32.mrf.mxu2 }
 0x403   : > { %v6178_v20 = vadd.f32 %v2923_v21, %v2835_v8  ;;  %v6180_v32 = vpop.f32.mrf.mxu3  ;;  %v2748_v59 = vpop.f32.mrf.mxu0 }
 0x404   : > { %v2749_v13 = vadd.f32 %v2748_v59, %v5965_v33  ;;  %v2837_v40 = vpop.f32.mrf.mxu1  ;;  %v6936_v59 = vld [vmem:[#allocation89_spill] sm:$0xff] }
 0x405   : > { %6929 = vst [vmem:[#allocation67_spill] sm:$0xff] %v6178_v20 }
 0x406   : > { %v2838_v34 = vadd.f32 %v2837_v40, %v2749_v13  ;;  %2787 = vmatmul.bf16.gmra.mxu0 %v6930_v36  ;;  %2876 = vmatmul.bf16.gmra.mxu1 %v6842_v53 }
 0x407   : > { %2965 = vmatmul.bf16.gmra.mxu2 %v6843_v39  ;;  %v6937_v39 = vld [vmem:[#allocation59_spill] sm:$0xff] }
 0x408   : > { %3054 = vmatmul.bf16.gmra.mxu3 %v6931_v9 }
 0x40a   : > { %v2926_v43 = vpop.f32.mrf.mxu2 }
 0x40b   : > { %v6187_v55 = vadd.f32 %v2926_v43, %v2838_v34  ;;  %v6189_v21 = vpop.f32.mrf.mxu3  ;;  %v2750_v58 = vpop.f32.mrf.mxu0  ;;  %v6938_v34 = vld [vmem:[#allocation60_spill] sm:$0xff]  ;;  %v6939_v43 = vld [vmem:[#allocation94_spill] sm:$0xff] }
 0x40c   : > { %v2751_v14 = vadd.f32 %v2750_v58, %v6933_v2  ;;  %v2839_v46 = vpop.f32.mrf.mxu1  ;;  %v4817_v58 = vld [vmem:[#allocation5 + $0x30c] sm:$0xf]  ;;  %v4390_v2 = vld [vmem:[#allocation5 + $0x318] sm:$0xf0] }
 0x40d   : > { %6932 = vst [vmem:[#allocation97_spill] sm:$0xff] %v6187_v55  ;;  %v6940_v55 = vld [vmem:[#allocation57_spill] sm:$0xff] }
 0x40e   : > { %v2840_v33 = vadd.f32 %v2839_v46, %v2751_v14  ;;  %v4753_v14 = vld [vmem:[#allocation5 + $0x10c] sm:$0xf]  ;;  %v4393_v46 = vor.u32 %v4817_v58, %v4390_v2 }
 0x410   : > { %3265 = vmatpush.bf16.msra.mxu2 %v4393_v46 }
 0x412   : > { %v2928_v50 = vpop.f32.mrf.mxu2 }
 0x413   : > { %v6192_v15 = vadd.f32 %v2928_v50, %v2840_v33  ;;  %v6194_v7 = vpop.f32.mrf.mxu3  ;;  %v2753_v8 = vpop.f32.mrf.mxu0  ;;  %v4134_v33 = vld [vmem:[#allocation5 + $0x118] sm:$0xf0]  ;;  %v4849_v50 = vld [vmem:[#allocation5 + $0x40c] sm:$0xf] }
 0x414   : > { %6935 = vst [vmem:[#allocation100_spill] sm:$0xff] %v6194_v7  ;;  %v2754_v13 = vadd.f32 %v2753_v8, %v6936_v59  ;;  %v2842_v40 = vpop.f32.mrf.mxu1  ;;  %v4137_v53 = vor.u32 %v4753_v14, %v4134_v33  ;;  %v6941_v33 = vld [vmem:[#allocation65_spill] sm:$0xff] }
 0x415   : > { %6934 = vst [vmem:[#allocation68_spill] sm:$0xff] %v6192_v15  ;;  %v4518_v15 = vld [vmem:[#allocation5 + $0x418] sm:$0xf0] }
 0x416   : > { %v2843_v9 = vadd.f32 %v2842_v40, %v2754_v13  ;;  %2792 = vmatmul.bf16.gmra.mxu0 %v6937_v39  ;;  %2881 = vmatmul.bf16.gmra.mxu1 %v6938_v34  ;;  %v4521_v8 = vor.u32 %v4849_v50, %v4518_v15  ;;  %v4785_v34 = vld [vmem:[#allocation5 + $0x20c] sm:$0xf]  ;;  %v6942_v50 = vld [vmem:[#allocation66_spill] sm:$0xff] }
 0x417   : > { %2970 = vmatmul.bf16.gmra.mxu2 %v6939_v43  ;;  %v4262_v43 = vld [vmem:[#allocation5 + $0x218] sm:$0xf0]  ;;  %3087 = vmatpush.bf16.msra.mxu0 %v4137_v53  ;;  %v6944_v53 = vld [vmem:[#allocation63_spill] sm:$0xff] }
 0x418   : > { %3059 = vmatmul.bf16.gmra.mxu3 %v6940_v55  ;;  %v4265_v58 = vor.u32 %v4785_v34, %v4262_v43 }
 0x419   : > { %3354 = vmatpush.bf16.msra.mxu3 %v4521_v8  ;;  %v6946_v8 = vld [vmem:[#allocation48_spill] sm:$0xff] }
 0x41a   : > { %v2931_v7 = vpop.f32.mrf.mxu2  ;;  %3176 = vmatpush.bf16.msra.mxu1 %v4265_v58 }
 0x41b   : > { %v6201_v59 = vadd.f32 %v2931_v7, %v2843_v9  ;;  %v6203_v13 = vpop.f32.mrf.mxu3  ;;  %v2755_v40 = vpop.f32.mrf.mxu0 }
 0x41c   : > { %v2756_v55 = vadd.f32 %v2755_v40, %v5984_v61  ;;  %v2844_v39 = vpop.f32.mrf.mxu1  ;;  %v6943_v61 = vld [vmem:[#allocation96_spill] sm:$0xff] }
 0x41e   : > { %v2845_v2 = vadd.f32 %v2844_v39, %v2756_v55 }
 0x422   : > { %v2933_v36 = vpop.f32.mrf.mxu2 }
 0x423   : > { %v6206_v20 = vadd.f32 %v2933_v36, %v2845_v2  ;;  %v6208_v15 = vpop.f32.mrf.mxu3  ;;  %v2758_v7 = vpop.f32.mrf.mxu0 }
 0x424   : > { %v2759_v9 = vadd.f32 %v2758_v7, %v5993_v31  ;;  %v2847_v14 = vpop.f32.mrf.mxu1 }
 0x426   : > { %v2848_v46 = vadd.f32 %v2847_v14, %v2759_v9  ;;  %2797 = vmatmul.bf16.gmra.mxu0 %v6941_v33  ;;  %2886 = vmatmul.bf16.gmra.mxu1 %v6942_v50  ;;  %v6948_v14 = vld [vmem:[#allocation49_spill] sm:$0xff]  ;;  %v6949_v33 = vld [vmem:[#allocation71_spill] sm:$0xff] }
 0x427   : > { %2975 = vmatmul.bf16.gmra.mxu2 %v6943_v61 }
 0x428   : > { %3064 = vmatmul.bf16.gmra.mxu3 %v6944_v53 }
 0x42a   : > { %v2936_v39 = vpop.f32.mrf.mxu2 }
 0x42b   : > { %v6215_v34 = vadd.f32 %v2936_v39, %v2848_v46  ;;  %v6217_v36 = vpop.f32.mrf.mxu3  ;;  %v2760_v43 = vpop.f32.mrf.mxu0  ;;  %v6950_v46 = vld [vmem:[#allocation72_spill] sm:$0xff]  ;;  %v6951_v39 = vld [vmem:[#allocation98_spill] sm:$0xff] }
 0x42c   : > { %v2761_v40 = vadd.f32 %v2760_v43, %v6946_v8  ;;  %v2849_v55 = vpop.f32.mrf.mxu1 }
 0x42d   : > { %6945 = vst [vmem:[#allocation73_spill] sm:$0xff] %v6215_v34  ;;  %v6952_v34 = vld [vmem:[#allocation69_spill] sm:$0xff] }
 0x42e   : > { %v2850_v31 = vadd.f32 %v2849_v55, %v2761_v40 }
 0x432   : > { %v2938_v58 = vpop.f32.mrf.mxu2 }
 0x433   : > { %v6220_v2 = vadd.f32 %v2938_v58, %v2850_v31  ;;  %v6222_v7 = vpop.f32.mrf.mxu3  ;;  %v2763_v9 = vpop.f32.mrf.mxu0 }
 0x434   : > { %v2764_v61 = vadd.f32 %v2763_v9, %v6948_v14  ;;  %v2852_v50 = vpop.f32.mrf.mxu1 }
 0x435   : > { %6947 = vst [vmem:[#allocation99_spill] sm:$0xff] %v6220_v2  ;;  %v6956_v2 = vld [vmem:[#allocation76_spill] sm:$0xff] }
 0x436   : > { %v2853_v53 = vadd.f32 %v2852_v50, %v2764_v61  ;;  %2802 = vmatmul.bf16.gmra.mxu0 %v6949_v33  ;;  %2891 = vmatmul.bf16.gmra.mxu1 %v6950_v46 }
 0x437   : > { %2980 = vmatmul.bf16.gmra.mxu2 %v6951_v39 }
 0x438   : > { %3069 = vmatmul.bf16.gmra.mxu3 %v6952_v34 }
 0x43a   : > { %v2941_v43 = vpop.f32.mrf.mxu2 }
 0x43b   : > { %v6229_v8 = vadd.f32 %v2941_v43, %v2853_v53  ;;  %v6231_v40 = vpop.f32.mrf.mxu3  ;;  %v2765_v55 = vpop.f32.mrf.mxu0  ;;  %v6957_v53 = vld [vmem:[#allocation77_spill] sm:$0xff]  ;;  %v6958_v43 = vld [vmem:[#allocation102_spill] sm:$0xff] }
 0x43c   : > { %v2766_v31 = vadd.f32 %v2765_v55, %v6012_v29  ;;  %v2854_v58 = vpop.f32.mrf.mxu1 }
 0x43d   : > { %6953 = vst [vmem:[#allocation101_spill] sm:$0xff] %v6229_v8  ;;  %v6959_v8 = vld [vmem:[#allocation74_spill] sm:$0xff] }
 0x43e   : > { %v2855_v9 = vadd.f32 %v2854_v58, %v2766_v31 }
 0x442   : > { %v2943_v14 = vpop.f32.mrf.mxu2 }
 0x443   : > { %v6234_v50 = vadd.f32 %v2943_v14, %v2855_v9  ;;  %v6236_v61 = vpop.f32.mrf.mxu3  ;;  %v2768_v46 = vpop.f32.mrf.mxu0  ;;  %v6961_v9 = vld [vmem:[#allocation91_spill] sm:$0xff] }
 0x444   : > { %6955 = vst [vmem:[#allocation78_spill] sm:$0xff] %v6236_v61  ;;  %v2769_v39 = vadd.f32 %v2768_v46, %v6021_v1  ;;  %v2857_v33 = vpop.f32.mrf.mxu1  ;;  %v6963_v61 = vld [vmem:[#allocation12_spill] sm:$0xff] }
 0x445   : > { %6954 = vst [vmem:[#allocation103_spill] sm:$0xff] %v6234_v50 }
 0x446   : > { %v2858_v34 = vadd.f32 %v2857_v33, %v2769_v39  ;;  %2807 = vmatmul.bf16.gmra.mxu0 %v6956_v2  ;;  %2896 = vmatmul.bf16.gmra.mxu1 %v6957_v53 }
 0x447   : > { %2985 = vmatmul.bf16.gmra.mxu2 %v6958_v43 }
 0x448   : > { %3074 = vmatmul.bf16.gmra.mxu3 %v6959_v8 }
 0x44a   : > { %v2946_v29 = vpop.f32.mrf.mxu2 }
 0x44b   : > { %v6243_v55 = vadd.f32 %v2946_v29, %v2858_v34  ;;  %v6245_v31 = vpop.f32.mrf.mxu3  ;;  %v2770_v58 = vpop.f32.mrf.mxu0  ;;  %v6964_v34 = vld [vmem:[#allocation13_spill] sm:$0xff]  ;;  %v6965_v29 = vld [vmem:[#allocation14_spill] sm:$0xff] }
 0x44c   : > { %v2771_v14 = vadd.f32 %v2770_v58, %v6961_v9  ;;  %v2859_v50 = vpop.f32.mrf.mxu1 }
 0x44d   : > { %6960 = vst [vmem:[#allocation105_spill] sm:$0xff] %v6243_v55  ;;  %v6966_v55 = vld [vmem:[#allocation79_spill] sm:$0xff] }
 0x44e   : > { %v2860_v1 = vadd.f32 %v2859_v50, %v2771_v14 }
 0x452   : > { %v2948_v46 = vpop.f32.mrf.mxu2 }
 0x453   : > { %v6248_v33 = vadd.f32 %v2948_v46, %v2860_v1  ;;  %v6250_v39 = vpop.f32.mrf.mxu3  ;;  %v2773_v53 = vpop.f32.mrf.mxu0 }
 0x454   : > { %v2774_v43 = vadd.f32 %v2773_v53, %v6035_v4  ;;  %v2862_v2 = vpop.f32.mrf.mxu1 }
 0x455   : > { %6962 = vst [vmem:[#allocation80_spill] sm:$0xff] %v6248_v33  ;;  %v6967_v33 = vld [vmem:[#allocation16_spill] sm:$0xff] }
 0x456   : > { %v2863_v8 = vadd.f32 %v2862_v2, %v2774_v43  ;;  %3088 = vmatmul.bf16.vlgmr.msra.gmra.mxu0 %v6963_v61  ;;  %3177 = vmatmul.bf16.vlgmr.msra.gmra.mxu1 %v6964_v34 }
 0x457   : > { %3266 = vmatmul.bf16.vlgmr.msra.gmra.mxu2 %v6965_v29 }
 0x458   : > { %3355 = vmatmul.bf16.vlgmr.msra.gmra.mxu3 %v6966_v55 }
 0x45a   : > { %v2951_v58 = vpop.f32.mrf.mxu2 }
 0x45b   : > { %v6257_v50 = vadd.f32 %v2951_v58, %v2863_v8  ;;  %v6259_v9 = vpop.f32.mrf.mxu3  ;;  %v2775_v14 = vpop.f32.mrf.mxu0 }
 0x45c   : > { %v2776_v1 = vadd.f32 %v2775_v14, %v6040_v56  ;;  %v2864_v46 = vpop.f32.mrf.mxu1 }
 0x45e   : > { %v2865_v4 = vadd.f32 %v2864_v46, %v2776_v1  ;;  %v6969_v1 = vld [vmem:[#allocation93_spill] sm:$0xff] }
 0x462   : > { %v2953_v53 = vpop.f32.mrf.mxu2 }
 0x463   : > { %v6262_v2 = vadd.f32 %v2953_v53, %v2865_v4  ;;  %v6264_v61 = vpop.f32.mrf.mxu3  ;;  %v2778_v43 = vpop.f32.mrf.mxu0 }
 0x464   : > { %v2779_v34 = vadd.f32 %v2778_v43, %v6049_v24  ;;  %v2867_v29 = vpop.f32.mrf.mxu1 }
 0x466   : > { %v2868_v55 = vadd.f32 %v2867_v29, %v2779_v34  ;;  %3093 = vmatmul.bf16.gmra.mxu0 %v6967_v33  ;;  %3182 = vmatmul.bf16.gmra.mxu1 %v6887_v35  ;;  %v6971_v29 = vld [vmem:[#allocation20_spill] sm:$0xff] }
 0x467   : > { %3271 = vmatmul.bf16.gmra.mxu2 %v6803_v27 }
 0x468   : > { %3360 = vmatmul.bf16.gmra.mxu3 %v5573_v62 }
 0x46a   : > { %v2956_v56 = vpop.f32.mrf.mxu2 }
 0x46b   : > { %v6271_v8 = vadd.f32 %v2956_v56, %v2868_v55  ;;  %v6273_v58 = vpop.f32.mrf.mxu3  ;;  %v2780_v14 = vpop.f32.mrf.mxu0  ;;  %v6972_v55 = vld [vmem:[#allocation21_spill] sm:$0xff]  ;;  %v6973_v56 = vld [vmem:[#allocation22_spill] sm:$0xff] }
 0x46c   : > { %v2781_v46 = vadd.f32 %v2780_v14, %v6969_v1  ;;  %v2869_v4 = vpop.f32.mrf.mxu1 }
 0x46d   : > { %6968 = vst [vmem:[#allocation104_spill] sm:$0xff] %v6271_v8  ;;  %v6974_v8 = vld [vmem:[#allocation81_spill] sm:$0xff] }
 0x46e   : > { %v2870_v24 = vadd.f32 %v2869_v4, %v2781_v46 }
 0x472   : > { %v2958_v53 = vpop.f32.mrf.mxu2 }
 0x473   : > { %v6276_v43 = vadd.f32 %v2958_v53, %v2870_v24  ;;  %v6278_v33 = vpop.f32.mrf.mxu3  ;;  %v2783_v35 = vpop.f32.mrf.mxu0 }
 0x474   : > { %v2784_v27 = vadd.f32 %v2783_v35, %v6063_v0  ;;  %v2872_v34 = vpop.f32.mrf.mxu1 }
 0x475   : > { %6970 = vst [vmem:[#allocation11_spill] sm:$0xff] %v6276_v43  ;;  %v6975_v43 = vld [vmem:[#allocation24_spill] sm:$0xff] }
 0x476   : > { %v2873_v62 = vadd.f32 %v2872_v34, %v2784_v27  ;;  %3098 = vmatmul.bf16.gmra.mxu0 %v6971_v29  ;;  %3187 = vmatmul.bf16.gmra.mxu1 %v6972_v55 }
 0x477   : > { %3276 = vmatmul.bf16.gmra.mxu2 %v6973_v56 }
 0x478   : > { %3365 = vmatmul.bf16.gmra.mxu3 %v6974_v8 }
 0x47a   : > { %v2961_v14 = vpop.f32.mrf.mxu2 }
 0x47b   : > { %v6285_v1 = vadd.f32 %v2961_v14, %v2873_v62  ;;  %v6287_v46 = vpop.f32.mrf.mxu3  ;;  %v2785_v4 = vpop.f32.mrf.mxu0 }
 0x47c   : > { %v2786_v24 = vadd.f32 %v2785_v4, %v6068_v30  ;;  %v2874_v53 = vpop.f32.mrf.mxu1 }
 0x47e   : > { %v2875_v0 = vadd.f32 %v2874_v53, %v2786_v24  ;;  %v6977_v24 = vld [vmem:[#allocation95_spill] sm:$0xff] }
 0x482   : > { %v2963_v35 = vpop.f32.mrf.mxu2 }
 0x483   : > { %v6290_v27 = vadd.f32 %v2963_v35, %v2875_v0  ;;  %v6292_v34 = vpop.f32.mrf.mxu3  ;;  %v2788_v29 = vpop.f32.mrf.mxu0 }
 0x484   : > { %v2789_v55 = vadd.f32 %v2788_v29, %v6077_v63  ;;  %v2877_v56 = vpop.f32.mrf.mxu1 }
 0x486   : > { %v2878_v8 = vadd.f32 %v2877_v56, %v2789_v55  ;;  %3103 = vmatmul.bf16.gmra.mxu0 %v6975_v43  ;;  %3192 = vmatmul.bf16.gmra.mxu1 %v6898_v16  ;;  %v6979_v56 = vld [vmem:[#allocation28_spill] sm:$0xff] }
 0x487   : > { %3281 = vmatmul.bf16.gmra.mxu2 %v6813_v51 }
 0x488   : > { %3370 = vmatmul.bf16.gmra.mxu3 %v5597_v23 }
 0x48a   : > { %v2966_v30 = vpop.f32.mrf.mxu2 }
 0x48b   : > { %v6299_v62 = vadd.f32 %v2966_v30, %v2878_v8  ;;  %v6301_v14 = vpop.f32.mrf.mxu3  ;;  %v2790_v4 = vpop.f32.mrf.mxu0  ;;  %v6980_v8 = vld [vmem:[#allocation29_spill] sm:$0xff]  ;;  %v6981_v30 = vld [vmem:[#allocation30_spill] sm:$0xff] }
 0x48c   : > { %v2791_v53 = vadd.f32 %v2790_v4, %v6977_v24  ;;  %v2879_v0 = vpop.f32.mrf.mxu1 }
 0x48d   : > { %6976 = vst [vmem:[#allocation17_spill] sm:$0xff] %v6299_v62  ;;  %v6982_v62 = vld [vmem:[#allocation83_spill] sm:$0xff] }
 0x48e   : > { %v2880_v63 = vadd.f32 %v2879_v0, %v2791_v53 }
 0x492   : > { %v2968_v35 = vpop.f32.mrf.mxu2 }
 0x493   : > { %v6304_v29 = vadd.f32 %v2968_v35, %v2880_v63  ;;  %v6306_v43 = vpop.f32.mrf.mxu3  ;;  %v2793_v16 = vpop.f32.mrf.mxu0 }
 0x494   : > { %v2794_v51 = vadd.f32 %v2793_v16, %v6091_v18  ;;  %v2882_v55 = vpop.f32.mrf.mxu1 }
 0x495   : > { %6978 = vst [vmem:[#allocation106_spill] sm:$0xff] %v6304_v29  ;;  %v6983_v29 = vld [vmem:[#allocation32_spill] sm:$0xff] }
 0x496   : > { %v2883_v23 = vadd.f32 %v2882_v55, %v2794_v51  ;;  %3108 = vmatmul.bf16.gmra.mxu0 %v6979_v56  ;;  %3197 = vmatmul.bf16.gmra.mxu1 %v6980_v8 }
 0x497   : > { %3286 = vmatmul.bf16.gmra.mxu2 %v6981_v30 }
 0x498   : > { %3375 = vmatmul.bf16.gmra.mxu3 %v6982_v62 }
 0x49a   : > { %v2971_v4 = vpop.f32.mrf.mxu2 }
 0x49b   : > { %v6313_v24 = vadd.f32 %v2971_v4, %v2883_v23  ;;  %v6315_v53 = vpop.f32.mrf.mxu3  ;;  %v2795_v0 = vpop.f32.mrf.mxu0 }
 0x49c   : > { %v2796_v63 = vadd.f32 %v2795_v0, %v6096_v10  ;;  %v2884_v35 = vpop.f32.mrf.mxu1 }
 0x49e   : > { %v2885_v18 = vadd.f32 %v2884_v35, %v2796_v63  ;;  %v6985_v63 = vld [vmem:[#allocation61_spill] sm:$0xff] }
 0x4a2   : > { %v2973_v16 = vpop.f32.mrf.mxu2 }
 0x4a3   : > { %v6318_v51 = vadd.f32 %v2973_v16, %v2885_v18  ;;  %v6320_v55 = vpop.f32.mrf.mxu3  ;;  %v2798_v56 = vpop.f32.mrf.mxu0 }
 0x4a4   : > { %v2799_v8 = vadd.f32 %v2798_v56, %v6105_v5  ;;  %v2887_v30 = vpop.f32.mrf.mxu1 }
 0x4a6   : > { %v2888_v62 = vadd.f32 %v2887_v30, %v2799_v8  ;;  %3113 = vmatmul.bf16.gmra.mxu0 %v6983_v29  ;;  %3202 = vmatmul.bf16.gmra.mxu1 %v6909_v57  ;;  %v6987_v30 = vld [vmem:[#allocation36_spill] sm:$0xff] }
 0x4a7   : > { %3291 = vmatmul.bf16.gmra.mxu2 %v6823_v26 }
 0x4a8   : > { %3380 = vmatmul.bf16.gmra.mxu3 %v6910_v54 }
 0x4aa   : > { %v2976_v10 = vpop.f32.mrf.mxu2 }
 0x4ab   : > { %v6327_v23 = vadd.f32 %v2976_v10, %v2888_v62  ;;  %v6329_v4 = vpop.f32.mrf.mxu3  ;;  %v2800_v0 = vpop.f32.mrf.mxu0  ;;  %v6988_v62 = vld [vmem:[#allocation37_spill] sm:$0xff]  ;;  %v6989_v10 = vld [vmem:[#allocation38_spill] sm:$0xff] }
 0x4ac   : > { %v2801_v35 = vadd.f32 %v2800_v0, %v6985_v63  ;;  %v2889_v18 = vpop.f32.mrf.mxu1 }
 0x4ad   : > { %6984 = vst [vmem:[#allocation15_spill] sm:$0xff] %v6327_v23  ;;  %v6990_v23 = vld [vmem:[#allocation86_spill] sm:$0xff] }
 0x4ae   : > { %v2890_v5 = vadd.f32 %v2889_v18, %v2801_v35 }
 0x4b2   : > { %v2978_v16 = vpop.f32.mrf.mxu2 }
 0x4b3   : > { %v6332_v56 = vadd.f32 %v2978_v16, %v2890_v5  ;;  %v6334_v29 = vpop.f32.mrf.mxu3  ;;  %v2803_v57 = vpop.f32.mrf.mxu0 }
 0x4b4   : > { %v2804_v26 = vadd.f32 %v2803_v57, %v6119_v44  ;;  %v2892_v8 = vpop.f32.mrf.mxu1 }
 0x4b5   : > { %6986 = vst [vmem:[#allocation107_spill] sm:$0xff] %v6332_v56  ;;  %v6991_v56 = vld [vmem:[#allocation39_spill] sm:$0xff] }
 0x4b6   : > { %v2893_v54 = vadd.f32 %v2892_v8, %v2804_v26  ;;  %3118 = vmatmul.bf16.gmra.mxu0 %v6987_v30  ;;  %3207 = vmatmul.bf16.gmra.mxu1 %v6988_v62 }
 0x4b7   : > { %3296 = vmatmul.bf16.gmra.mxu2 %v6989_v10 }
 0x4b8   : > { %3385 = vmatmul.bf16.gmra.mxu3 %v6990_v23 }
 0x4ba   : > { %v2981_v0 = vpop.f32.mrf.mxu2 }
 0x4bb   : > { %v6341_v63 = vadd.f32 %v2981_v0, %v2893_v54  ;;  %v6343_v35 = vpop.f32.mrf.mxu3  ;;  %v2805_v18 = vpop.f32.mrf.mxu0 }
 0x4bc   : > { %v2806_v5 = vadd.f32 %v2805_v18, %v6124_v17  ;;  %v2894_v16 = vpop.f32.mrf.mxu1 }
 0x4be   : > { %v2895_v44 = vadd.f32 %v2894_v16, %v2806_v5 }
 0x4c2   : > { %v2983_v57 = vpop.f32.mrf.mxu2 }
 0x4c3   : > { %v6346_v26 = vadd.f32 %v2983_v57, %v2895_v44  ;;  %v6348_v8 = vpop.f32.mrf.mxu3  ;;  %v2808_v30 = vpop.f32.mrf.mxu0 }
 0x4c4   : > { %v2809_v62 = vadd.f32 %v2808_v30, %v6133_v48  ;;  %v2897_v10 = vpop.f32.mrf.mxu1  ;;  %v6994_v30 = vld [vmem:[#allocation43_spill] sm:$0xff] }
 0x4c6   : > { %v2898_v23 = vadd.f32 %v2897_v10, %v2809_v62  ;;  %3123 = vmatmul.bf16.gmra.mxu0 %v6991_v56  ;;  %3212 = vmatmul.bf16.gmra.mxu1 %v6921_v3  ;;  %v6995_v62 = vld [vmem:[#allocation45_spill] sm:$0xff]  ;;  %v6996_v10 = vld [vmem:[#allocation88_spill] sm:$0xff] }
 0x4c7   : > { %3301 = vmatmul.bf16.gmra.mxu2 %v6832_v42 }
 0x4c8   : > { %3390 = vmatmul.bf16.gmra.mxu3 %v5645_v6 }
 0x4ca   : > { %v2986_v17 = vpop.f32.mrf.mxu2 }
 0x4cb   : > { %v6355_v54 = vadd.f32 %v2986_v17, %v2898_v23  ;;  %v6357_v0 = vpop.f32.mrf.mxu3  ;;  %v2810_v18 = vpop.f32.mrf.mxu0 }
 0x4cc   : > { %v2811_v5 = vadd.f32 %v2810_v18, %v6138_v12  ;;  %v2899_v16 = vpop.f32.mrf.mxu1 }
 0x4cd   : > { %6992 = vst [vmem:[#allocation18_spill] sm:$0xff] %v6355_v54 }
 0x4ce   : > { %v2900_v48 = vadd.f32 %v2899_v16, %v2811_v5 }
 0x4d2   : > { %v2988_v44 = vpop.f32.mrf.mxu2 }
 0x4d3   : > { %v6360_v57 = vadd.f32 %v2988_v44, %v2900_v48  ;;  %v6362_v56 = vpop.f32.mrf.mxu3  ;;  %v3089_v3 = vpop.f32.mrf.mxu0 }
 0x4d4   : > { %v3178_v42 = vpop.f32.mrf.mxu1  ;;  %v3090_v6 = vadd.f32 %v3089_v3, %v6147_v41 }
 0x4d5   : > { %6993 = vst [vmem:[#allocation82_spill] sm:$0xff] %v6360_v57 }
 0x4d6   : > { %3128 = vmatmul.bf16.gmra.mxu0 %v6994_v30  ;;  %3217 = vmatmul.bf16.gmra.mxu1 %v6922_v52  ;;  %v3179_v12 = vadd.f32 %v3178_v42, %v3090_v6  ;;  %v6997_v6 = vld [vmem:[#allocation46_spill] sm:$0xff] }
 0x4d7   : > { %3306 = vmatmul.bf16.gmra.mxu2 %v6995_v62 }
 0x4d8   : > { %3395 = vmatmul.bf16.gmra.mxu3 %v6996_v10 }
 0x4da   : > { %v3267_v23 = vpop.f32.mrf.mxu2 }
 0x4db   : > { %v3268_v17 = vadd.f32 %v3267_v23, %v3179_v12  ;;  %v3356_v18 = vpop.f32.mrf.mxu3  ;;  %v3091_v5 = vpop.f32.mrf.mxu0 }
 0x4dc   : > { %v3180_v16 = vpop.f32.mrf.mxu1  ;;  %v3092_v44 = vadd.f32 %v3091_v5, %v6152_v25 }
 0x4dd   : > { %v3357_v48 = vadd.f32 %v3356_v18, %v3268_v17 }
 0x4de   : > { %v3181_v3 = vadd.f32 %v3180_v16, %v3092_v44 }
 0x4df   : > { %v3437_v41 = vpack.c.bf16 %v3357_v48, %v6145_v37 }
 0x4e1   : > { %3501 = vst [vmem:[%s5920_s20 + $0x8] sm:$0xff] %v3437_v41 }
 0x4e2   : > { %v3269_v30 = vpop.f32.mrf.mxu2 }
 0x4e3   : > { %v3270_v52 = vadd.f32 %v3269_v30, %v3181_v3  ;;  %v3358_v57 = vpop.f32.mrf.mxu3  ;;  %v3094_v62 = vpop.f32.mrf.mxu0  ;;  %v6998_v3 = vld [vmem:[#allocation50_spill] sm:$0xff] }
 0x4e4   : > { %v3183_v54 = vpop.f32.mrf.mxu1  ;;  %v3095_v42 = vadd.f32 %v3094_v62, %v6161_v49  ;;  %v6999_v30 = vld [vmem:[#allocation62_spill] sm:$0xff]  ;;  %v7000_v62 = vld [vmem:[#allocation51_spill] sm:$0xff] }
 0x4e5   : > { %v3359_v10 = vadd.f32 %v3358_v57, %v3270_v52 }
 0x4e6   : > { %3133 = vmatmul.bf16.gmra.mxu0 %v6997_v6  ;;  %3222 = vmatmul.bf16.gmra.mxu1 %v6926_v19  ;;  %v3184_v37 = vadd.f32 %v3183_v54, %v3095_v42 }
 0x4e7   : > { %v3439_v12 = vpack.c.bf16 %v3359_v10, %v6150_v11  ;;  %3311 = vmatmul.bf16.gmra.mxu2 %v6836_v28 }
 0x4e8   : > { %3400 = vmatmul.bf16.gmra.mxu3 %v5675_v45 }
 0x4e9   : > { %3503 = vst [vmem:[%s5920_s20 + $0x18] sm:$0xff] %v3439_v12 }
 0x4ea   : > { %v3272_v25 = vpop.f32.mrf.mxu2 }
 0x4eb   : > { %v3273_v23 = vadd.f32 %v3272_v25, %v3184_v37  ;;  %v3361_v17 = vpop.f32.mrf.mxu3  ;;  %v3096_v18 = vpop.f32.mrf.mxu0 }
 0x4ec   : > { %v3185_v57 = vpop.f32.mrf.mxu1  ;;  %v3097_v49 = vadd.f32 %v3096_v18, %v6166_v38  ;;  %v7001_v38 = vld [vmem:[#allocation52_spill] sm:$0xff] }
 0x4ed   : > { %v3362_v5 = vadd.f32 %v3361_v17, %v3273_v23 }
 0x4ee   : > { %v3186_v11 = vadd.f32 %v3185_v57, %v3097_v49 }
 0x4ef   : > { %v3441_v16 = vpack.c.bf16 %v3362_v5, %v6159_v22  ;;  %v7002_v22 = vld [vmem:[#allocation90_spill] sm:$0xff] }
 0x4f1   : > { %3505 = vst [vmem:[%s5920_s20 + $0x28] sm:$0xff] %v3441_v16 }
 0x4f2   : > { %v3274_v19 = vpop.f32.mrf.mxu2 }
 0x4f3   : > { %v3275_v48 = vadd.f32 %v3274_v19, %v3186_v11  ;;  %v3363_v28 = vpop.f32.mrf.mxu3  ;;  %v3099_v44 = vpop.f32.mrf.mxu0 }
 0x4f4   : > { %v3188_v45 = vpop.f32.mrf.mxu1  ;;  %v3100_v54 = vadd.f32 %v3099_v44, %v6175_v60  ;;  %v7004_v44 = vld [vmem:[#allocation67_spill] sm:$0xff] }
 0x4f5   : > { %v3364_v41 = vadd.f32 %v3363_v28, %v3275_v48  ;;  %v7003_v28 = vld [vmem:[#allocation54_spill] sm:$0xff] }
 0x4f6   : > { %3138 = vmatmul.bf16.gmra.mxu0 %v6998_v3  ;;  %3227 = vmatmul.bf16.gmra.mxu1 %v7000_v62  ;;  %v3189_v10 = vadd.f32 %v3188_v45, %v3100_v54 }
 0x4f7   : > { %v3443_v52 = vpack.c.bf16 %v3364_v41, %v6999_v30  ;;  %3316 = vmatmul.bf16.gmra.mxu2 %v7001_v38  ;;  %v7005_v41 = vld [vmem:[#allocation55_spill] sm:$0xff] }
 0x4f8   : > { %3405 = vmatmul.bf16.gmra.mxu3 %v7002_v22 }
 0x4f9   : > { %3507 = vst [vmem:[%s5920_s20 + $0x38] sm:$0xff] %v3443_v52 }
 0x4fa   : > { %v3277_v42 = vpop.f32.mrf.mxu2 }
 0x4fb   : > { %v3278_v6 = vadd.f32 %v3277_v42, %v3189_v10  ;;  %v3366_v12 = vpop.f32.mrf.mxu3  ;;  %v3101_v37 = vpop.f32.mrf.mxu0  ;;  %v7009_v42 = vld [vmem:[#allocation97_spill] sm:$0xff] }
 0x4fc   : > { %v3190_v25 = vpop.f32.mrf.mxu1  ;;  %v3102_v60 = vadd.f32 %v3101_v37, %v6180_v32  ;;  %v7006_v32 = vld [vmem:[#allocation56_spill] sm:$0xff] }
 0x4fd   : > { %v3367_v23 = vadd.f32 %v3366_v12, %v3278_v6 }
 0x4fe   : > { %v3191_v18 = vadd.f32 %v3190_v25, %v3102_v60 }
 0x4ff   : > { %v3445_v17 = vpack.c.bf16 %v3367_v23, %v6173_v47  ;;  %v7007_v47 = vld [vmem:[#allocation92_spill] sm:$0xff] }
 0x501   : > { %3509 = vst [vmem:[%s5920_s20 + $0x48] sm:$0xff] %v3445_v17 }
 0x502   : > { %v3279_v57 = vpop.f32.mrf.mxu2 }
 0x503   : > { %v3280_v5 = vadd.f32 %v3279_v57, %v3191_v18  ;;  %v3368_v49 = vpop.f32.mrf.mxu3  ;;  %v3104_v16 = vpop.f32.mrf.mxu0 }
 0x504   : > { %v3193_v11 = vpop.f32.mrf.mxu1  ;;  %v3105_v48 = vadd.f32 %v3104_v16, %v6189_v21  ;;  %v7008_v21 = vld [vmem:[#allocation100_spill] sm:$0xff] }
 0x505   : > { %v3369_v19 = vadd.f32 %v3368_v49, %v3280_v5  ;;  %v7010_v5 = vld [vmem:[#allocation58_spill] sm:$0xff]  ;;  %v7011_v49 = vld [vmem:[#allocation68_spill] sm:$0xff] }
 0x506   : > { %3143 = vmatmul.bf16.gmra.mxu0 %v7003_v28  ;;  %3232 = vmatmul.bf16.gmra.mxu1 %v7005_v41  ;;  %v3194_v54 = vadd.f32 %v3193_v11, %v3105_v48  ;;  %v7012_v11 = vld [vmem:[#allocation59_spill] sm:$0xff]  ;;  %v7014_v48 = vld [vmem:[#allocation94_spill] sm:$0xff] }
 0x507   : > { %v3447_v45 = vpack.c.bf16 %v3369_v19, %v7004_v44  ;;  %3321 = vmatmul.bf16.gmra.mxu2 %v7006_v32  ;;  %v7013_v19 = vld [vmem:[#allocation60_spill] sm:$0xff] }
 0x508   : > { %3410 = vmatmul.bf16.gmra.mxu3 %v7007_v47 }
 0x509   : > { %3511 = vst [vmem:[%s5920_s20 + $0x58] sm:$0xff] %v3447_v45 }
 0x50a   : > { %v3282_v3 = vpop.f32.mrf.mxu2 }
 0x50b   : > { %v3283_v30 = vadd.f32 %v3282_v3, %v3194_v54  ;;  %v3371_v52 = vpop.f32.mrf.mxu3  ;;  %v3106_v62 = vpop.f32.mrf.mxu0 }
 0x50c   : > { %v3195_v38 = vpop.f32.mrf.mxu1  ;;  %v3107_v10 = vadd.f32 %v3106_v62, %v7008_v21 }
 0x50d   : > { %v3372_v22 = vadd.f32 %v3371_v52, %v3283_v30 }
 0x50e   : > { %v3196_v12 = vadd.f32 %v3195_v38, %v3107_v10 }
 0x50f   : > { %v3449_v6 = vpack.c.bf16 %v3372_v22, %v7009_v42 }
 0x511   : > { %3513 = vst [vmem:[%s5920_s20 + $0x68] sm:$0xff] %v3449_v6  ;;  %v7015_v6 = vld [vmem:[#allocation64_spill] sm:$0xff] }
 0x512   : > { %v3284_v37 = vpop.f32.mrf.mxu2 }
 0x513   : > { %v3285_v25 = vadd.f32 %v3284_v37, %v3196_v12  ;;  %v3373_v23 = vpop.f32.mrf.mxu3  ;;  %v3109_v60 = vpop.f32.mrf.mxu0  ;;  %v7016_v37 = vld [vmem:[#allocation65_spill] sm:$0xff] }
 0x514   : > { %v3198_v17 = vpop.f32.mrf.mxu1  ;;  %v3110_v57 = vadd.f32 %v3109_v60, %v6203_v13 }
 0x515   : > { %v3374_v18 = vadd.f32 %v3373_v23, %v3285_v25 }
 0x516   : > { %3148 = vmatmul.bf16.gmra.mxu0 %v7010_v5  ;;  %3237 = vmatmul.bf16.gmra.mxu1 %v7012_v11  ;;  %v3199_v28 = vadd.f32 %v3198_v17, %v3110_v57 }
 0x517   : > { %v3451_v16 = vpack.c.bf16 %v3374_v18, %v7011_v49  ;;  %3326 = vmatmul.bf16.gmra.mxu2 %v7013_v19  ;;  %v7019_v49 = vld [vmem:[#allocation73_spill] sm:$0xff] }
 0x518   : > { %3415 = vmatmul.bf16.gmra.mxu3 %v7014_v48 }
 0x519   : > { %3515 = vst [vmem:[%s5920_s20 + $0x78] sm:$0xff] %v3451_v16 }
 0x51a   : > { %v3287_v44 = vpop.f32.mrf.mxu2 }
 0x51b   : > { %v3288_v45 = vadd.f32 %v3287_v44, %v3199_v28  ;;  %v3376_v41 = vpop.f32.mrf.mxu3  ;;  %v3111_v32 = vpop.f32.mrf.mxu0 }
 0x51c   : > { %v3200_v47 = vpop.f32.mrf.mxu1  ;;  %v3112_v13 = vadd.f32 %v3111_v32, %v6208_v15  ;;  %v7017_v15 = vld [vmem:[#allocation66_spill] sm:$0xff] }
 0x51d   : > { %v3377_v54 = vadd.f32 %v3376_v41, %v3288_v45  ;;  %v7020_v32 = vld [vmem:[#allocation70_spill] sm:$0xff] }
 0x51e   : > { %v3201_v30 = vadd.f32 %v3200_v47, %v3112_v13  ;;  %v7021_v47 = vld [vmem:[#allocation99_spill] sm:$0xff] }
 0x51f   : > { %v3453_v3 = vpack.c.bf16 %v3377_v54, %v6201_v59  ;;  %v7018_v59 = vld [vmem:[#allocation96_spill] sm:$0xff]  ;;  %v7022_v13 = vld [vmem:[#allocation71_spill] sm:$0xff] }
 0x521   : > { %3517 = vst [vmem:[%s5920_s20 + $0x88] sm:$0xff] %v3453_v3  ;;  %v7024_v3 = vld [vmem:[#allocation98_spill] sm:$0xff] }
 0x522   : > { %v3289_v52 = vpop.f32.mrf.mxu2 }
 0x523   : > { %v3290_v62 = vadd.f32 %v3289_v52, %v3201_v30  ;;  %v3378_v38 = vpop.f32.mrf.mxu3  ;;  %v3114_v22 = vpop.f32.mrf.mxu0 }
 0x524   : > { %v3203_v21 = vpop.f32.mrf.mxu1  ;;  %v3115_v42 = vadd.f32 %v3114_v22, %v6217_v36 }
 0x525   : > { %v3379_v10 = vadd.f32 %v3378_v38, %v3290_v62 }
 0x526   : > { %3153 = vmatmul.bf16.gmra.mxu0 %v7015_v6  ;;  %3242 = vmatmul.bf16.gmra.mxu1 %v7016_v37  ;;  %v3204_v25 = vadd.f32 %v3203_v21, %v3115_v42  ;;  %v7026_v6 = vld [vmem:[#allocation101_spill] sm:$0xff] }
 0x527   : > { %v3455_v12 = vpack.c.bf16 %v3379_v10, %v6206_v20  ;;  %3331 = vmatmul.bf16.gmra.mxu2 %v7017_v15 }
 0x528   : > { %3420 = vmatmul.bf16.gmra.mxu3 %v7018_v59 }
 0x529   : > { %3519 = vst [vmem:[%s5920_s20 + $0x98] sm:$0xff] %v3455_v12 }
 0x52a   : > { %v3292_v23 = vpop.f32.mrf.mxu2 }
 0x52b   : > { %v3293_v60 = vadd.f32 %v3292_v23, %v3204_v25  ;;  %v3381_v17 = vpop.f32.mrf.mxu3  ;;  %v3116_v18 = vpop.f32.mrf.mxu0 }
 0x52c   : > { %v3205_v57 = vpop.f32.mrf.mxu1  ;;  %v3117_v36 = vadd.f32 %v3116_v18, %v6222_v7  ;;  %v7023_v7 = vld [vmem:[#allocation72_spill] sm:$0xff] }
 0x52d   : > { %v3382_v5 = vadd.f32 %v3381_v17, %v3293_v60 }
 0x52e   : > { %v3206_v20 = vadd.f32 %v3205_v57, %v3117_v36  ;;  %v7027_v57 = vld [vmem:[#allocation75_spill] sm:$0xff] }
 0x52f   : > { %v3457_v16 = vpack.c.bf16 %v3382_v5, %v7019_v49  ;;  %v7028_v5 = vld [vmem:[#allocation103_spill] sm:$0xff]  ;;  %v7029_v49 = vld [vmem:[#allocation76_spill] sm:$0xff] }
 0x531   : > { %3521 = vst [vmem:[%s5920_s20 + $0xa8] sm:$0xff] %v3457_v16  ;;  %v7030_v16 = vld [vmem:[#allocation77_spill] sm:$0xff] }
 0x532   : > { %v3294_v11 = vpop.f32.mrf.mxu2 }
 0x533   : > { %v3295_v19 = vadd.f32 %v3294_v11, %v3206_v20  ;;  %v3383_v48 = vpop.f32.mrf.mxu3  ;;  %v3119_v28 = vpop.f32.mrf.mxu0  ;;  %v7031_v20 = vld [vmem:[#allocation102_spill] sm:$0xff] }
 0x534   : > { %v3208_v44 = vpop.f32.mrf.mxu1  ;;  %v3120_v41 = vadd.f32 %v3119_v28, %v6231_v40  ;;  %v7025_v40 = vld [vmem:[#allocation78_spill] sm:$0xff] }
 0x535   : > { %v3384_v45 = vadd.f32 %v3383_v48, %v3295_v19 }
 0x536   : > { %3158 = vmatmul.bf16.gmra.mxu0 %v7020_v32  ;;  %3247 = vmatmul.bf16.gmra.mxu1 %v7022_v13  ;;  %v3209_v30 = vadd.f32 %v3208_v44, %v3120_v41  ;;  %v7032_v32 = vld [vmem:[#allocation105_spill] sm:$0xff] }
 0x537   : > { %v3459_v54 = vpack.c.bf16 %v3384_v45, %v7021_v47  ;;  %3336 = vmatmul.bf16.gmra.mxu2 %v7023_v7 }
 0x538   : > { %3425 = vmatmul.bf16.gmra.mxu3 %v7024_v3 }
 0x539   : > { %3523 = vst [vmem:[%s5920_s20 + $0xb8] sm:$0xff] %v3459_v54 }
 0x53a   : > { %v3297_v52 = vpop.f32.mrf.mxu2 }
 0x53b   : > { %v3298_v62 = vadd.f32 %v3297_v52, %v3209_v30  ;;  %v3386_v38 = vpop.f32.mrf.mxu3  ;;  %v3121_v22 = vpop.f32.mrf.mxu0 }
 0x53c   : > { %v3210_v21 = vpop.f32.mrf.mxu1  ;;  %v3122_v42 = vadd.f32 %v3121_v22, %v7025_v40  ;;  %v7033_v22 = vld [vmem:[#allocation80_spill] sm:$0xff] }
 0x53d   : > { %v3387_v10 = vadd.f32 %v3386_v38, %v3298_v62 }
 0x53e   : > { %v3211_v37 = vadd.f32 %v3210_v21, %v3122_v42 }
 0x53f   : > { %v3461_v12 = vpack.c.bf16 %v3387_v10, %v7026_v6 }
 0x541   : > { %3525 = vst [vmem:[%s5920_s20 + $0xc8] sm:$0xff] %v3461_v12 }
 0x542   : > { %v3299_v15 = vpop.f32.mrf.mxu2 }
 0x543   : > { %v3300_v59 = vadd.f32 %v3299_v15, %v3211_v37  ;;  %v3388_v25 = vpop.f32.mrf.mxu3  ;;  %v3124_v23 = vpop.f32.mrf.mxu0 }
 0x544   : > { %v3213_v60 = vpop.f32.mrf.mxu1  ;;  %v3125_v18 = vadd.f32 %v3124_v23, %v6245_v31 }
 0x545   : > { %v3389_v17 = vadd.f32 %v3388_v25, %v3300_v59 }
 0x546   : > { %3163 = vmatmul.bf16.gmra.mxu0 %v7027_v57  ;;  %3252 = vmatmul.bf16.gmra.mxu1 %v7029_v49  ;;  %v3214_v11 = vadd.f32 %v3213_v60, %v3125_v18 }
 0x547   : > { %v3463_v36 = vpack.c.bf16 %v3389_v17, %v7028_v5  ;;  %3341 = vmatmul.bf16.gmra.mxu2 %v7030_v16 }
 0x548   : > { %3430 = vmatmul.bf16.gmra.mxu3 %v7031_v20 }
 0x549   : > { %3527 = vst [vmem:[%s5920_s20 + $0xd8] sm:$0xff] %v3463_v36 }
 0x54a   : > { %v3302_v19 = vpop.f32.mrf.mxu2 }
 0x54b   : > { %v3303_v48 = vadd.f32 %v3302_v19, %v3214_v11  ;;  %v3391_v28 = vpop.f32.mrf.mxu3  ;;  %v3126_v44 = vpop.f32.mrf.mxu0 }
 0x54c   : > { %v3215_v45 = vpop.f32.mrf.mxu1  ;;  %v3127_v41 = vadd.f32 %v3126_v44, %v6250_v39 }
 0x54d   : > { %v3392_v31 = vadd.f32 %v3391_v28, %v3303_v48  ;;  %v7034_v28 = vld [vmem:[#allocation104_spill] sm:$0xff] }
 0x54e   : > { %v3216_v54 = vadd.f32 %v3215_v45, %v3127_v41 }
 0x54f   : > { %v3465_v47 = vpack.c.bf16 %v3392_v31, %v7032_v32 }
 0x551   : > { %3529 = vst [vmem:[%s5920_s20 + $0xe8] sm:$0xff] %v3465_v47 }
 0x552   : > { %v3304_v13 = vpop.f32.mrf.mxu2 }
 0x553   : > { %v3305_v7 = vadd.f32 %v3304_v13, %v3216_v54  ;;  %v3393_v3 = vpop.f32.mrf.mxu3  ;;  %v3129_v30 = vpop.f32.mrf.mxu0  ;;  %v7035_v13 = vld [vmem:[#allocation11_spill] sm:$0xff] }
 0x554   : > { %v3218_v52 = vpop.f32.mrf.mxu1  ;;  %v3130_v38 = vadd.f32 %v3129_v30, %v6259_v9 }
 0x555   : > { %v3394_v62 = vadd.f32 %v3393_v3, %v3305_v7 }
 0x556   : > { %v3219_v10 = vadd.f32 %v3218_v52, %v3130_v38 }
 0x557   : > { %v3467_v21 = vpack.c.bf16 %v3394_v62, %v7033_v22 }
 0x559   : > { %3531 = vst [vmem:[%s5920_s20 + $0xf8] sm:$0xff] %v3467_v21 }
 0x55a   : > { %v3307_v40 = vpop.f32.mrf.mxu2 }
 0x55b   : > { %v3308_v42 = vadd.f32 %v3307_v40, %v3219_v10  ;;  %v3396_v39 = vpop.f32.mrf.mxu3  ;;  %v3131_v6 = vpop.f32.mrf.mxu0 }
 0x55c   : > { %v3220_v12 = vpop.f32.mrf.mxu1  ;;  %v3132_v15 = vadd.f32 %v3131_v6, %v6264_v61 }
 0x55d   : > { %v3397_v37 = vadd.f32 %v3396_v39, %v3308_v42 }
 0x55e   : > { %v3221_v25 = vadd.f32 %v3220_v12, %v3132_v15 }
 0x55f   : > { %v3469_v59 = vpack.c.bf16 %v3397_v37, %v6257_v50 }
 0x561   : > { %3533 = vst [vmem:[%s5920_s20 + $0x108] sm:$0xff] %v3469_v59 }
 0x562   : > { %v3309_v23 = vpop.f32.mrf.mxu2 }
 0x563   : > { %v3310_v60 = vadd.f32 %v3309_v23, %v3221_v25  ;;  %v3398_v9 = vpop.f32.mrf.mxu3  ;;  %v3134_v17 = vpop.f32.mrf.mxu0 }
 0x564   : > { %v3223_v18 = vpop.f32.mrf.mxu1  ;;  %v3135_v5 = vadd.f32 %v3134_v17, %v6273_v58 }
 0x565   : > { %v3399_v57 = vadd.f32 %v3398_v9, %v3310_v60 }
 0x566   : > { %v3224_v49 = vadd.f32 %v3223_v18, %v3135_v5 }
 0x567   : > { %v3471_v36 = vpack.c.bf16 %v3399_v57, %v6262_v2  ;;  %v7036_v57 = vld [vmem:[#allocation17_spill] sm:$0xff] }
 0x569   : > { %3535 = vst [vmem:[%s5920_s20 + $0x118] sm:$0xff] %v3471_v36 }
 0x56a   : > { %v3312_v16 = vpop.f32.mrf.mxu2 }
 0x56b   : > { %v3313_v20 = vadd.f32 %v3312_v16, %v3224_v49  ;;  %v3401_v61 = vpop.f32.mrf.mxu3  ;;  %v3136_v50 = vpop.f32.mrf.mxu0 }
 0x56c   : > { %v3225_v11 = vpop.f32.mrf.mxu1  ;;  %v3137_v48 = vadd.f32 %v3136_v50, %v6278_v33 }
 0x56d   : > { %v3402_v19 = vadd.f32 %v3401_v61, %v3313_v20 }
 0x56e   : > { %v3226_v45 = vadd.f32 %v3225_v11, %v3137_v48  ;;  %v7037_v11 = vld [vmem:[#allocation106_spill] sm:$0xff] }
 0x56f   : > { %v3473_v44 = vpack.c.bf16 %v3402_v19, %v7034_v28 }
 0x571   : > { %3537 = vst [vmem:[%s5920_s20 + $0x128] sm:$0xff] %v3473_v44 }
 0x572   : > { %v3314_v31 = vpop.f32.mrf.mxu2 }
 0x573   : > { %v3315_v41 = vadd.f32 %v3314_v31, %v3226_v45  ;;  %v3403_v58 = vpop.f32.mrf.mxu3  ;;  %v3139_v2 = vpop.f32.mrf.mxu0 }
 0x574   : > { %v3228_v32 = vpop.f32.mrf.mxu1  ;;  %v3140_v54 = vadd.f32 %v3139_v2, %v6287_v46 }
 0x575   : > { %v3404_v47 = vadd.f32 %v3403_v58, %v3315_v41 }
 0x576   : > { %v3229_v3 = vadd.f32 %v3228_v32, %v3140_v54 }
 0x577   : > { %v3475_v7 = vpack.c.bf16 %v3404_v47, %v7035_v13 }
 0x579   : > { %3539 = vst [vmem:[%s5920_s20 + $0x138] sm:$0xff] %v3475_v7 }
 0x57a   : > { %v3317_v30 = vpop.f32.mrf.mxu2 }
 0x57b   : > { %v3318_v52 = vadd.f32 %v3317_v30, %v3229_v3  ;;  %v3406_v33 = vpop.f32.mrf.mxu3  ;;  %v3141_v62 = vpop.f32.mrf.mxu0 }
 0x57c   : > { %v3230_v38 = vpop.f32.mrf.mxu1  ;;  %v3142_v21 = vadd.f32 %v3141_v62, %v6292_v34 }
 0x57d   : > { %v3407_v22 = vadd.f32 %v3406_v33, %v3318_v52 }
 0x57e   : > { %v3231_v40 = vadd.f32 %v3230_v38, %v3142_v21 }
 0x57f   : > { %v3477_v10 = vpack.c.bf16 %v3407_v22, %v6285_v1 }
 0x581   : > { %3541 = vst [vmem:[%s5920_s20 + $0x148] sm:$0xff] %v3477_v10 }
 0x582   : > { %v3319_v42 = vpop.f32.mrf.mxu2 }
 0x583   : > { %v3320_v39 = vadd.f32 %v3319_v42, %v3231_v40  ;;  %v3408_v46 = vpop.f32.mrf.mxu3  ;;  %v3144_v6 = vpop.f32.mrf.mxu0  ;;  %v7038_v40 = vld [vmem:[#allocation15_spill] sm:$0xff] }
 0x584   : > { %v3233_v12 = vpop.f32.mrf.mxu1  ;;  %v3145_v15 = vadd.f32 %v3144_v6, %v6301_v14 }
 0x585   : > { %v3409_v37 = vadd.f32 %v3408_v46, %v3320_v39 }
 0x586   : > { %v3234_v25 = vadd.f32 %v3233_v12, %v3145_v15 }
 0x587   : > { %v3479_v59 = vpack.c.bf16 %v3409_v37, %v6290_v27 }
 0x589   : > { %3543 = vst [vmem:[%s5920_s20 + $0x158] sm:$0xff] %v3479_v59  ;;  %v7039_v59 = vld [vmem:[#allocation107_spill] sm:$0xff] }
 0x58a   : > { %v3322_v23 = vpop.f32.mrf.mxu2 }
 0x58b   : > { %v3323_v60 = vadd.f32 %v3322_v23, %v3234_v25  ;;  %v3411_v34 = vpop.f32.mrf.mxu3  ;;  %v3146_v1 = vpop.f32.mrf.mxu0 }
 0x58c   : > { %v3235_v9 = vpop.f32.mrf.mxu1  ;;  %v3147_v18 = vadd.f32 %v3146_v1, %v6306_v43 }
 0x58d   : > { %v3412_v17 = vadd.f32 %v3411_v34, %v3323_v60 }
 0x58e   : > { %v3236_v36 = vadd.f32 %v3235_v9, %v3147_v18 }
 0x58f   : > { %v3481_v5 = vpack.c.bf16 %v3412_v17, %v7036_v57 }
 0x591   : > { %3545 = vst [vmem:[%s5920_s20 + $0x168] sm:$0xff] %v3481_v5 }
 0x592   : > { %v3324_v49 = vpop.f32.mrf.mxu2 }
 0x593   : > { %v3325_v16 = vadd.f32 %v3324_v49, %v3236_v36  ;;  %v3413_v14 = vpop.f32.mrf.mxu3  ;;  %v3149_v27 = vpop.f32.mrf.mxu0 }
 0x594   : > { %v3238_v20 = vpop.f32.mrf.mxu1  ;;  %v3150_v50 = vadd.f32 %v3149_v27, %v6315_v53 }
 0x595   : > { %v3414_v61 = vadd.f32 %v3413_v14, %v3325_v16 }
 0x596   : > { %v3239_v48 = vadd.f32 %v3238_v20, %v3150_v50 }
 0x597   : > { %v3483_v19 = vpack.c.bf16 %v3414_v61, %v7037_v11 }
 0x599   : > { %3547 = vst [vmem:[%s5920_s20 + $0x178] sm:$0xff] %v3483_v19 }
 0x59a   : > { %v3327_v28 = vpop.f32.mrf.mxu2 }
 0x59b   : > { %v3328_v44 = vadd.f32 %v3327_v28, %v3239_v48  ;;  %v3416_v43 = vpop.f32.mrf.mxu3  ;;  %v3151_v45 = vpop.f32.mrf.mxu0 }
 0x59c   : > { %v3240_v31 = vpop.f32.mrf.mxu1  ;;  %v3152_v58 = vadd.f32 %v3151_v45, %v6320_v55 }
 0x59d   : > { %v3417_v41 = vadd.f32 %v3416_v43, %v3328_v44  ;;  %v7040_v44 = vld [vmem:[#allocation18_spill] sm:$0xff] }
 0x59e   : > { %v3241_v32 = vadd.f32 %v3240_v31, %v3152_v58 }
 0x59f   : > { %v3485_v2 = vpack.c.bf16 %v3417_v41, %v6313_v24 }
 0x5a1   : > { %3549 = vst [vmem:[%s5920_s20 + $0x188] sm:$0xff] %v3485_v2 }
 0x5a2   : > { %v3329_v47 = vpop.f32.mrf.mxu2 }
 0x5a3   : > { %v3330_v54 = vadd.f32 %v3329_v47, %v3241_v32  ;;  %v3418_v53 = vpop.f32.mrf.mxu3  ;;  %v3154_v13 = vpop.f32.mrf.mxu0 }
 0x5a4   : > { %v3243_v7 = vpop.f32.mrf.mxu1  ;;  %v3155_v30 = vadd.f32 %v3154_v13, %v6329_v4 }
 0x5a5   : > { %v3419_v3 = vadd.f32 %v3418_v53, %v3330_v54 }
 0x5a6   : > { %v3244_v33 = vadd.f32 %v3243_v7, %v3155_v30 }
 0x5a7   : > { %v3487_v52 = vpack.c.bf16 %v3419_v3, %v6318_v51 }
 0x5a9   : > { %3551 = vst [vmem:[%s5920_s20 + $0x198] sm:$0xff] %v3487_v52 }
 0x5aa   : > { %v3332_v62 = vpop.f32.mrf.mxu2 }
 0x5ab   : > { %v3333_v38 = vadd.f32 %v3332_v62, %v3244_v33  ;;  %v3421_v55 = vpop.f32.mrf.mxu3  ;;  %v3156_v24 = vpop.f32.mrf.mxu0 }
 0x5ac   : > { %v3245_v22 = vpop.f32.mrf.mxu1  ;;  %v3157_v10 = vadd.f32 %v3156_v24, %v6334_v29 }
 0x5ad   : > { %v3422_v21 = vadd.f32 %v3421_v55, %v3333_v38 }
 0x5ae   : > { %v3246_v39 = vadd.f32 %v3245_v22, %v3157_v10 }
 0x5af   : > { %v3489_v42 = vpack.c.bf16 %v3422_v21, %v7038_v40 }
 0x5b1   : > { %3553 = vst [vmem:[%s5920_s20 + $0x1a8] sm:$0xff] %v3489_v42 }
 0x5b2   : > { %v3334_v46 = vpop.f32.mrf.mxu2 }
 0x5b3   : > { %v3335_v6 = vadd.f32 %v3334_v46, %v3246_v39  ;;  %v3423_v4 = vpop.f32.mrf.mxu3  ;;  %v3159_v51 = vpop.f32.mrf.mxu0 }
 0x5b4   : > { %v3248_v12 = vpop.f32.mrf.mxu1  ;;  %v3160_v15 = vadd.f32 %v3159_v51, %v6343_v35 }
 0x5b5   : > { %v3424_v37 = vadd.f32 %v3423_v4, %v3335_v6 }
 0x5b6   : > { %v3249_v23 = vadd.f32 %v3248_v12, %v3160_v15 }
 0x5b7   : > { %v3491_v25 = vpack.c.bf16 %v3424_v37, %v7039_v59 }
 0x5b9   : > { %3555 = vst [vmem:[%s5920_s20 + $0x1b8] sm:$0xff] %v3491_v25 }
 0x5ba   : > { %v3337_v60 = vpop.f32.mrf.mxu2 }
 0x5bb   : > { %v3338_v34 = vadd.f32 %v3337_v60, %v3249_v23  ;;  %v3426_v29 = vpop.f32.mrf.mxu3  ;;  %v3161_v1 = vpop.f32.mrf.mxu0 }
 0x5bc   : > { %v3250_v9 = vpop.f32.mrf.mxu1  ;;  %v3162_v18 = vadd.f32 %v3161_v1, %v6348_v8 }
 0x5bd   : > { %v3427_v17 = vadd.f32 %v3426_v29, %v3338_v34 }
 0x5be   : > { %v3251_v5 = vadd.f32 %v3250_v9, %v3162_v18 }
 0x5bf   : > { %v3493_v57 = vpack.c.bf16 %v3427_v17, %v6341_v63 }
 0x5c1   : > { %3557 = vst [vmem:[%s5920_s20 + $0x1c8] sm:$0xff] %v3493_v57 }
 0x5c2   : > { %v3339_v36 = vpop.f32.mrf.mxu2 }
 0x5c3   : > { %v3340_v35 = vadd.f32 %v3339_v36, %v3251_v5  ;;  %v3428_v49 = vpop.f32.mrf.mxu3  ;;  %v3164_v16 = vpop.f32.mrf.mxu0 }
 0x5c4   : > { %v3165_v27 = vadd.f32 %v3164_v16, %v6357_v0  ;;  %v3253_v20 = vpop.f32.mrf.mxu1 }
 0x5c5   : > { %v3429_v14 = vadd.f32 %v3428_v49, %v3340_v35 }
 0x5c6   : > { %v3254_v50 = vadd.f32 %v3253_v20, %v3165_v27 }
 0x5c7   : > { %v3495_v61 = vpack.c.bf16 %v3429_v14, %v6346_v26 }
 0x5c9   : > { %3559 = vst [vmem:[%s5920_s20 + $0x1d8] sm:$0xff] %v3495_v61 }
 0x5ca   : > { %v3342_v8 = vpop.f32.mrf.mxu2 }
 0x5cb   : > { %v3343_v11 = vadd.f32 %v3342_v8, %v3254_v50  ;;  %v3431_v63 = vpop.f32.mrf.mxu3  ;;  %v3166_v19 = vpop.f32.mrf.mxu0 }
 0x5cc   : > { %v3167_v28 = vadd.f32 %v3166_v19, %v6362_v56  ;;  %v3255_v45 = vpop.f32.mrf.mxu1  ;;  %v7041_v56 = vld [vmem:[#allocation82_spill] sm:$0xff] }
 0x5cd   : > { %v3432_v48 = vadd.f32 %v3431_v63, %v3343_v11 }
 0x5ce   : > { %v3256_v26 = vadd.f32 %v3255_v45, %v3167_v28 }
 0x5cf   : > { %v3497_v43 = vpack.c.bf16 %v3432_v48, %v7040_v44 }
 0x5d1   : > { %3561 = vst [vmem:[%s5920_s20 + $0x1e8] sm:$0xff] %v3497_v43 }
 0x5d2   : > { %v3344_v0 = vpop.f32.mrf.mxu2 }
 0x5d3   : > { %v3345_v31 = vadd.f32 %v3344_v0, %v3256_v26  ;;  %v3433_v41 = vpop.f32.mrf.mxu3 }
 0x5d5   : > { %v3434_v58 = vadd.f32 %v3433_v41, %v3345_v31 }
 0x5d7   : > { %v3499_v2 = vpack.c.bf16 %v3434_v58, %v7041_v56 }
 0x5d9   : > { %3563 = vst [vmem:[%s5920_s20 + $0x1f8] sm:$0xff] %v3499_v2 }
 0x5da   : > { %5035 = shalt.err (!%p5032_p10)
}
 0x5db   : > { %s5085_s5 = smov 256   ;;  %s5086_s6 = smov 16  }
 0x5dc   : > { %4891 = dma.vmem_to_hbm [thread:$0]  (%p5169_p7), %s3579_s21, 8192, %s3581_s22, %s3565_s13, %s5085_s5, %s5085_s5, %s5086_s6  }
 0x5dd PF: > { %s3595_s7 = sand.u32 1, %s5066_s9   ;;  %p7042_p12 = scmp.ge.s32.totalorder %s5078_s12, 2 }
 0x5de   : > { %s3596_s17 = scalar_lea.sflag [#allocation4], %s3595_s7 }
 0x5df   : > { %p4902_p13 = pnand %p7042_p12, %p5137_p6 }
 0x5e1   : > { %p4903_p0 = pneg %p4902_p13 }
 0x5e3   : > { %5061 = dma.done.wait (%p4903_p0), %s3596_s17, 8192  }
 0x5e4   : > { %5063 = vsyncadd (%p4903_p0), %s3596_s17, 4294959104  ;;  %p16_p3 = scmp.ge.s32.totalorder %s5155_s23, 4   ;;  %s7043_s9 = smov %s5070_s10 }
 0x5e5   : > { %s7044_s10 = smov %s5074_s11  ;;  %s7045_s11 = smov %s5165_s28 }
 0x5e6   : > { %s7046_s12 = smov %s5155_s23  ;;  %18 = sbr.rel (!%p16_p3) target bundleno = 6 (0x6), region = 77 }
 0x5eb   :  { %3602 = vsyncpa [#allocation3], 1 }
 0x5ec   :  { %3604 = vsyncpa [#allocation3 + $0x1], 1 }
 0x5ed   :  { %3605 = vsyncpa [#allocation6], 1 }
 0x5ee   :  { %3606 = vsyncpa [#allocation4], 1 }
 0x5ef   :  { %3608 = vsyncpa [#allocation4 + $0x1], 1 }

</bundles_post_ra>
